<compile_context>
chip_gen: v7x
topology: tpu7x:2x2x1
jax: 0.10.0
libtpu: 0.0.40
codegen_flags: <defaults>
</compile_context>

<pallas_src>
import jax
import jax.numpy as jnp
from jax.experimental import pallas as pl
from jax.experimental.pallas import tpu as pltpu

INPUT_SIZE = 4          # already even, no padding needed
LATENT_SIZE = 2
HIDDEN = 64
HALF = INPUT_SIZE // 2  # coupling-layer half width
N_COUPLING = 3          # masks has 6 rows -> len(self.t) == 3
NEG_SLOPE = 0.01        # nn.LeakyReLU default
IS_NORMALIZED = True
OUT_ROWS = INPUT_SIZE + 3 * LATENT_SIZE   # x_hat(4) | h_t(2) | h_t1(2) | h_t1_hat(2)

assert LATENT_SIZE <= HALF  # encoding slice stays inside the "lo" half


def _leaky_relu(x):
    return jnp.where(x > 0, x, NEG_SLOPE * x)


# ---------------------------------------------------------------------------
# fused Pallas kernel: flow.f(x_t), flow.f(x_t1) -> dynamics -> flow.g
# layout: (features, batch) — features on sublanes, batch on lanes
# ---------------------------------------------------------------------------
def nisnet_kernel(xt_ref, xt1_ref, noise_ref,
                  fp1, fw2, fw3, fb3,          # fused s|t flow nets (pre-T)
                  dp1, dw2, dw3, db3,          # dynamics MLP (pre-T)
                  out_ref):
    f32 = jnp.float32

    def coupling(lo, hi, i, inverse):
        # mask row i: i even -> [0,0,1,1] (cond = hi, trans = lo)
        #             i odd  -> [1,1,0,0] (cond = lo, trans = hi)
        cond = hi if i % 2 == 0 else lo
        trans = lo if i % 2 == 0 else hi
        p1 = fp1[i]                                   # (2H, 4) = [W1 | b1 | b2]
        w1 = p1[:, 0:HALF]
        b1 = p1[:, HALF:HALF + 1]
        b2 = p1[:, HALF + 1:HALF + 2]
        h = _leaky_relu(jnp.dot(w1, cond, preferred_element_type=f32) + b1)
        h = _leaky_relu(jnp.dot(fw2[i], h, preferred_element_type=f32) + b2)
        st = jnp.dot(fw3[i], h, preferred_element_type=f32) + fb3[i]   # (4, tile)
        s = jnp.tanh(st[:HALF, :])                    # s-net has a final Tanh
        t = st[HALF:, :]
        if inverse:                                   # flow.f: z = (z - t) * exp(-s)
            new_trans = (trans - t) * jnp.exp(-s)
        else:                                         # flow.g: x = x * exp(s) + t
            new_trans = trans * jnp.exp(s) + t
        return (new_trans, hi) if i % 2 == 0 else (lo, new_trans)

    def flow_f(x):                                    # x: (INPUT_SIZE, tile)
        lo, hi = x[:HALF, :], x[HALF:, :]
        for i in range(N_COUPLING - 1, -1, -1):       # static unroll (3 layers)
            lo, hi = coupling(lo, hi, i, inverse=True)
        return lo, hi

    def flow_g(lo, hi):
        for i in range(N_COUPLING):
            lo, hi = coupling(lo, hi, i, inverse=False)
        return lo, hi

    # --- encoding -----------------------------------------------------------
    zlo_t, _ = flow_f(xt_ref[...].astype(f32))
    zlo_t1, _ = flow_f(xt1_ref[...].astype(f32))
    h_t = zlo_t[:LATENT_SIZE, :]                      # (2, tile)
    h_t1 = zlo_t1[:LATENT_SIZE, :]

    # --- dynamics + residual (+ tanh when normalized) ------------------------
    p1 = dp1[...]                                     # (HIDDEN, 4) = [W1 | b1 | b2]
    w1 = p1[:, 0:LATENT_SIZE]
    b1 = p1[:, LATENT_SIZE:LATENT_SIZE + 1]
    b2 = p1[:, LATENT_SIZE + 1:LATENT_SIZE + 2]
    y = _leaky_relu(jnp.dot(w1, h_t, preferred_element_type=f32) + b1)
    y = _leaky_relu(jnp.dot(dw2[...], y, preferred_element_type=f32) + b2)
    y = jnp.dot(dw3[...], y, preferred_element_type=f32) + db3[...] + h_t
    if IS_NORMALIZED:
        y = jnp.tanh(y)

    # --- decoding: flow.g on (y | noise), no concat needed -------------------
    out_lo, out_hi = flow_g(y, noise_ref[...].astype(f32))

    # --- single merged output slab -------------------------------------------
    dt = out_ref.dtype
    out_ref[0:HALF, :] = out_lo.astype(dt)
    out_ref[HALF:INPUT_SIZE, :] = out_hi.astype(dt)
    out_ref[INPUT_SIZE:INPUT_SIZE + LATENT_SIZE, :] = h_t.astype(dt)
    out_ref[INPUT_SIZE + LATENT_SIZE:INPUT_SIZE + 2 * LATENT_SIZE, :] = h_t1.astype(dt)
    out_ref[INPUT_SIZE + 2 * LATENT_SIZE:OUT_ROWS, :] = y.astype(dt)


# ---------------------------------------------------------------------------
# wrapper: batch-tiled (lanes) pallas_call with VMEM-resident weights
# ---------------------------------------------------------------------------
def _choose_tiling(batch, max_tile):
    if batch <= max_tile:
        # give the v7x megacore >=2 grid steps when the batch allows a
        # 128-aligned split; otherwise a single full-batch tile (always legal).
        if batch >= 256 and batch % 256 == 0:
            return batch // 2, batch
        return batch, batch
    tile = max_tile                                   # multiple of 128
    padded = ((batch + tile - 1) // tile) * tile
    return tile, padded


def nisnet_forward(x_t, x_t1, params, noise, L=1, num_samples=1000, *,
                   max_tile=2048):
    batch = x_t.shape[0]
    tile, padded = _choose_tiling(batch, max_tile)

    # transpose once in the wrapper: (batch, feat) -> (feat, batch)
    xt, xt1, nz = x_t.T, x_t1.T, noise.T
    if padded != batch:
        pad = ((0, 0), (0, padded - batch))
        xt, xt1, nz = jnp.pad(xt, pad), jnp.pad(xt1, pad), jnp.pad(nz, pad)
    grid = (padded // tile,)

    def col_spec(rows):
        return pl.BlockSpec((rows, tile), lambda i: (0, i))

    def const_spec(a):                                # weights: VMEM-resident
        nd = a.ndim
        return pl.BlockSpec(a.shape, lambda i, nd=nd: (0,) * nd)

    weight_args = (params['fp1'], params['fw2'], params['fw3'], params['fb3'],
                   params['dp1'], params['dw2'], params['dw3'], params['db3'])

    slab = pl.pallas_call(
        nisnet_kernel,
        grid=grid,
        in_specs=[col_spec(INPUT_SIZE), col_spec(INPUT_SIZE),
                  col_spec(INPUT_SIZE - LATENT_SIZE)]
                 + [const_spec(a) for a in weight_args],
        out_specs=col_spec(OUT_ROWS),
        out_shape=jax.ShapeDtypeStruct((OUT_ROWS, padded), x_t.dtype),
        compiler_params=pltpu.CompilerParams(
            dimension_semantics=("parallel",),
            vmem_limit_bytes=32 * 1024 * 1024),
    )(xt, xt1, nz, *weight_args)

    slab = slab[:, :batch]
    x_t1_hat = slab[0:INPUT_SIZE, :].T
    h_t = slab[INPUT_SIZE:INPUT_SIZE + LATENT_SIZE, :].T
    h_t1 = slab[INPUT_SIZE + LATENT_SIZE:INPUT_SIZE + 2 * LATENT_SIZE, :].T
    h_t1_hat = slab[INPUT_SIZE + 2 * LATENT_SIZE:OUT_ROWS, :].T

    # cal_EI_1: module default is training mode -> returns (0, 0).
    # TODO(synk): eval-mode EI path (autograd jacobian + per-sample determinant)
    # has no clean Pallas equivalent and is not implemented.
    ei_items = {'h_t': h_t, 'h_t1': h_t1, 'h_t1_hat': h_t1_hat,
                'avg_log_jacobian': jnp.float32(0.0), 'count': 0}
    return x_t1_hat, ei_items


# ---------------------------------------------------------------------------
# parameter construction (PyTorch-like uniform init) + s/t fusion + transpose
# ---------------------------------------------------------------------------
def _linear_init(key, fan_in, fan_out):
    kw, kb = jax.random.split(key)
    bound = 1.0 / jnp.sqrt(jnp.float32(fan_in))
    w = jax.random.uniform(kw, (fan_in, fan_out), jnp.float32, -bound, bound)
    b = jax.random.uniform(kb, (1, fan_out), jnp.float32, -bound, bound)
    return w, b


def make_params(key):
    keys = jax.random.split(key, 2 * N_COUPLING * 3 + 3)
    k = iter(keys)

    def net():
        return [_linear_init(next(k), fi, fo)
                for fi, fo in ((INPUT_SIZE, HIDDEN), (HIDDEN, HIDDEN),
                               (HIDDEN, INPUT_SIZE))]

    s_nets = [net() for _ in range(N_COUPLING)]
    t_nets = [net() for _ in range(N_COUPLING)]

    d1 = _linear_init(next(k), LATENT_SIZE, HIDDEN)
    d2 = _linear_init(next(k), HIDDEN, HIDDEN)
    d3 = _linear_init(next(k), HIDDEN, LATENT_SIZE)

    # masks: rows used are [mask1, mask2, mask1]; mask1 = [0,0,1,1]
    mask1 = jnp.concatenate([jnp.zeros((1, HALF), jnp.float32),
                             jnp.ones((1, HALF), jnp.float32)], axis=1)
    masks = jnp.concatenate([mask1, 1.0 - mask1, mask1], axis=0)

    # fuse s/t nets into one 128-wide MLP per coupling layer, specialize on the
    # static masks, and pre-transpose so the kernel computes W^T @ x^T.
    fp1, fw2, fw3, fb3 = [], [], [], []
    for i in range(N_COUPLING):
        cond = slice(HALF, INPUT_SIZE) if i % 2 == 0 else slice(0, HALF)
        trans = slice(0, HALF) if i % 2 == 0 else slice(HALF, INPUT_SIZE)
        (sw1, sb1), (sw2, sb2), (sw3, sb3) = s_nets[i]
        (tw1, tb1), (tw2, tb2), (tw3, tb3) = t_nets[i]

        w1_t = jnp.concatenate([sw1[cond, :], tw1[cond, :]], axis=1).T    # (128, 2)
        b1_t = jnp.concatenate([sb1, tb1], axis=1).T                      # (128, 1)
        b2_t = jnp.concatenate([sb2, tb2], axis=1).T                      # (128, 1)
        fp1.append(jnp.concatenate([w1_t, b1_t, b2_t], axis=1))           # (128, 4)

        w2 = jnp.zeros((2 * HIDDEN, 2 * HIDDEN), jnp.float32)
        w2 = w2.at[:HIDDEN, :HIDDEN].set(sw2).at[HIDDEN:, HIDDEN:].set(tw2)
        fw2.append(w2.T)                                                   # (128, 128)

        w3 = jnp.zeros((2 * HIDDEN, 2 * HALF), jnp.float32)
        w3 = w3.at[:HIDDEN, :HALF].set(sw3[:, trans])
        w3 = w3.at[HIDDEN:, HALF:].set(tw3[:, trans])
        fw3.append(w3.T)                                                   # (4, 128)
        fb3.append(jnp.concatenate([sb3[:, trans], tb3[:, trans]], axis=1).T)  # (4, 1)

    dp1 = jnp.concatenate([d1[0].T, d1[1].T, d2[1].T], axis=1)             # (64, 4)
    params = dict(fp1=jnp.stack(fp1), fw2=jnp.stack(fw2),
                  fw3=jnp.stack(fw3), fb3=jnp.stack(fb3),
                  dp1=dp1, dw2=d2[0].T, dw3=d3[0].T, db3=d3[1].T)

    raw = (s_nets, t_nets, [d1, d2, d3], masks)
    return params, raw


# ---------------------------------------------------------------------------
# pure-JAX reference (unfused, mask-based) for numerical validation
# ---------------------------------------------------------------------------
def _ref_mlp3(x, layers, final_tanh):
    (w1, b1), (w2, b2), (w3, b3) = layers
    h = _leaky_relu(x @ w1 + b1)
    h = _leaky_relu(h @ w2 + b2)
    h = h @ w3 + b3
    return jnp.tanh(h) if final_tanh else h


def _ref_flow(x, s_nets, t_nets, masks, inverse):
    order = range(N_COUPLING - 1, -1, -1) if inverse else range(N_COUPLING)
    for i in order:
        m = masks[i:i + 1]
        xm = x * m
        s = _ref_mlp3(xm, s_nets[i], True) * (1 - m)
        t = _ref_mlp3(xm, t_nets[i], False) * (1 - m)
        if inverse:
            x = (1 - m) * (x - t) * jnp.exp(-s) + xm
        else:
            x = xm + (1 - m) * (x * jnp.exp(s) + t)
    return x


def _ref_forward(x_t, x_t1, raw, noise):
    s_nets, t_nets, dyn_layers, masks = raw
    h_t = _ref_flow(x_t, s_nets, t_nets, masks, True)[:, :LATENT_SIZE]
    h_t1 = _ref_flow(x_t1, s_nets, t_nets, masks, True)[:, :LATENT_SIZE]
    h_t1_hat = _ref_mlp3(h_t, dyn_layers, False) + h_t
    if IS_NORMALIZED:
        h_t1_hat = jnp.tanh(h_t1_hat)
    z = jnp.concatenate([h_t1_hat, noise], axis=1)
    x_t1_hat = _ref_flow(z, s_nets, t_nets, masks, False)
    return x_t1_hat, h_t, h_t1, h_t1_hat


# ---------------------------------------------------------------------------
if __name__ == "__main__":
    key = jax.random.PRNGKey(0)
    k_params, k_xt, k_xt1, k_noise = jax.random.split(key, 4)

    params, raw = make_params(k_params)

    batch = 2
    x_t = jax.random.normal(k_xt, (batch, INPUT_SIZE), jnp.float32)
    x_t1 = jax.random.normal(k_xt1, (batch, INPUT_SIZE), jnp.float32)
    noise = jax.random.normal(k_noise, (batch, INPUT_SIZE - LATENT_SIZE),
                              jnp.float32)

    x_t1_hat, ei_items = nisnet_forward(x_t, x_t1, params, noise)
    jax.block_until_ready(x_t1_hat)
    jax.block_until_ready(ei_items['h_t'])
    jax.block_until_ready(ei_items['h_t1'])
    jax.block_until_ready(ei_items['h_t1_hat'])

    # validate fused/transposed kernel against the unfused pure-JAX reference
    r_xhat, r_ht, r_ht1, r_hhat = _ref_forward(x_t, x_t1, raw, noise)
    assert x_t1_hat.shape == (batch, INPUT_SIZE)
    assert ei_items['h_t'].shape == (batch, LATENT_SIZE)
    assert ei_items['h_t1'].shape == (batch, LATENT_SIZE)
    assert ei_items['h_t1_hat'].shape == (batch, LATENT_SIZE)
    assert jnp.allclose(x_t1_hat, r_xhat, atol=1e-5, rtol=1e-5)
    assert jnp.allclose(ei_items['h_t'], r_ht, atol=1e-5, rtol=1e-5)
    assert jnp.allclose(ei_items['h_t1'], r_ht1, atol=1e-5, rtol=1e-5)
    assert jnp.allclose(ei_items['h_t1_hat'], r_hhat, atol=1e-5, rtol=1e-5)

    print("KERNEL_OK")
</pallas_src>

<mosaic_0001>
module attributes {stable_mosaic.version = 11 : i64} {
  func.func @nisnet_kernel(%arg0: i32, %arg1: memref<4x2xf32, #tpu.memory_space<vmem>>, %arg2: memref<4x2xf32, #tpu.memory_space<vmem>>, %arg3: memref<2x2xf32, #tpu.memory_space<vmem>>, %arg4: memref<3x128x4xf32, #tpu.memory_space<vmem>>, %arg5: memref<3x128x128xf32, #tpu.memory_space<vmem>>, %arg6: memref<3x4x128xf32, #tpu.memory_space<vmem>>, %arg7: memref<3x4x1xf32, #tpu.memory_space<vmem>>, %arg8: memref<64x4xf32, #tpu.memory_space<vmem>>, %arg9: memref<64x64xf32, #tpu.memory_space<vmem>>, %arg10: memref<2x64xf32, #tpu.memory_space<vmem>>, %arg11: memref<2x1xf32, #tpu.memory_space<vmem>>, %arg12: memref<10x2xf32, #tpu.memory_space<vmem>>) attributes {dimension_semantics = [#tpu.dimension_semantics<parallel>], iteration_bounds = array<i64: 1>, scalar_prefetch = 0 : i64, scratch_operands = 0 : i64, tpu.core_type = #tpu.core_type<tc>, window_params = [{transform_indices = @transform_0, window_bounds = array<i64: 4, 2>}, {transform_indices = @transform_1, window_bounds = array<i64: 4, 2>}, {transform_indices = @transform_2, window_bounds = array<i64: 2, 2>}, {pipeline_mode = #tpu.pipeline_mode<synchronous>, transform_indices = @transform_3, window_bounds = array<i64: 3, 128, 4>}, {pipeline_mode = #tpu.pipeline_mode<synchronous>, transform_indices = @transform_4, window_bounds = array<i64: 3, 128, 128>}, {pipeline_mode = #tpu.pipeline_mode<synchronous>, transform_indices = @transform_5, window_bounds = array<i64: 3, 4, 128>}, {pipeline_mode = #tpu.pipeline_mode<synchronous>, transform_indices = @transform_6, window_bounds = array<i64: 3, 4, 1>}, {pipeline_mode = #tpu.pipeline_mode<synchronous>, transform_indices = @transform_7, window_bounds = array<i64: 64, 4>}, {pipeline_mode = #tpu.pipeline_mode<synchronous>, transform_indices = @transform_8, window_bounds = array<i64: 64, 64>}, {pipeline_mode = #tpu.pipeline_mode<synchronous>, transform_indices = @transform_9, window_bounds = array<i64: 2, 64>}, {pipeline_mode = #tpu.pipeline_mode<synchronous>, transform_indices = @transform_10, window_bounds = array<i64: 2, 1>}, {transform_indices = @transform_11, window_bounds = array<i64: 10, 2>}]} {
    %c0 = arith.constant 0 : index
    %c0_0 = arith.constant 0 : index
    %0 = vector.load %arg1[%c0, %c0_0] : memref<4x2xf32, #tpu.memory_space<vmem>>, vector<4x2xf32>
    %1 = vector.extract_strided_slice %0 {offsets = [0, 0], sizes = [2, 2], strides = [1, 1]} : vector<4x2xf32> to vector<2x2xf32>
    %2 = vector.extract_strided_slice %0 {offsets = [2, 0], sizes = [2, 2], strides = [1, 1]} : vector<4x2xf32> to vector<2x2xf32>
    %c2 = arith.constant 2 : index
    %c0_1 = arith.constant 0 : index
    %c0_2 = arith.constant 0 : index
    %3 = vector.load %arg4[%c2, %c0_1, %c0_2] : memref<3x128x4xf32, #tpu.memory_space<vmem>>, vector<1x128x4xf32>
    %4 = vector.shape_cast %3 : vector<1x128x4xf32> to vector<128x4xf32>
    %5 = vector.extract_strided_slice %4 {offsets = [0, 0], sizes = [128, 2], strides = [1, 1]} : vector<128x4xf32> to vector<128x2xf32>
    %6 = vector.extract_strided_slice %4 {offsets = [0, 2], sizes = [128, 1], strides = [1, 1]} : vector<128x4xf32> to vector<128x1xf32>
    %7 = vector.extract_strided_slice %4 {offsets = [0, 3], sizes = [128, 1], strides = [1, 1]} : vector<128x4xf32> to vector<128x1xf32>
    %cst = arith.constant dense<0.000000e+00> : vector<128x2xf32>
    %8 = tpu.matmul %5, %2, %cst {dimension_numbers = #tpu.dot_dimension_numbers<[1], [0], [0], [1], [0, 0, 1, 1], [], []>} : vector<128x2xf32>, vector<2x2xf32>, vector<128x2xf32> -> vector<128x2xf32>
    %9 = vector.broadcast %6 : vector<128x1xf32> to vector<128x2xf32>
    %10 = arith.addf %8, %9 : vector<128x2xf32>
    %cst_3 = arith.constant 0.000000e+00 : f32
    %11 = vector.broadcast %cst_3 : f32 to vector<128x2xf32>
    %12 = arith.cmpf ogt, %10, %11 : vector<128x2xf32>
    %cst_4 = arith.constant 0.00999999977 : f32
    %13 = vector.broadcast %cst_4 : f32 to vector<128x2xf32>
    %14 = arith.mulf %13, %10 : vector<128x2xf32>
    %15 = arith.select %12, %10, %14 : vector<128x2xi1>, vector<128x2xf32>
    %c2_5 = arith.constant 2 : index
    %c0_6 = arith.constant 0 : index
    %c0_7 = arith.constant 0 : index
    %16 = vector.load %arg5[%c2_5, %c0_6, %c0_7] : memref<3x128x128xf32, #tpu.memory_space<vmem>>, vector<1x128x128xf32>
    %17 = vector.shape_cast %16 : vector<1x128x128xf32> to vector<128x128xf32>
    %cst_8 = arith.constant dense<0.000000e+00> : vector<128x2xf32>
    %18 = tpu.matmul %17, %15, %cst_8 {dimension_numbers = #tpu.dot_dimension_numbers<[1], [0], [0], [1], [0, 0, 1, 1], [], []>} : vector<128x128xf32>, vector<128x2xf32>, vector<128x2xf32> -> vector<128x2xf32>
    %19 = vector.broadcast %7 : vector<128x1xf32> to vector<128x2xf32>
    %20 = arith.addf %18, %19 : vector<128x2xf32>
    %cst_9 = arith.constant 0.000000e+00 : f32
    %21 = vector.broadcast %cst_9 : f32 to vector<128x2xf32>
    %22 = arith.cmpf ogt, %20, %21 : vector<128x2xf32>
    %cst_10 = arith.constant 0.00999999977 : f32
    %23 = vector.broadcast %cst_10 : f32 to vector<128x2xf32>
    %24 = arith.mulf %23, %20 : vector<128x2xf32>
    %25 = arith.select %22, %20, %24 : vector<128x2xi1>, vector<128x2xf32>
    %c2_11 = arith.constant 2 : index
    %c0_12 = arith.constant 0 : index
    %c0_13 = arith.constant 0 : index
    %26 = vector.load %arg6[%c2_11, %c0_12, %c0_13] : memref<3x4x128xf32, #tpu.memory_space<vmem>>, vector<1x4x128xf32>
    %27 = vector.shape_cast %26 : vector<1x4x128xf32> to vector<4x128xf32>
    %cst_14 = arith.constant dense<0.000000e+00> : vector<4x2xf32>
    %28 = tpu.matmul %27, %25, %cst_14 {dimension_numbers = #tpu.dot_dimension_numbers<[1], [0], [0], [1], [0, 0, 1, 1], [], []>} : vector<4x128xf32>, vector<128x2xf32>, vector<4x2xf32> -> vector<4x2xf32>
    %c2_15 = arith.constant 2 : index
    %c0_16 = arith.constant 0 : index
    %c0_17 = arith.constant 0 : index
    %29 = vector.load %arg7[%c2_15, %c0_16, %c0_17] : memref<3x4x1xf32, #tpu.memory_space<vmem>>, vector<1x4x1xf32>
    %30 = vector.shape_cast %29 : vector<1x4x1xf32> to vector<4x1xf32>
    %31 = vector.broadcast %30 : vector<4x1xf32> to vector<4x2xf32>
    %32 = arith.addf %28, %31 : vector<4x2xf32>
    %33 = vector.extract_strided_slice %32 {offsets = [0, 0], sizes = [2, 2], strides = [1, 1]} : vector<4x2xf32> to vector<2x2xf32>
    %34 = math.tanh %33 : vector<2x2xf32>
    %35 = vector.extract_strided_slice %32 {offsets = [2, 0], sizes = [2, 2], strides = [1, 1]} : vector<4x2xf32> to vector<2x2xf32>
    %36 = arith.subf %1, %35 : vector<2x2xf32>
    %cst_18 = arith.constant 0.000000e+00 : f32
    %37 = vector.broadcast %cst_18 : f32 to vector<2x2xf32>
    %38 = arith.subf %37, %34 : vector<2x2xf32>
    %39 = math.exp %38 : vector<2x2xf32>
    %40 = arith.mulf %36, %39 : vector<2x2xf32>
    %c1 = arith.constant 1 : index
    %c0_19 = arith.constant 0 : index
    %c0_20 = arith.constant 0 : index
    %41 = vector.load %arg4[%c1, %c0_19, %c0_20] : memref<3x128x4xf32, #tpu.memory_space<vmem>>, vector<1x128x4xf32>
    %42 = vector.shape_cast %41 : vector<1x128x4xf32> to vector<128x4xf32>
    %43 = vector.extract_strided_slice %42 {offsets = [0, 0], sizes = [128, 2], strides = [1, 1]} : vector<128x4xf32> to vector<128x2xf32>
    %44 = vector.extract_strided_slice %42 {offsets = [0, 2], sizes = [128, 1], strides = [1, 1]} : vector<128x4xf32> to vector<128x1xf32>
    %45 = vector.extract_strided_slice %42 {offsets = [0, 3], sizes = [128, 1], strides = [1, 1]} : vector<128x4xf32> to vector<128x1xf32>
    %cst_21 = arith.constant dense<0.000000e+00> : vector<128x2xf32>
    %46 = tpu.matmul %43, %40, %cst_21 {dimension_numbers = #tpu.dot_dimension_numbers<[1], [0], [0], [1], [0, 0, 1, 1], [], []>} : vector<128x2xf32>, vector<2x2xf32>, vector<128x2xf32> -> vector<128x2xf32>
    %47 = vector.broadcast %44 : vector<128x1xf32> to vector<128x2xf32>
    %48 = arith.addf %46, %47 : vector<128x2xf32>
    %cst_22 = arith.constant 0.000000e+00 : f32
    %49 = vector.broadcast %cst_22 : f32 to vector<128x2xf32>
    %50 = arith.cmpf ogt, %48, %49 : vector<128x2xf32>
    %cst_23 = arith.constant 0.00999999977 : f32
    %51 = vector.broadcast %cst_23 : f32 to vector<128x2xf32>
    %52 = arith.mulf %51, %48 : vector<128x2xf32>
    %53 = arith.select %50, %48, %52 : vector<128x2xi1>, vector<128x2xf32>
    %c1_24 = arith.constant 1 : index
    %c0_25 = arith.constant 0 : index
    %c0_26 = arith.constant 0 : index
    %54 = vector.load %arg5[%c1_24, %c0_25, %c0_26] : memref<3x128x128xf32, #tpu.memory_space<vmem>>, vector<1x128x128xf32>
    %55 = vector.shape_cast %54 : vector<1x128x128xf32> to vector<128x128xf32>
    %cst_27 = arith.constant dense<0.000000e+00> : vector<128x2xf32>
    %56 = tpu.matmul %55, %53, %cst_27 {dimension_numbers = #tpu.dot_dimension_numbers<[1], [0], [0], [1], [0, 0, 1, 1], [], []>} : vector<128x128xf32>, vector<128x2xf32>, vector<128x2xf32> -> vector<128x2xf32>
    %57 = vector.broadcast %45 : vector<128x1xf32> to vector<128x2xf32>
    %58 = arith.addf %56, %57 : vector<128x2xf32>
    %cst_28 = arith.constant 0.000000e+00 : f32
    %59 = vector.broadcast %cst_28 : f32 to vector<128x2xf32>
    %60 = arith.cmpf ogt, %58, %59 : vector<128x2xf32>
    %cst_29 = arith.constant 0.00999999977 : f32
    %61 = vector.broadcast %cst_29 : f32 to vector<128x2xf32>
    %62 = arith.mulf %61, %58 : vector<128x2xf32>
    %63 = arith.select %60, %58, %62 : vector<128x2xi1>, vector<128x2xf32>
    %c1_30 = arith.constant 1 : index
    %c0_31 = arith.constant 0 : index
    %c0_32 = arith.constant 0 : index
    %64 = vector.load %arg6[%c1_30, %c0_31, %c0_32] : memref<3x4x128xf32, #tpu.memory_space<vmem>>, vector<1x4x128xf32>
    %65 = vector.shape_cast %64 : vector<1x4x128xf32> to vector<4x128xf32>
    %cst_33 = arith.constant dense<0.000000e+00> : vector<4x2xf32>
    %66 = tpu.matmul %65, %63, %cst_33 {dimension_numbers = #tpu.dot_dimension_numbers<[1], [0], [0], [1], [0, 0, 1, 1], [], []>} : vector<4x128xf32>, vector<128x2xf32>, vector<4x2xf32> -> vector<4x2xf32>
    %c1_34 = arith.constant 1 : index
    %c0_35 = arith.constant 0 : index
    %c0_36 = arith.constant 0 : index
    %67 = vector.load %arg7[%c1_34, %c0_35, %c0_36] : memref<3x4x1xf32, #tpu.memory_space<vmem>>, vector<1x4x1xf32>
    %68 = vector.shape_cast %67 : vector<1x4x1xf32> to vector<4x1xf32>
    %69 = vector.broadcast %68 : vector<4x1xf32> to vector<4x2xf32>
    %70 = arith.addf %66, %69 : vector<4x2xf32>
    %71 = vector.extract_strided_slice %70 {offsets = [0, 0], sizes = [2, 2], strides = [1, 1]} : vector<4x2xf32> to vector<2x2xf32>
    %72 = math.tanh %71 : vector<2x2xf32>
    %73 = vector.extract_strided_slice %70 {offsets = [2, 0], sizes = [2, 2], strides = [1, 1]} : vector<4x2xf32> to vector<2x2xf32>
    %74 = arith.subf %2, %73 : vector<2x2xf32>
    %cst_37 = arith.constant 0.000000e+00 : f32
    %75 = vector.broadcast %cst_37 : f32 to vector<2x2xf32>
    %76 = arith.subf %75, %72 : vector<2x2xf32>
    %77 = math.exp %76 : vector<2x2xf32>
    %78 = arith.mulf %74, %77 : vector<2x2xf32>
    %c0_38 = arith.constant 0 : index
    %c0_39 = arith.constant 0 : index
    %c0_40 = arith.constant 0 : index
    %79 = vector.load %arg4[%c0_38, %c0_39, %c0_40] : memref<3x128x4xf32, #tpu.memory_space<vmem>>, vector<1x128x4xf32>
    %80 = vector.shape_cast %79 : vector<1x128x4xf32> to vector<128x4xf32>
    %81 = vector.extract_strided_slice %80 {offsets = [0, 0], sizes = [128, 2], strides = [1, 1]} : vector<128x4xf32> to vector<128x2xf32>
    %82 = vector.extract_strided_slice %80 {offsets = [0, 2], sizes = [128, 1], strides = [1, 1]} : vector<128x4xf32> to vector<128x1xf32>
    %83 = vector.extract_strided_slice %80 {offsets = [0, 3], sizes = [128, 1], strides = [1, 1]} : vector<128x4xf32> to vector<128x1xf32>
    %cst_41 = arith.constant dense<0.000000e+00> : vector<128x2xf32>
    %84 = tpu.matmul %81, %78, %cst_41 {dimension_numbers = #tpu.dot_dimension_numbers<[1], [0], [0], [1], [0, 0, 1, 1], [], []>} : vector<128x2xf32>, vector<2x2xf32>, vector<128x2xf32> -> vector<128x2xf32>
    %85 = vector.broadcast %82 : vector<128x1xf32> to vector<128x2xf32>
    %86 = arith.addf %84, %85 : vector<128x2xf32>
    %cst_42 = arith.constant 0.000000e+00 : f32
    %87 = vector.broadcast %cst_42 : f32 to vector<128x2xf32>
    %88 = arith.cmpf ogt, %86, %87 : vector<128x2xf32>
    %cst_43 = arith.constant 0.00999999977 : f32
    %89 = vector.broadcast %cst_43 : f32 to vector<128x2xf32>
    %90 = arith.mulf %89, %86 : vector<128x2xf32>
    %91 = arith.select %88, %86, %90 : vector<128x2xi1>, vector<128x2xf32>
    %c0_44 = arith.constant 0 : index
    %c0_45 = arith.constant 0 : index
    %c0_46 = arith.constant 0 : index
    %92 = vector.load %arg5[%c0_44, %c0_45, %c0_46] : memref<3x128x128xf32, #tpu.memory_space<vmem>>, vector<1x128x128xf32>
    %93 = vector.shape_cast %92 : vector<1x128x128xf32> to vector<128x128xf32>
    %cst_47 = arith.constant dense<0.000000e+00> : vector<128x2xf32>
    %94 = tpu.matmul %93, %91, %cst_47 {dimension_numbers = #tpu.dot_dimension_numbers<[1], [0], [0], [1], [0, 0, 1, 1], [], []>} : vector<128x128xf32>, vector<128x2xf32>, vector<128x2xf32> -> vector<128x2xf32>
    %95 = vector.broadcast %83 : vector<128x1xf32> to vector<128x2xf32>
    %96 = arith.addf %94, %95 : vector<128x2xf32>
    %cst_48 = arith.constant 0.000000e+00 : f32
    %97 = vector.broadcast %cst_48 : f32 to vector<128x2xf32>
    %98 = arith.cmpf ogt, %96, %97 : vector<128x2xf32>
    %cst_49 = arith.constant 0.00999999977 : f32
    %99 = vector.broadcast %cst_49 : f32 to vector<128x2xf32>
    %100 = arith.mulf %99, %96 : vector<128x2xf32>
    %101 = arith.select %98, %96, %100 : vector<128x2xi1>, vector<128x2xf32>
    %c0_50 = arith.constant 0 : index
    %c0_51 = arith.constant 0 : index
    %c0_52 = arith.constant 0 : index
    %102 = vector.load %arg6[%c0_50, %c0_51, %c0_52] : memref<3x4x128xf32, #tpu.memory_space<vmem>>, vector<1x4x128xf32>
    %103 = vector.shape_cast %102 : vector<1x4x128xf32> to vector<4x128xf32>
    %cst_53 = arith.constant dense<0.000000e+00> : vector<4x2xf32>
    %104 = tpu.matmul %103, %101, %cst_53 {dimension_numbers = #tpu.dot_dimension_numbers<[1], [0], [0], [1], [0, 0, 1, 1], [], []>} : vector<4x128xf32>, vector<128x2xf32>, vector<4x2xf32> -> vector<4x2xf32>
    %c0_54 = arith.constant 0 : index
    %c0_55 = arith.constant 0 : index
    %c0_56 = arith.constant 0 : index
    %105 = vector.load %arg7[%c0_54, %c0_55, %c0_56] : memref<3x4x1xf32, #tpu.memory_space<vmem>>, vector<1x4x1xf32>
    %106 = vector.shape_cast %105 : vector<1x4x1xf32> to vector<4x1xf32>
    %107 = vector.broadcast %106 : vector<4x1xf32> to vector<4x2xf32>
    %108 = arith.addf %104, %107 : vector<4x2xf32>
    %109 = vector.extract_strided_slice %108 {offsets = [0, 0], sizes = [2, 2], strides = [1, 1]} : vector<4x2xf32> to vector<2x2xf32>
    %110 = math.tanh %109 : vector<2x2xf32>
    %111 = vector.extract_strided_slice %108 {offsets = [2, 0], sizes = [2, 2], strides = [1, 1]} : vector<4x2xf32> to vector<2x2xf32>
    %112 = arith.subf %40, %111 : vector<2x2xf32>
    %cst_57 = arith.constant 0.000000e+00 : f32
    %113 = vector.broadcast %cst_57 : f32 to vector<2x2xf32>
    %114 = arith.subf %113, %110 : vector<2x2xf32>
    %115 = math.exp %114 : vector<2x2xf32>
    %116 = arith.mulf %112, %115 : vector<2x2xf32>
    %c0_58 = arith.constant 0 : index
    %c0_59 = arith.constant 0 : index
    %117 = vector.load %arg2[%c0_58, %c0_59] : memref<4x2xf32, #tpu.memory_space<vmem>>, vector<4x2xf32>
    %118 = vector.extract_strided_slice %117 {offsets = [0, 0], sizes = [2, 2], strides = [1, 1]} : vector<4x2xf32> to vector<2x2xf32>
    %119 = vector.extract_strided_slice %117 {offsets = [2, 0], sizes = [2, 2], strides = [1, 1]} : vector<4x2xf32> to vector<2x2xf32>
    %c2_60 = arith.constant 2 : index
    %c0_61 = arith.constant 0 : index
    %c0_62 = arith.constant 0 : index
    %120 = vector.load %arg4[%c2_60, %c0_61, %c0_62] : memref<3x128x4xf32, #tpu.memory_space<vmem>>, vector<1x128x4xf32>
    %121 = vector.shape_cast %120 : vector<1x128x4xf32> to vector<128x4xf32>
    %122 = vector.extract_strided_slice %121 {offsets = [0, 0], sizes = [128, 2], strides = [1, 1]} : vector<128x4xf32> to vector<128x2xf32>
    %123 = vector.extract_strided_slice %121 {offsets = [0, 2], sizes = [128, 1], strides = [1, 1]} : vector<128x4xf32> to vector<128x1xf32>
    %124 = vector.extract_strided_slice %121 {offsets = [0, 3], sizes = [128, 1], strides = [1, 1]} : vector<128x4xf32> to vector<128x1xf32>
    %cst_63 = arith.constant dense<0.000000e+00> : vector<128x2xf32>
    %125 = tpu.matmul %122, %119, %cst_63 {dimension_numbers = #tpu.dot_dimension_numbers<[1], [0], [0], [1], [0, 0, 1, 1], [], []>} : vector<128x2xf32>, vector<2x2xf32>, vector<128x2xf32> -> vector<128x2xf32>
    %126 = vector.broadcast %123 : vector<128x1xf32> to vector<128x2xf32>
    %127 = arith.addf %125, %126 : vector<128x2xf32>
    %cst_64 = arith.constant 0.000000e+00 : f32
    %128 = vector.broadcast %cst_64 : f32 to vector<128x2xf32>
    %129 = arith.cmpf ogt, %127, %128 : vector<128x2xf32>
    %cst_65 = arith.constant 0.00999999977 : f32
    %130 = vector.broadcast %cst_65 : f32 to vector<128x2xf32>
    %131 = arith.mulf %130, %127 : vector<128x2xf32>
    %132 = arith.select %129, %127, %131 : vector<128x2xi1>, vector<128x2xf32>
    %c2_66 = arith.constant 2 : index
    %c0_67 = arith.constant 0 : index
    %c0_68 = arith.constant 0 : index
    %133 = vector.load %arg5[%c2_66, %c0_67, %c0_68] : memref<3x128x128xf32, #tpu.memory_space<vmem>>, vector<1x128x128xf32>
    %134 = vector.shape_cast %133 : vector<1x128x128xf32> to vector<128x128xf32>
    %cst_69 = arith.constant dense<0.000000e+00> : vector<128x2xf32>
    %135 = tpu.matmul %134, %132, %cst_69 {dimension_numbers = #tpu.dot_dimension_numbers<[1], [0], [0], [1], [0, 0, 1, 1], [], []>} : vector<128x128xf32>, vector<128x2xf32>, vector<128x2xf32> -> vector<128x2xf32>
    %136 = vector.broadcast %124 : vector<128x1xf32> to vector<128x2xf32>
    %137 = arith.addf %135, %136 : vector<128x2xf32>
    %cst_70 = arith.constant 0.000000e+00 : f32
    %138 = vector.broadcast %cst_70 : f32 to vector<128x2xf32>
    %139 = arith.cmpf ogt, %137, %138 : vector<128x2xf32>
    %cst_71 = arith.constant 0.00999999977 : f32
    %140 = vector.broadcast %cst_71 : f32 to vector<128x2xf32>
    %141 = arith.mulf %140, %137 : vector<128x2xf32>
    %142 = arith.select %139, %137, %141 : vector<128x2xi1>, vector<128x2xf32>
    %c2_72 = arith.constant 2 : index
    %c0_73 = arith.constant 0 : index
    %c0_74 = arith.constant 0 : index
    %143 = vector.load %arg6[%c2_72, %c0_73, %c0_74] : memref<3x4x128xf32, #tpu.memory_space<vmem>>, vector<1x4x128xf32>
    %144 = vector.shape_cast %143 : vector<1x4x128xf32> to vector<4x128xf32>
    %cst_75 = arith.constant dense<0.000000e+00> : vector<4x2xf32>
    %145 = tpu.matmul %144, %142, %cst_75 {dimension_numbers = #tpu.dot_dimension_numbers<[1], [0], [0], [1], [0, 0, 1, 1], [], []>} : vector<4x128xf32>, vector<128x2xf32>, vector<4x2xf32> -> vector<4x2xf32>
    %c2_76 = arith.constant 2 : index
    %c0_77 = arith.constant 0 : index
    %c0_78 = arith.constant 0 : index
    %146 = vector.load %arg7[%c2_76, %c0_77, %c0_78] : memref<3x4x1xf32, #tpu.memory_space<vmem>>, vector<1x4x1xf32>
    %147 = vector.shape_cast %146 : vector<1x4x1xf32> to vector<4x1xf32>
    %148 = vector.broadcast %147 : vector<4x1xf32> to vector<4x2xf32>
    %149 = arith.addf %145, %148 : vector<4x2xf32>
    %150 = vector.extract_strided_slice %149 {offsets = [0, 0], sizes = [2, 2], strides = [1, 1]} : vector<4x2xf32> to vector<2x2xf32>
    %151 = math.tanh %150 : vector<2x2xf32>
    %152 = vector.extract_strided_slice %149 {offsets = [2, 0], sizes = [2, 2], strides = [1, 1]} : vector<4x2xf32> to vector<2x2xf32>
    %153 = arith.subf %118, %152 : vector<2x2xf32>
    %cst_79 = arith.constant 0.000000e+00 : f32
    %154 = vector.broadcast %cst_79 : f32 to vector<2x2xf32>
    %155 = arith.subf %154, %151 : vector<2x2xf32>
    %156 = math.exp %155 : vector<2x2xf32>
    %157 = arith.mulf %153, %156 : vector<2x2xf32>
    %c1_80 = arith.constant 1 : index
    %c0_81 = arith.constant 0 : index
    %c0_82 = arith.constant 0 : index
    %158 = vector.load %arg4[%c1_80, %c0_81, %c0_82] : memref<3x128x4xf32, #tpu.memory_space<vmem>>, vector<1x128x4xf32>
    %159 = vector.shape_cast %158 : vector<1x128x4xf32> to vector<128x4xf32>
    %160 = vector.extract_strided_slice %159 {offsets = [0, 0], sizes = [128, 2], strides = [1, 1]} : vector<128x4xf32> to vector<128x2xf32>
    %161 = vector.extract_strided_slice %159 {offsets = [0, 2], sizes = [128, 1], strides = [1, 1]} : vector<128x4xf32> to vector<128x1xf32>
    %162 = vector.extract_strided_slice %159 {offsets = [0, 3], sizes = [128, 1], strides = [1, 1]} : vector<128x4xf32> to vector<128x1xf32>
    %cst_83 = arith.constant dense<0.000000e+00> : vector<128x2xf32>
    %163 = tpu.matmul %160, %157, %cst_83 {dimension_numbers = #tpu.dot_dimension_numbers<[1], [0], [0], [1], [0, 0, 1, 1], [], []>} : vector<128x2xf32>, vector<2x2xf32>, vector<128x2xf32> -> vector<128x2xf32>
    %164 = vector.broadcast %161 : vector<128x1xf32> to vector<128x2xf32>
    %165 = arith.addf %163, %164 : vector<128x2xf32>
    %cst_84 = arith.constant 0.000000e+00 : f32
    %166 = vector.broadcast %cst_84 : f32 to vector<128x2xf32>
    %167 = arith.cmpf ogt, %165, %166 : vector<128x2xf32>
    %cst_85 = arith.constant 0.00999999977 : f32
    %168 = vector.broadcast %cst_85 : f32 to vector<128x2xf32>
    %169 = arith.mulf %168, %165 : vector<128x2xf32>
    %170 = arith.select %167, %165, %169 : vector<128x2xi1>, vector<128x2xf32>
    %c1_86 = arith.constant 1 : index
    %c0_87 = arith.constant 0 : index
    %c0_88 = arith.constant 0 : index
    %171 = vector.load %arg5[%c1_86, %c0_87, %c0_88] : memref<3x128x128xf32, #tpu.memory_space<vmem>>, vector<1x128x128xf32>
    %172 = vector.shape_cast %171 : vector<1x128x128xf32> to vector<128x128xf32>
    %cst_89 = arith.constant dense<0.000000e+00> : vector<128x2xf32>
    %173 = tpu.matmul %172, %170, %cst_89 {dimension_numbers = #tpu.dot_dimension_numbers<[1], [0], [0], [1], [0, 0, 1, 1], [], []>} : vector<128x128xf32>, vector<128x2xf32>, vector<128x2xf32> -> vector<128x2xf32>
    %174 = vector.broadcast %162 : vector<128x1xf32> to vector<128x2xf32>
    %175 = arith.addf %173, %174 : vector<128x2xf32>
    %cst_90 = arith.constant 0.000000e+00 : f32
    %176 = vector.broadcast %cst_90 : f32 to vector<128x2xf32>
    %177 = arith.cmpf ogt, %175, %176 : vector<128x2xf32>
    %cst_91 = arith.constant 0.00999999977 : f32
    %178 = vector.broadcast %cst_91 : f32 to vector<128x2xf32>
    %179 = arith.mulf %178, %175 : vector<128x2xf32>
    %180 = arith.select %177, %175, %179 : vector<128x2xi1>, vector<128x2xf32>
    %c1_92 = arith.constant 1 : index
    %c0_93 = arith.constant 0 : index
    %c0_94 = arith.constant 0 : index
    %181 = vector.load %arg6[%c1_92, %c0_93, %c0_94] : memref<3x4x128xf32, #tpu.memory_space<vmem>>, vector<1x4x128xf32>
    %182 = vector.shape_cast %181 : vector<1x4x128xf32> to vector<4x128xf32>
    %cst_95 = arith.constant dense<0.000000e+00> : vector<4x2xf32>
    %183 = tpu.matmul %182, %180, %cst_95 {dimension_numbers = #tpu.dot_dimension_numbers<[1], [0], [0], [1], [0, 0, 1, 1], [], []>} : vector<4x128xf32>, vector<128x2xf32>, vector<4x2xf32> -> vector<4x2xf32>
    %c1_96 = arith.constant 1 : index
    %c0_97 = arith.constant 0 : index
    %c0_98 = arith.constant 0 : index
    %184 = vector.load %arg7[%c1_96, %c0_97, %c0_98] : memref<3x4x1xf32, #tpu.memory_space<vmem>>, vector<1x4x1xf32>
    %185 = vector.shape_cast %184 : vector<1x4x1xf32> to vector<4x1xf32>
    %186 = vector.broadcast %185 : vector<4x1xf32> to vector<4x2xf32>
    %187 = arith.addf %183, %186 : vector<4x2xf32>
    %188 = vector.extract_strided_slice %187 {offsets = [0, 0], sizes = [2, 2], strides = [1, 1]} : vector<4x2xf32> to vector<2x2xf32>
    %189 = math.tanh %188 : vector<2x2xf32>
    %190 = vector.extract_strided_slice %187 {offsets = [2, 0], sizes = [2, 2], strides = [1, 1]} : vector<4x2xf32> to vector<2x2xf32>
    %191 = arith.subf %119, %190 : vector<2x2xf32>
    %cst_99 = arith.constant 0.000000e+00 : f32
    %192 = vector.broadcast %cst_99 : f32 to vector<2x2xf32>
    %193 = arith.subf %192, %189 : vector<2x2xf32>
    %194 = math.exp %193 : vector<2x2xf32>
    %195 = arith.mulf %191, %194 : vector<2x2xf32>
    %c0_100 = arith.constant 0 : index
    %c0_101 = arith.constant 0 : index
    %c0_102 = arith.constant 0 : index
    %196 = vector.load %arg4[%c0_100, %c0_101, %c0_102] : memref<3x128x4xf32, #tpu.memory_space<vmem>>, vector<1x128x4xf32>
    %197 = vector.shape_cast %196 : vector<1x128x4xf32> to vector<128x4xf32>
    %198 = vector.extract_strided_slice %197 {offsets = [0, 0], sizes = [128, 2], strides = [1, 1]} : vector<128x4xf32> to vector<128x2xf32>
    %199 = vector.extract_strided_slice %197 {offsets = [0, 2], sizes = [128, 1], strides = [1, 1]} : vector<128x4xf32> to vector<128x1xf32>
    %200 = vector.extract_strided_slice %197 {offsets = [0, 3], sizes = [128, 1], strides = [1, 1]} : vector<128x4xf32> to vector<128x1xf32>
    %cst_103 = arith.constant dense<0.000000e+00> : vector<128x2xf32>
    %201 = tpu.matmul %198, %195, %cst_103 {dimension_numbers = #tpu.dot_dimension_numbers<[1], [0], [0], [1], [0, 0, 1, 1], [], []>} : vector<128x2xf32>, vector<2x2xf32>, vector<128x2xf32> -> vector<128x2xf32>
    %202 = vector.broadcast %199 : vector<128x1xf32> to vector<128x2xf32>
    %203 = arith.addf %201, %202 : vector<128x2xf32>
    %cst_104 = arith.constant 0.000000e+00 : f32
    %204 = vector.broadcast %cst_104 : f32 to vector<128x2xf32>
    %205 = arith.cmpf ogt, %203, %204 : vector<128x2xf32>
    %cst_105 = arith.constant 0.00999999977 : f32
    %206 = vector.broadcast %cst_105 : f32 to vector<128x2xf32>
    %207 = arith.mulf %206, %203 : vector<128x2xf32>
    %208 = arith.select %205, %203, %207 : vector<128x2xi1>, vector<128x2xf32>
    %c0_106 = arith.constant 0 : index
    %c0_107 = arith.constant 0 : index
    %c0_108 = arith.constant 0 : index
    %209 = vector.load %arg5[%c0_106, %c0_107, %c0_108] : memref<3x128x128xf32, #tpu.memory_space<vmem>>, vector<1x128x128xf32>
    %210 = vector.shape_cast %209 : vector<1x128x128xf32> to vector<128x128xf32>
    %cst_109 = arith.constant dense<0.000000e+00> : vector<128x2xf32>
    %211 = tpu.matmul %210, %208, %cst_109 {dimension_numbers = #tpu.dot_dimension_numbers<[1], [0], [0], [1], [0, 0, 1, 1], [], []>} : vector<128x128xf32>, vector<128x2xf32>, vector<128x2xf32> -> vector<128x2xf32>
    %212 = vector.broadcast %200 : vector<128x1xf32> to vector<128x2xf32>
    %213 = arith.addf %211, %212 : vector<128x2xf32>
    %cst_110 = arith.constant 0.000000e+00 : f32
    %214 = vector.broadcast %cst_110 : f32 to vector<128x2xf32>
    %215 = arith.cmpf ogt, %213, %214 : vector<128x2xf32>
    %cst_111 = arith.constant 0.00999999977 : f32
    %216 = vector.broadcast %cst_111 : f32 to vector<128x2xf32>
    %217 = arith.mulf %216, %213 : vector<128x2xf32>
    %218 = arith.select %215, %213, %217 : vector<128x2xi1>, vector<128x2xf32>
    %c0_112 = arith.constant 0 : index
    %c0_113 = arith.constant 0 : index
    %c0_114 = arith.constant 0 : index
    %219 = vector.load %arg6[%c0_112, %c0_113, %c0_114] : memref<3x4x128xf32, #tpu.memory_space<vmem>>, vector<1x4x128xf32>
    %220 = vector.shape_cast %219 : vector<1x4x128xf32> to vector<4x128xf32>
    %cst_115 = arith.constant dense<0.000000e+00> : vector<4x2xf32>
    %221 = tpu.matmul %220, %218, %cst_115 {dimension_numbers = #tpu.dot_dimension_numbers<[1], [0], [0], [1], [0, 0, 1, 1], [], []>} : vector<4x128xf32>, vector<128x2xf32>, vector<4x2xf32> -> vector<4x2xf32>
    %c0_116 = arith.constant 0 : index
    %c0_117 = arith.constant 0 : index
    %c0_118 = arith.constant 0 : index
    %222 = vector.load %arg7[%c0_116, %c0_117, %c0_118] : memref<3x4x1xf32, #tpu.memory_space<vmem>>, vector<1x4x1xf32>
    %223 = vector.shape_cast %222 : vector<1x4x1xf32> to vector<4x1xf32>
    %224 = vector.broadcast %223 : vector<4x1xf32> to vector<4x2xf32>
    %225 = arith.addf %221, %224 : vector<4x2xf32>
    %226 = vector.extract_strided_slice %225 {offsets = [0, 0], sizes = [2, 2], strides = [1, 1]} : vector<4x2xf32> to vector<2x2xf32>
    %227 = math.tanh %226 : vector<2x2xf32>
    %228 = vector.extract_strided_slice %225 {offsets = [2, 0], sizes = [2, 2], strides = [1, 1]} : vector<4x2xf32> to vector<2x2xf32>
    %229 = arith.subf %157, %228 : vector<2x2xf32>
    %cst_119 = arith.constant 0.000000e+00 : f32
    %230 = vector.broadcast %cst_119 : f32 to vector<2x2xf32>
    %231 = arith.subf %230, %227 : vector<2x2xf32>
    %232 = math.exp %231 : vector<2x2xf32>
    %233 = arith.mulf %229, %232 : vector<2x2xf32>
    %c0_120 = arith.constant 0 : index
    %c0_121 = arith.constant 0 : index
    %234 = vector.load %arg8[%c0_120, %c0_121] : memref<64x4xf32, #tpu.memory_space<vmem>>, vector<64x4xf32>
    %235 = vector.extract_strided_slice %234 {offsets = [0, 0], sizes = [64, 2], strides = [1, 1]} : vector<64x4xf32> to vector<64x2xf32>
    %236 = vector.extract_strided_slice %234 {offsets = [0, 2], sizes = [64, 1], strides = [1, 1]} : vector<64x4xf32> to vector<64x1xf32>
    %237 = vector.extract_strided_slice %234 {offsets = [0, 3], sizes = [64, 1], strides = [1, 1]} : vector<64x4xf32> to vector<64x1xf32>
    %cst_122 = arith.constant dense<0.000000e+00> : vector<64x2xf32>
    %238 = tpu.matmul %235, %116, %cst_122 {dimension_numbers = #tpu.dot_dimension_numbers<[1], [0], [0], [1], [0, 0, 1, 1], [], []>} : vector<64x2xf32>, vector<2x2xf32>, vector<64x2xf32> -> vector<64x2xf32>
    %239 = vector.broadcast %236 : vector<64x1xf32> to vector<64x2xf32>
    %240 = arith.addf %238, %239 : vector<64x2xf32>
    %cst_123 = arith.constant 0.000000e+00 : f32
    %241 = vector.broadcast %cst_123 : f32 to vector<64x2xf32>
    %242 = arith.cmpf ogt, %240, %241 : vector<64x2xf32>
    %cst_124 = arith.constant 0.00999999977 : f32
    %243 = vector.broadcast %cst_124 : f32 to vector<64x2xf32>
    %244 = arith.mulf %243, %240 : vector<64x2xf32>
    %245 = arith.select %242, %240, %244 : vector<64x2xi1>, vector<64x2xf32>
    %c0_125 = arith.constant 0 : index
    %c0_126 = arith.constant 0 : index
    %246 = vector.load %arg9[%c0_125, %c0_126] : memref<64x64xf32, #tpu.memory_space<vmem>>, vector<64x64xf32>
    %cst_127 = arith.constant dense<0.000000e+00> : vector<64x2xf32>
    %247 = tpu.matmul %246, %245, %cst_127 {dimension_numbers = #tpu.dot_dimension_numbers<[1], [0], [0], [1], [0, 0, 1, 1], [], []>} : vector<64x64xf32>, vector<64x2xf32>, vector<64x2xf32> -> vector<64x2xf32>
    %248 = vector.broadcast %237 : vector<64x1xf32> to vector<64x2xf32>
    %249 = arith.addf %247, %248 : vector<64x2xf32>
    %cst_128 = arith.constant 0.000000e+00 : f32
    %250 = vector.broadcast %cst_128 : f32 to vector<64x2xf32>
    %251 = arith.cmpf ogt, %249, %250 : vector<64x2xf32>
    %cst_129 = arith.constant 0.00999999977 : f32
    %252 = vector.broadcast %cst_129 : f32 to vector<64x2xf32>
    %253 = arith.mulf %252, %249 : vector<64x2xf32>
    %254 = arith.select %251, %249, %253 : vector<64x2xi1>, vector<64x2xf32>
    %c0_130 = arith.constant 0 : index
    %c0_131 = arith.constant 0 : index
    %255 = vector.load %arg10[%c0_130, %c0_131] : memref<2x64xf32, #tpu.memory_space<vmem>>, vector<2x64xf32>
    %cst_132 = arith.constant dense<0.000000e+00> : vector<2x2xf32>
    %256 = tpu.matmul %255, %254, %cst_132 {dimension_numbers = #tpu.dot_dimension_numbers<[1], [0], [0], [1], [0, 0, 1, 1], [], []>} : vector<2x64xf32>, vector<64x2xf32>, vector<2x2xf32> -> vector<2x2xf32>
    %c0_133 = arith.constant 0 : index
    %c0_134 = arith.constant 0 : index
    %257 = vector.load %arg11[%c0_133, %c0_134] : memref<2x1xf32, #tpu.memory_space<vmem>>, vector<2x1xf32>
    %258 = vector.broadcast %257 : vector<2x1xf32> to vector<2x2xf32>
    %259 = arith.addf %256, %258 : vector<2x2xf32>
    %260 = arith.addf %259, %116 : vector<2x2xf32>
    %261 = math.tanh %260 : vector<2x2xf32>
    %c0_135 = arith.constant 0 : index
    %c0_136 = arith.constant 0 : index
    %262 = vector.load %arg3[%c0_135, %c0_136] : memref<2x2xf32, #tpu.memory_space<vmem>>, vector<2x2xf32>
    %c0_137 = arith.constant 0 : index
    %c0_138 = arith.constant 0 : index
    %c0_139 = arith.constant 0 : index
    %263 = vector.load %arg4[%c0_137, %c0_138, %c0_139] : memref<3x128x4xf32, #tpu.memory_space<vmem>>, vector<1x128x4xf32>
    %264 = vector.shape_cast %263 : vector<1x128x4xf32> to vector<128x4xf32>
    %265 = vector.extract_strided_slice %264 {offsets = [0, 0], sizes = [128, 2], strides = [1, 1]} : vector<128x4xf32> to vector<128x2xf32>
    %266 = vector.extract_strided_slice %264 {offsets = [0, 2], sizes = [128, 1], strides = [1, 1]} : vector<128x4xf32> to vector<128x1xf32>
    %267 = vector.extract_strided_slice %264 {offsets = [0, 3], sizes = [128, 1], strides = [1, 1]} : vector<128x4xf32> to vector<128x1xf32>
    %cst_140 = arith.constant dense<0.000000e+00> : vector<128x2xf32>
    %268 = tpu.matmul %265, %262, %cst_140 {dimension_numbers = #tpu.dot_dimension_numbers<[1], [0], [0], [1], [0, 0, 1, 1], [], []>} : vector<128x2xf32>, vector<2x2xf32>, vector<128x2xf32> -> vector<128x2xf32>
    %269 = vector.broadcast %266 : vector<128x1xf32> to vector<128x2xf32>
    %270 = arith.addf %268, %269 : vector<128x2xf32>
    %cst_141 = arith.constant 0.000000e+00 : f32
    %271 = vector.broadcast %cst_141 : f32 to vector<128x2xf32>
    %272 = arith.cmpf ogt, %270, %271 : vector<128x2xf32>
    %cst_142 = arith.constant 0.00999999977 : f32
    %273 = vector.broadcast %cst_142 : f32 to vector<128x2xf32>
    %274 = arith.mulf %273, %270 : vector<128x2xf32>
    %275 = arith.select %272, %270, %274 : vector<128x2xi1>, vector<128x2xf32>
    %c0_143 = arith.constant 0 : index
    %c0_144 = arith.constant 0 : index
    %c0_145 = arith.constant 0 : index
    %276 = vector.load %arg5[%c0_143, %c0_144, %c0_145] : memref<3x128x128xf32, #tpu.memory_space<vmem>>, vector<1x128x128xf32>
    %277 = vector.shape_cast %276 : vector<1x128x128xf32> to vector<128x128xf32>
    %cst_146 = arith.constant dense<0.000000e+00> : vector<128x2xf32>
    %278 = tpu.matmul %277, %275, %cst_146 {dimension_numbers = #tpu.dot_dimension_numbers<[1], [0], [0], [1], [0, 0, 1, 1], [], []>} : vector<128x128xf32>, vector<128x2xf32>, vector<128x2xf32> -> vector<128x2xf32>
    %279 = vector.broadcast %267 : vector<128x1xf32> to vector<128x2xf32>
    %280 = arith.addf %278, %279 : vector<128x2xf32>
    %cst_147 = arith.constant 0.000000e+00 : f32
    %281 = vector.broadcast %cst_147 : f32 to vector<128x2xf32>
    %282 = arith.cmpf ogt, %280, %281 : vector<128x2xf32>
    %cst_148 = arith.constant 0.00999999977 : f32
    %283 = vector.broadcast %cst_148 : f32 to vector<128x2xf32>
    %284 = arith.mulf %283, %280 : vector<128x2xf32>
    %285 = arith.select %282, %280, %284 : vector<128x2xi1>, vector<128x2xf32>
    %c0_149 = arith.constant 0 : index
    %c0_150 = arith.constant 0 : index
    %c0_151 = arith.constant 0 : index
    %286 = vector.load %arg6[%c0_149, %c0_150, %c0_151] : memref<3x4x128xf32, #tpu.memory_space<vmem>>, vector<1x4x128xf32>
    %287 = vector.shape_cast %286 : vector<1x4x128xf32> to vector<4x128xf32>
    %cst_152 = arith.constant dense<0.000000e+00> : vector<4x2xf32>
    %288 = tpu.matmul %287, %285, %cst_152 {dimension_numbers = #tpu.dot_dimension_numbers<[1], [0], [0], [1], [0, 0, 1, 1], [], []>} : vector<4x128xf32>, vector<128x2xf32>, vector<4x2xf32> -> vector<4x2xf32>
    %c0_153 = arith.constant 0 : index
    %c0_154 = arith.constant 0 : index
    %c0_155 = arith.constant 0 : index
    %289 = vector.load %arg7[%c0_153, %c0_154, %c0_155] : memref<3x4x1xf32, #tpu.memory_space<vmem>>, vector<1x4x1xf32>
    %290 = vector.shape_cast %289 : vector<1x4x1xf32> to vector<4x1xf32>
    %291 = vector.broadcast %290 : vector<4x1xf32> to vector<4x2xf32>
    %292 = arith.addf %288, %291 : vector<4x2xf32>
    %293 = vector.extract_strided_slice %292 {offsets = [0, 0], sizes = [2, 2], strides = [1, 1]} : vector<4x2xf32> to vector<2x2xf32>
    %294 = math.tanh %293 : vector<2x2xf32>
    %295 = vector.extract_strided_slice %292 {offsets = [2, 0], sizes = [2, 2], strides = [1, 1]} : vector<4x2xf32> to vector<2x2xf32>
    %296 = math.exp %294 : vector<2x2xf32>
    %297 = arith.mulf %261, %296 : vector<2x2xf32>
    %298 = arith.addf %297, %295 : vector<2x2xf32>
    %c1_156 = arith.constant 1 : index
    %c0_157 = arith.constant 0 : index
    %c0_158 = arith.constant 0 : index
    %299 = vector.load %arg4[%c1_156, %c0_157, %c0_158] : memref<3x128x4xf32, #tpu.memory_space<vmem>>, vector<1x128x4xf32>
    %300 = vector.shape_cast %299 : vector<1x128x4xf32> to vector<128x4xf32>
    %301 = vector.extract_strided_slice %300 {offsets = [0, 0], sizes = [128, 2], strides = [1, 1]} : vector<128x4xf32> to vector<128x2xf32>
    %302 = vector.extract_strided_slice %300 {offsets = [0, 2], sizes = [128, 1], strides = [1, 1]} : vector<128x4xf32> to vector<128x1xf32>
    %303 = vector.extract_strided_slice %300 {offsets = [0, 3], sizes = [128, 1], strides = [1, 1]} : vector<128x4xf32> to vector<128x1xf32>
    %cst_159 = arith.constant dense<0.000000e+00> : vector<128x2xf32>
    %304 = tpu.matmul %301, %298, %cst_159 {dimension_numbers = #tpu.dot_dimension_numbers<[1], [0], [0], [1], [0, 0, 1, 1], [], []>} : vector<128x2xf32>, vector<2x2xf32>, vector<128x2xf32> -> vector<128x2xf32>
    %305 = vector.broadcast %302 : vector<128x1xf32> to vector<128x2xf32>
    %306 = arith.addf %304, %305 : vector<128x2xf32>
    %cst_160 = arith.constant 0.000000e+00 : f32
    %307 = vector.broadcast %cst_160 : f32 to vector<128x2xf32>
    %308 = arith.cmpf ogt, %306, %307 : vector<128x2xf32>
    %cst_161 = arith.constant 0.00999999977 : f32
    %309 = vector.broadcast %cst_161 : f32 to vector<128x2xf32>
    %310 = arith.mulf %309, %306 : vector<128x2xf32>
    %311 = arith.select %308, %306, %310 : vector<128x2xi1>, vector<128x2xf32>
    %c1_162 = arith.constant 1 : index
    %c0_163 = arith.constant 0 : index
    %c0_164 = arith.constant 0 : index
    %312 = vector.load %arg5[%c1_162, %c0_163, %c0_164] : memref<3x128x128xf32, #tpu.memory_space<vmem>>, vector<1x128x128xf32>
    %313 = vector.shape_cast %312 : vector<1x128x128xf32> to vector<128x128xf32>
    %cst_165 = arith.constant dense<0.000000e+00> : vector<128x2xf32>
    %314 = tpu.matmul %313, %311, %cst_165 {dimension_numbers = #tpu.dot_dimension_numbers<[1], [0], [0], [1], [0, 0, 1, 1], [], []>} : vector<128x128xf32>, vector<128x2xf32>, vector<128x2xf32> -> vector<128x2xf32>
    %315 = vector.broadcast %303 : vector<128x1xf32> to vector<128x2xf32>
    %316 = arith.addf %314, %315 : vector<128x2xf32>
    %cst_166 = arith.constant 0.000000e+00 : f32
    %317 = vector.broadcast %cst_166 : f32 to vector<128x2xf32>
    %318 = arith.cmpf ogt, %316, %317 : vector<128x2xf32>
    %cst_167 = arith.constant 0.00999999977 : f32
    %319 = vector.broadcast %cst_167 : f32 to vector<128x2xf32>
    %320 = arith.mulf %319, %316 : vector<128x2xf32>
    %321 = arith.select %318, %316, %320 : vector<128x2xi1>, vector<128x2xf32>
    %c1_168 = arith.constant 1 : index
    %c0_169 = arith.constant 0 : index
    %c0_170 = arith.constant 0 : index
    %322 = vector.load %arg6[%c1_168, %c0_169, %c0_170] : memref<3x4x128xf32, #tpu.memory_space<vmem>>, vector<1x4x128xf32>
    %323 = vector.shape_cast %322 : vector<1x4x128xf32> to vector<4x128xf32>
    %cst_171 = arith.constant dense<0.000000e+00> : vector<4x2xf32>
    %324 = tpu.matmul %323, %321, %cst_171 {dimension_numbers = #tpu.dot_dimension_numbers<[1], [0], [0], [1], [0, 0, 1, 1], [], []>} : vector<4x128xf32>, vector<128x2xf32>, vector<4x2xf32> -> vector<4x2xf32>
    %c1_172 = arith.constant 1 : index
    %c0_173 = arith.constant 0 : index
    %c0_174 = arith.constant 0 : index
    %325 = vector.load %arg7[%c1_172, %c0_173, %c0_174] : memref<3x4x1xf32, #tpu.memory_space<vmem>>, vector<1x4x1xf32>
    %326 = vector.shape_cast %325 : vector<1x4x1xf32> to vector<4x1xf32>
    %327 = vector.broadcast %326 : vector<4x1xf32> to vector<4x2xf32>
    %328 = arith.addf %324, %327 : vector<4x2xf32>
    %329 = vector.extract_strided_slice %328 {offsets = [0, 0], sizes = [2, 2], strides = [1, 1]} : vector<4x2xf32> to vector<2x2xf32>
    %330 = math.tanh %329 : vector<2x2xf32>
    %331 = vector.extract_strided_slice %328 {offsets = [2, 0], sizes = [2, 2], strides = [1, 1]} : vector<4x2xf32> to vector<2x2xf32>
    %332 = math.exp %330 : vector<2x2xf32>
    %333 = arith.mulf %262, %332 : vector<2x2xf32>
    %334 = arith.addf %333, %331 : vector<2x2xf32>
    %c2_175 = arith.constant 2 : index
    %c0_176 = arith.constant 0 : index
    %c0_177 = arith.constant 0 : index
    %335 = vector.load %arg4[%c2_175, %c0_176, %c0_177] : memref<3x128x4xf32, #tpu.memory_space<vmem>>, vector<1x128x4xf32>
    %336 = vector.shape_cast %335 : vector<1x128x4xf32> to vector<128x4xf32>
    %337 = vector.extract_strided_slice %336 {offsets = [0, 0], sizes = [128, 2], strides = [1, 1]} : vector<128x4xf32> to vector<128x2xf32>
    %338 = vector.extract_strided_slice %336 {offsets = [0, 2], sizes = [128, 1], strides = [1, 1]} : vector<128x4xf32> to vector<128x1xf32>
    %339 = vector.extract_strided_slice %336 {offsets = [0, 3], sizes = [128, 1], strides = [1, 1]} : vector<128x4xf32> to vector<128x1xf32>
    %cst_178 = arith.constant dense<0.000000e+00> : vector<128x2xf32>
    %340 = tpu.matmul %337, %334, %cst_178 {dimension_numbers = #tpu.dot_dimension_numbers<[1], [0], [0], [1], [0, 0, 1, 1], [], []>} : vector<128x2xf32>, vector<2x2xf32>, vector<128x2xf32> -> vector<128x2xf32>
    %341 = vector.broadcast %338 : vector<128x1xf32> to vector<128x2xf32>
    %342 = arith.addf %340, %341 : vector<128x2xf32>
    %cst_179 = arith.constant 0.000000e+00 : f32
    %343 = vector.broadcast %cst_179 : f32 to vector<128x2xf32>
    %344 = arith.cmpf ogt, %342, %343 : vector<128x2xf32>
    %cst_180 = arith.constant 0.00999999977 : f32
    %345 = vector.broadcast %cst_180 : f32 to vector<128x2xf32>
    %346 = arith.mulf %345, %342 : vector<128x2xf32>
    %347 = arith.select %344, %342, %346 : vector<128x2xi1>, vector<128x2xf32>
    %c2_181 = arith.constant 2 : index
    %c0_182 = arith.constant 0 : index
    %c0_183 = arith.constant 0 : index
    %348 = vector.load %arg5[%c2_181, %c0_182, %c0_183] : memref<3x128x128xf32, #tpu.memory_space<vmem>>, vector<1x128x128xf32>
    %349 = vector.shape_cast %348 : vector<1x128x128xf32> to vector<128x128xf32>
    %cst_184 = arith.constant dense<0.000000e+00> : vector<128x2xf32>
    %350 = tpu.matmul %349, %347, %cst_184 {dimension_numbers = #tpu.dot_dimension_numbers<[1], [0], [0], [1], [0, 0, 1, 1], [], []>} : vector<128x128xf32>, vector<128x2xf32>, vector<128x2xf32> -> vector<128x2xf32>
    %351 = vector.broadcast %339 : vector<128x1xf32> to vector<128x2xf32>
    %352 = arith.addf %350, %351 : vector<128x2xf32>
    %cst_185 = arith.constant 0.000000e+00 : f32
    %353 = vector.broadcast %cst_185 : f32 to vector<128x2xf32>
    %354 = arith.cmpf ogt, %352, %353 : vector<128x2xf32>
    %cst_186 = arith.constant 0.00999999977 : f32
    %355 = vector.broadcast %cst_186 : f32 to vector<128x2xf32>
    %356 = arith.mulf %355, %352 : vector<128x2xf32>
    %357 = arith.select %354, %352, %356 : vector<128x2xi1>, vector<128x2xf32>
    %c2_187 = arith.constant 2 : index
    %c0_188 = arith.constant 0 : index
    %c0_189 = arith.constant 0 : index
    %358 = vector.load %arg6[%c2_187, %c0_188, %c0_189] : memref<3x4x128xf32, #tpu.memory_space<vmem>>, vector<1x4x128xf32>
    %359 = vector.shape_cast %358 : vector<1x4x128xf32> to vector<4x128xf32>
    %cst_190 = arith.constant dense<0.000000e+00> : vector<4x2xf32>
    %360 = tpu.matmul %359, %357, %cst_190 {dimension_numbers = #tpu.dot_dimension_numbers<[1], [0], [0], [1], [0, 0, 1, 1], [], []>} : vector<4x128xf32>, vector<128x2xf32>, vector<4x2xf32> -> vector<4x2xf32>
    %c2_191 = arith.constant 2 : index
    %c0_192 = arith.constant 0 : index
    %c0_193 = arith.constant 0 : index
    %361 = vector.load %arg7[%c2_191, %c0_192, %c0_193] : memref<3x4x1xf32, #tpu.memory_space<vmem>>, vector<1x4x1xf32>
    %362 = vector.shape_cast %361 : vector<1x4x1xf32> to vector<4x1xf32>
    %363 = vector.broadcast %362 : vector<4x1xf32> to vector<4x2xf32>
    %364 = arith.addf %360, %363 : vector<4x2xf32>
    %365 = vector.extract_strided_slice %364 {offsets = [0, 0], sizes = [2, 2], strides = [1, 1]} : vector<4x2xf32> to vector<2x2xf32>
    %366 = math.tanh %365 : vector<2x2xf32>
    %367 = vector.extract_strided_slice %364 {offsets = [2, 0], sizes = [2, 2], strides = [1, 1]} : vector<4x2xf32> to vector<2x2xf32>
    %368 = math.exp %366 : vector<2x2xf32>
    %369 = arith.mulf %298, %368 : vector<2x2xf32>
    %370 = arith.addf %369, %367 : vector<2x2xf32>
    %c0_194 = arith.constant 0 : index
    %c0_195 = arith.constant 0 : index
    %371 = vector.load %arg12[%c0_194, %c0_195] : memref<10x2xf32, #tpu.memory_space<vmem>>, vector<2x2xf32>
    tpu.vector_store %arg12[%c0_194, %c0_195], %370 {strides = array<i32>} : memref<10x2xf32, #tpu.memory_space<vmem>>, vector<2x2xf32>,
    %c2_196 = arith.constant 2 : index
    %c0_197 = arith.constant 0 : index
    %372 = vector.load %arg12[%c2_196, %c0_197] : memref<10x2xf32, #tpu.memory_space<vmem>>, vector<2x2xf32>
    tpu.vector_store %arg12[%c2_196, %c0_197], %334 {strides = array<i32>} : memref<10x2xf32, #tpu.memory_space<vmem>>, vector<2x2xf32>,
    %c4 = arith.constant 4 : index
    %c0_198 = arith.constant 0 : index
    %373 = vector.load %arg12[%c4, %c0_198] : memref<10x2xf32, #tpu.memory_space<vmem>>, vector<2x2xf32>
    tpu.vector_store %arg12[%c4, %c0_198], %116 {strides = array<i32>} : memref<10x2xf32, #tpu.memory_space<vmem>>, vector<2x2xf32>,
    %c6 = arith.constant 6 : index
    %c0_199 = arith.constant 0 : index
    %374 = vector.load %arg12[%c6, %c0_199] : memref<10x2xf32, #tpu.memory_space<vmem>>, vector<2x2xf32>
    tpu.vector_store %arg12[%c6, %c0_199], %233 {strides = array<i32>} : memref<10x2xf32, #tpu.memory_space<vmem>>, vector<2x2xf32>,
    %c8 = arith.constant 8 : index
    %c0_200 = arith.constant 0 : index
    %375 = vector.load %arg12[%c8, %c0_200] : memref<10x2xf32, #tpu.memory_space<vmem>>, vector<2x2xf32>
    tpu.vector_store %arg12[%c8, %c0_200], %261 {strides = array<i32>} : memref<10x2xf32, #tpu.memory_space<vmem>>, vector<2x2xf32>,
    return
  }
  func.func @transform_0(%arg0: i32) -> (i32, i32) {
    %c0_i32 = arith.constant 0 : i32
    %c0_i32_0 = arith.constant 0 : i32
    return %c0_i32, %arg0 : i32, i32
  }
  func.func @transform_1(%arg0: i32) -> (i32, i32) {
    %c0_i32 = arith.constant 0 : i32
    %c0_i32_0 = arith.constant 0 : i32
    return %c0_i32, %arg0 : i32, i32
  }
  func.func @transform_2(%arg0: i32) -> (i32, i32) {
    %c0_i32 = arith.constant 0 : i32
    %c0_i32_0 = arith.constant 0 : i32
    return %c0_i32, %arg0 : i32, i32
  }
  func.func @transform_3(%arg0: i32) -> (i32, i32, i32) {
    %c0_i32 = arith.constant 0 : i32
    %c0_i32_0 = arith.constant 0 : i32
    %c0_i32_1 = arith.constant 0 : i32
    %c0_i32_2 = arith.constant 0 : i32
    return %c0_i32, %c0_i32_0, %c0_i32_1 : i32, i32, i32
  }
  func.func @transform_4(%arg0: i32) -> (i32, i32, i32) {
    %c0_i32 = arith.constant 0 : i32
    %c0_i32_0 = arith.constant 0 : i32
    %c0_i32_1 = arith.constant 0 : i32
    %c0_i32_2 = arith.constant 0 : i32
    return %c0_i32, %c0_i32_0, %c0_i32_1 : i32, i32, i32
  }
  func.func @transform_5(%arg0: i32) -> (i32, i32, i32) {
    %c0_i32 = arith.constant 0 : i32
    %c0_i32_0 = arith.constant 0 : i32
    %c0_i32_1 = arith.constant 0 : i32
    %c0_i32_2 = arith.constant 0 : i32
    return %c0_i32, %c0_i32_0, %c0_i32_1 : i32, i32, i32
  }
  func.func @transform_6(%arg0: i32) -> (i32, i32, i32) {
    %c0_i32 = arith.constant 0 : i32
    %c0_i32_0 = arith.constant 0 : i32
    %c0_i32_1 = arith.constant 0 : i32
    %c0_i32_2 = arith.constant 0 : i32
    return %c0_i32, %c0_i32_0, %c0_i32_1 : i32, i32, i32
  }
  func.func @transform_7(%arg0: i32) -> (i32, i32) {
    %c0_i32 = arith.constant 0 : i32
    %c0_i32_0 = arith.constant 0 : i32
    %c0_i32_1 = arith.constant 0 : i32
    return %c0_i32, %c0_i32_0 : i32, i32
  }
  func.func @transform_8(%arg0: i32) -> (i32, i32) {
    %c0_i32 = arith.constant 0 : i32
    %c0_i32_0 = arith.constant 0 : i32
    %c0_i32_1 = arith.constant 0 : i32
    return %c0_i32, %c0_i32_0 : i32, i32
  }
  func.func @transform_9(%arg0: i32) -> (i32, i32) {
    %c0_i32 = arith.constant 0 : i32
    %c0_i32_0 = arith.constant 0 : i32
    %c0_i32_1 = arith.constant 0 : i32
    return %c0_i32, %c0_i32_0 : i32, i32
  }
  func.func @transform_10(%arg0: i32) -> (i32, i32) {
    %c0_i32 = arith.constant 0 : i32
    %c0_i32_0 = arith.constant 0 : i32
    %c0_i32_1 = arith.constant 0 : i32
    return %c0_i32, %c0_i32_0 : i32, i32
  }
  func.func @transform_11(%arg0: i32) -> (i32, i32) {
    %c0_i32 = arith.constant 0 : i32
    %c0_i32_0 = arith.constant 0 : i32
    return %c0_i32, %arg0 : i32, i32
  }
}

</mosaic_0001>

<bundles_post_ra>
// kernel: tpu_custom_call.1
= control target key start
LH: loop header
LB: loop body
LE: loop exit
PB: predicated region body
PF: predicated region fallthrough
CT: control target
= control target key end

     0   :  { %vm138_vm0 = vcmask 15360   ;;  %vm171_vm1 = vcmask 1041408   ;;  %v10170_v2 = vmov 2   ;;  %v10166_v20 = vmov 3   ;;  %s10150_s0 = inlined_call_operand.vmem [shape: f32[4,2], index: 0, kind: input, shape index: {}]   ;;  %s10151_s3 = inlined_call_operand.vmem [shape: f32[3,128,4], index: 3, kind: input, shape index: {}]   ;;  %s10152_s4 = inlined_call_operand.vmem [shape: f32[3,128,128], index: 4, kind: input, shape index: {}]   ;;  %s10153_s6 = inlined_call_operand.vmem [shape: f32[3,4,1], index: 6, kind: input, shape index: {}]   ;;  %s10154_s5 = inlined_call_operand.vmem [shape: f32[3,4,128], index: 5, kind: input, shape index: {}]   ;;  %s10155_s1 = inlined_call_operand.vmem [shape: f32[4,2], index: 1, kind: input, shape index: {}]   ;;  %s10156_s11 = inlined_call_operand.vmem [shape: f32[10,2], index: 11, kind: output, shape index: {}]   ;;  %s10157_s7 = inlined_call_operand.vmem [shape: f32[64,4], index: 7, kind: input, shape index: {}]   ;;  %s10158_s8 = inlined_call_operand.vmem [shape: f32[64,64], index: 8, kind: input, shape index: {}]   ;;  %s10159_s10 = inlined_call_operand.vmem [shape: f32[2,1], index: 10, kind: input, shape index: {}]   ;;  %s10160_s2 = inlined_call_operand.vmem [shape: f32[2,2], index: 2, kind: input, shape index: {}]   ;;  %s10161_s9 = inlined_call_operand.vmem [shape: f32[2,64], index: 9, kind: input, shape index: {}]  }
   0x1   :  { %v8205_v0 = vld [vmem:[%s10150_s0] sm:$0xf]  ;;  %7910 = vset.pattern.permute.xlu0 %v10170_v2  ;;  %7911 = vset.pattern.permute.xlu1 %v10170_v2  ;;  %v5393_v4 = vld [vmem:[%s10151_s3 + $0x110] sm:$0xff]  ;;  %v5392_v5 = vld [vmem:[%s10151_s3 + $0x108] sm:$0xff] }
   0x2   :  { %v5391_v1 = vld [vmem:[%s10151_s3 + $0x100] sm:$0xff]  ;;  %v137_v3 = vrot.slane %v8205_v0, 2  ;;  %68 = vperm.xlu1 %7911, %v5393_v4   ;;  %v5394_v6 = vld [vmem:[%s10151_s3 + $0x118] sm:$0xff]  ;;  %v5396_v8 = vld [vmem:[%s10151_s3 + $0x128] sm:$0xff] }
   0x3   :  { %6260 = vmatprep.mubr.msk.f32.mxu0 %vm138_vm0, %v5391_v1  ;;  %58 = vperm.xlu0 %7910, %v5391_v1   ;;  %v5395_v7 = vld [vmem:[%s10151_s3 + $0x120] sm:$0xff]  ;;  %v5397_v9 = vld [vmem:[%s10151_s3 + $0x130] sm:$0xff]  ;;  %v5398_v10 = vld [vmem:[%s10151_s3 + $0x138] sm:$0xff] }
   0x4   :  { %6258 = vmatprep.subr.msk.mxu0 %vm171_vm1, %v137_v3  ;;  %v5399_v11 = vld [vmem:[%s10151_s3 + $0x140] sm:$0xff]  ;;  %v5400_v12 = vld [vmem:[%s10151_s3 + $0x148] sm:$0xff]  ;;  %v5401_v13 = vld [vmem:[%s10151_s3 + $0x150] sm:$0xff] }
   0x5   :  { %6259 = vmatpush3.msk.msra.mxu0 %vm171_vm1, %v137_v3  ;;  %v5402_v14 = vld [vmem:[%s10151_s3 + $0x158] sm:$0xff]  ;;  %v5403_v15 = vld [vmem:[%s10151_s3 + $0x160] sm:$0xff]  ;;  %v5404_v16 = vld [vmem:[%s10151_s3 + $0x168] sm:$0xff] }
   0x6   :  { %6261 = vmatmul.mubr.msk.f32.vlgmr.msra.gmra.mrb[0].mxu0 %vm138_vm0, %v5392_v5  ;;  %73 = vperm.xlu1 %7911, %v5394_v6   ;;  %v5405_v17 = vld [vmem:[%s10151_s3 + $0x170] sm:$0xff]  ;;  %v5406_v18 = vld [vmem:[%s10151_s3 + $0x178] sm:$0xff]  ;;  %v5424_v19 = vld [vmem:[%s10152_s4 + $0x100] sm:$0xff] }
   0x7   :  { %63 = vperm.xlu0 %7910, %v5392_v5   ;;  %6263 = vmatprep.mubr.msk.f32.mxu0 %vm138_vm0, %v5393_v4 }
   0x8   :  { %6316 = vmatprep.mubr.f32.mxu1 %v5424_v19 }
   0xa   :  { %6264 = vmatmul.mubr.msk.f32.gmra.mrb[2].mxu0 %vm138_vm0, %v5394_v6  ;;  %83 = vperm.xlu1 %7911, %v5396_v8  }
   0xb   :  { %78 = vperm.xlu0 %7910, %v5395_v7   ;;  %6266 = vmatprep.mubr.msk.f32.mxu0 %vm138_vm0, %v5395_v7 }
   0xe   :  { %6267 = vmatmul.mubr.msk.f32.gmra.mrb[4].mxu0 %vm138_vm0, %v5396_v8  ;;  %93 = vperm.xlu1 %7911, %v5398_v10  }
   0xf   :  { %88 = vperm.xlu0 %7910, %v5397_v9   ;;  %6269 = vmatprep.mubr.msk.f32.mxu0 %vm138_vm0, %v5397_v9 }
  0x12   :  { %6270 = vmatmul.mubr.msk.f32.gmra.mrb[6].mxu0 %vm138_vm0, %v5398_v10  ;;  %103 = vperm.xlu1 %7911, %v5400_v12  }
  0x13   :  { %98 = vperm.xlu0 %7910, %v5399_v11   ;;  %6272 = vmatprep.mubr.msk.f32.mxu0 %vm138_vm0, %v5399_v11 }
  0x16   :  { %6273 = vmatmul.mubr.msk.f32.gmra.mrb[8].mxu0 %vm138_vm0, %v5400_v12  ;;  %113 = vperm.xlu1 %7911, %v5402_v14  }
  0x17   :  { %108 = vperm.xlu0 %7910, %v5401_v13   ;;  %6275 = vmatprep.mubr.msk.f32.mxu0 %vm138_vm0, %v5401_v13 }
  0x1a   :  { %6276 = vmatmul.mubr.msk.f32.gmra.mrb[10].mxu0 %vm138_vm0, %v5402_v14  ;;  %123 = vperm.xlu1 %7911, %v5404_v16  }
  0x1b   :  { %118 = vperm.xlu0 %7910, %v5403_v15   ;;  %6278 = vmatprep.mubr.msk.f32.mxu0 %vm138_vm0, %v5403_v15 }
  0x1e   :  { %6279 = vmatmul.mubr.msk.f32.gmra.mrb[12].mxu0 %vm138_vm0, %v5404_v16  ;;  %133 = vperm.xlu1 %7911, %v5406_v18  }
  0x1f   :  { %128 = vperm.xlu0 %7910, %v5405_v17   ;;  %6281 = vmatprep.mubr.msk.f32.mxu0 %vm138_vm0, %v5405_v17 }
  0x22   :  { %6282 = vmatmul.mubr.msk.f32.gmra.mrb[14].mxu0 %vm138_vm0, %v5406_v18  ;;  %7913 = vset.pattern.permute.xlu1 %v10166_v20 }
  0x23   :  { %7912 = vset.pattern.permute.xlu0 %v10166_v20  ;;  %389 = vperm.xlu1 %7913, %v5392_v5  }
  0x24   :  { %385 = vperm.xlu0 %7912, %v5391_v1  }
  0x27   :  { %393 = vperm.xlu1 %7913, %v5393_v4  }
  0x28   :  { %397 = vperm.xlu0 %7912, %v5394_v6  }
  0x2b   :  { %401 = vperm.xlu1 %7913, %v5395_v7  }
  0x2c   :  { %405 = vperm.xlu0 %7912, %v5396_v8  }
  0x2f   :  { %409 = vperm.xlu1 %7913, %v5397_v9  }
  0x30   :  { %413 = vperm.xlu0 %7912, %v5398_v10  }
  0x33   :  { %417 = vperm.xlu1 %7913, %v5399_v11  }
  0x34   :  { %421 = vperm.xlu0 %7912, %v5400_v12  }
  0x37   :  { %425 = vperm.xlu1 %7913, %v5401_v13  }
  0x38   :  { %429 = vperm.xlu0 %7912, %v5402_v14  }
  0x3b   :  { %433 = vperm.xlu1 %7913, %v5403_v15  }
  0x3c   :  { %437 = vperm.xlu0 %7912, %v5404_v16  }
  0x3f   :  { %441 = vperm.xlu1 %7913, %v5405_v17  }
  0x40   :  { %445 = vperm.xlu0 %7912, %v5406_v18  }
  0x44   :  { %7915 = vset.pattern.permute.xlu0 %v10170_v2 }
  0x81   :  { %v8282_v21 = vpop.permute.xlu1 %68 }
  0x82   :  { %10341 = vst [vmem:[#allocation2_spill] sm:$0xff] %v8282_v21  ;;  %v8284_v22 = vpop.permute.xlu0 %58 }
  0x83   :  { %10342 = vst [vmem:[#allocation3_spill] sm:$0xff] %v8284_v22 }
  0x85   :  { %v8286_v23 = vpop.permute.xlu1 %73 }
  0x86   :  { %10343 = vst [vmem:[#allocation4_spill] sm:$0xff] %v8286_v23  ;;  %v8288_v24 = vpop.permute.xlu0 %63 }
  0x87   :  { %10344 = vst [vmem:[#allocation5_spill] sm:$0xff] %v8288_v24 }
  0x89   :  { %v8290_v25 = vpop.permute.xlu1 %83 }
  0x8a   :  { %10345 = vst [vmem:[#allocation6_spill] sm:$0xff] %v8290_v25  ;;  %v8292_v26 = vpop.permute.xlu0 %78 }
  0x8b   :  { %10346 = vst [vmem:[#allocation7_spill] sm:$0xff] %v8292_v26 }
  0x8d   :  { %v8296_v32 = vpop.permute.xlu1 %93 }
  0x8e   :  { %10347 = vst [vmem:[#allocation8_spill] sm:$0xff] %v8296_v32  ;;  %v8298_v35 = vpop.permute.xlu0 %88 }
  0x8f   :  { %10348 = vst [vmem:[#allocation9_spill] sm:$0xff] %v8298_v35 }
  0x91   :  { %v8303_v48 = vpop.permute.xlu1 %103 }
  0x92   :  { %10349 = vst [vmem:[#allocation10_spill] sm:$0xff] %v8303_v48  ;;  %v8306_v51 = vpop.permute.xlu0 %98 }
  0x93   :  { %10350 = vst [vmem:[#allocation11_spill] sm:$0xff] %v8306_v51 }
  0x95   :  { %v8310_v63 = vpop.permute.xlu1 %113 }
  0x96   :  { %10351 = vst [vmem:[#allocation12_spill] sm:$0xff] %v8310_v63  ;;  %v8312_v4 = vpop.permute.xlu0 %108 }
  0x97   :  { %10352 = vst [vmem:[#allocation13_spill] sm:$0xff] %v8312_v4 }
  0x99   :  { %v8317_v17 = vpop.permute.xlu1 %123 }
  0x9a   :  { %10353 = vst [vmem:[#allocation14_spill] sm:$0xff] %v8317_v17 }
  0xd9   :  { %v6262_v27 = vpop.f32.mrb[0].mxu0 }
  0xda   :  { %v246_v28 = vadd.f32 %v6262_v27, %v8288_v24  ;;  %v240_v29 = vpop.f32.mrb[1].mxu0  ;;  %v8320_v27 = vpop.permute.xlu0 %118 }
  0xdb   :  { %v241_v30 = vadd.f32 %v240_v29, %v8284_v22  ;;  %10354 = vst [vmem:[#allocation15_spill] sm:$0xff] %v8320_v27 }
  0xdc   :  { %v336_v31 = vmul.f32 0.01, %v246_v28  ;;  %vm320_vm2 = vcmp.gt.f32.partialorder %v246_v28, 0.0 }
  0xdd   :  { %v335_v33 = vmul.f32 0.01, %v241_v30  ;;  %v6265_v34 = vpop.f32.mrb[2].mxu0  ;;  %vm319_vm3 = vcmp.gt.f32.partialorder %v241_v30, 0.0 }
  0xde   :  { %v256_v36 = vadd.f32 %v6265_v34, %v8286_v23  ;;  %v250_v37 = vpop.f32.mrb[3].mxu0  ;;  %v352_v38 = vsel %vm320_vm2, %v246_v28, %v336_v31 }
  0xdf   :  { %v251_v39 = vadd.f32 %v250_v37, %v8282_v21  ;;  %v351_v40 = vsel %vm319_vm3, %v241_v30, %v335_v33 }
  0xe0   :  { %vm322_vm4 = vcmp.gt.f32.partialorder %v256_v36, 0.0  ;;  %v338_v41 = vmul.f32 0.01, %v256_v36  ;;  %v7372_v42 = vpack.c.bf16 %v352_v38, %v351_v40 }
  0xe1   :  { %vm321_vm5 = vcmp.gt.f32.partialorder %v251_v39, 0.0  ;;  %v337_v43 = vmul.f32 0.01, %v251_v39  ;;  %v6268_v44 = vpop.f32.mrb[4].mxu0 }
  0xe2   :  { %v266_v45 = vadd.f32 %v6268_v44, %v8290_v25  ;;  %v260_v46 = vpop.f32.mrb[5].mxu0  ;;  %7373 = vmatprep.subr.bf16.mxu1 %v7372_v42  ;;  %v354_v47 = vsel %vm322_vm4, %v256_v36, %v338_v41  ;;  %v8324_v41 = vpop.permute.xlu1 %133  ;;  %vm8139_vm4 = vmmov 0  }
  0xe3   :  { %v261_v49 = vadd.f32 %v260_v46, %v8292_v26  ;;  %7375 = vmatpush3.bf16.msra.mxu1 %v7372_v42  ;;  %v353_v50 = vsel %vm321_vm5, %v251_v39, %v337_v43  ;;  %10355 = vst [vmem:[#allocation16_spill] sm:$0xff] %v8324_v41  ;;  %v8326_v44 = vpop.permute.xlu0 %128 }
  0xe4   :  { %vm324_vm6 = vcmp.gt.f32.partialorder %v266_v45, 0.0  ;;  %v340_v52 = vmul.f32 0.01, %v266_v45  ;;  %v7376_v53 = vpack.c.bf16 %v354_v47, %v353_v50  ;;  %10356 = vst [vmem:[#allocation17_spill] sm:$0xff] %v8326_v44 }
  0xe5   :  { %vm323_vm7 = vcmp.gt.f32.partialorder %v261_v49, 0.0  ;;  %v339_v54 = vmul.f32 0.01, %v261_v49  ;;  %v6271_v55 = vpop.f32.mrb[6].mxu0 }
  0xe6   :  { %v276_v56 = vadd.f32 %v6271_v55, %v8296_v32  ;;  %v270_v57 = vpop.f32.mrb[7].mxu0  ;;  %7377 = vmatprep.subr.bf16.mxu1 %v7376_v53  ;;  %v356_v58 = vsel %vm324_vm6, %v266_v45, %v340_v52 }
  0xe7   :  { %v271_v59 = vadd.f32 %v270_v57, %v8298_v35  ;;  %7379 = vmatpush3.bf16.msra.mxu1 %v7376_v53  ;;  %v355_v60 = vsel %vm323_vm7, %v261_v49, %v339_v54 }
  0xe8   :  { %vm326_vm8 = vcmp.gt.f32.partialorder %v276_v56, 0.0  ;;  %v342_v61 = vmul.f32 0.01, %v276_v56  ;;  %v7380_v62 = vpack.c.bf16 %v356_v58, %v355_v60  ;;  %v5425_v58 = vld [vmem:[%s10152_s4 + $0x108] sm:$0xff]  ;;  %v5427_v60 = vld [vmem:[%s10152_s4 + $0x118] sm:$0xff] }
  0xe9   :  { %vm325_vm9 = vcmp.gt.f32.partialorder %v271_v59, 0.0  ;;  %v341_v1 = vmul.f32 0.01, %v271_v59  ;;  %v6274_v3 = vpop.f32.mrb[8].mxu0 }
  0xea   :  { %v286_v5 = vadd.f32 %v6274_v3, %v8303_v48  ;;  %v280_v6 = vpop.f32.mrb[9].mxu0  ;;  %7381 = vmatprep.subr.bf16.mxu1 %v7380_v62  ;;  %v358_v7 = vsel %vm326_vm8, %v276_v56, %v342_v61  ;;  %v5428_v61 = vld [vmem:[%s10152_s4 + $0x120] sm:$0xff]  ;;  %v5431_v3 = vld [vmem:[%s10152_s4 + $0x138] sm:$0xff] }
  0xeb   :  { %v281_v8 = vadd.f32 %v280_v6, %v8306_v51  ;;  %7383 = vmatpush3.bf16.msra.mxu1 %v7380_v62  ;;  %v357_v9 = vsel %vm325_vm9, %v271_v59, %v341_v1  ;;  %v5426_v59 = vld [vmem:[%s10152_s4 + $0x110] sm:$0xff]  ;;  %v5429_v62 = vld [vmem:[%s10152_s4 + $0x128] sm:$0xff] }
  0xec   :  { %vm328_vm10 = vcmp.gt.f32.partialorder %v286_v5, 0.0  ;;  %v344_v10 = vmul.f32 0.01, %v286_v5  ;;  %v7384_v11 = vpack.c.bf16 %v358_v7, %v357_v9  ;;  %v5430_v1 = vld [vmem:[%s10152_s4 + $0x130] sm:$0xff]  ;;  %v5433_v6 = vld [vmem:[%s10152_s4 + $0x148] sm:$0xff]  ;;  %v5436_v9 = vld [vmem:[%s10152_s4 + $0x160] sm:$0xff] }
  0xed   :  { %vm327_vm11 = vcmp.gt.f32.partialorder %v281_v8, 0.0  ;;  %v343_v12 = vmul.f32 0.01, %v281_v8  ;;  %v6277_v13 = vpop.f32.mrb[10].mxu0  ;;  %v5434_v7 = vld [vmem:[%s10152_s4 + $0x150] sm:$0xff] }
  0xee   :  { %v296_v14 = vadd.f32 %v6277_v13, %v8310_v63  ;;  %v290_v15 = vpop.f32.mrb[11].mxu0  ;;  %7385 = vmatprep.subr.bf16.mxu1 %v7384_v11  ;;  %v360_v16 = vsel %vm328_vm10, %v286_v5, %v344_v10  ;;  %v5432_v5 = vld [vmem:[%s10152_s4 + $0x140] sm:$0xff]  ;;  %v5437_v10 = vld [vmem:[%s10152_s4 + $0x168] sm:$0xff]  ;;  %v10168_v13 = vmov 0.0|0.0  }
  0xef   :  { %v291_v18 = vadd.f32 %v290_v15, %v8312_v4  ;;  %7387 = vmatpush3.bf16.msra.mxu1 %v7384_v11  ;;  %v359_v19 = vsel %vm327_vm11, %v281_v8, %v343_v12  ;;  %v5435_v8 = vld [vmem:[%s10152_s4 + $0x158] sm:$0xff]  ;;  %v5438_v11 = vld [vmem:[%s10152_s4 + $0x170] sm:$0xff]  ;;  %7404 = vmatprep.subr.bf16.mxu0 %v10168_v13  ;;  %v10164_v15 = vmov 0  }
  0xf0   :  { %vm330_vm12 = vcmp.gt.f32.partialorder %v296_v14, 0.0  ;;  %v346_v28 = vmul.f32 0.01, %v296_v14  ;;  %v7388_v29 = vpack.c.bf16 %v360_v16, %v359_v19  ;;  %v5439_v12 = vld [vmem:[%s10152_s4 + $0x178] sm:$0xff]  ;;  %7914 = vset.pattern.permute.xlu1 %v10164_v15  ;;  %v5441_v16 = vld [vmem:[%s10153_s6 + $0x8] sm:$0xf]  ;;  %v8385_v19 = vpop.permute.xlu1 %389 }
  0xf1   :  { %vm329_vm13 = vcmp.gt.f32.partialorder %v291_v18, 0.0  ;;  %v345_v30 = vmul.f32 0.01, %v291_v18  ;;  %v6280_v31 = vpop.f32.mrb[12].mxu0  ;;  %647 = vperm.xlu1 %7914, %v5441_v16   ;;  %10358 = vst [vmem:[#allocation19_spill] sm:$0xff] %v8385_v19 }
  0xf2   :  { %v306_v33 = vadd.f32 %v6280_v31, %v8317_v17  ;;  %v300_v34 = vpop.f32.mrb[13].mxu0  ;;  %7389 = vmatprep.subr.bf16.mxu1 %v7388_v29  ;;  %v362_v36 = vsel %vm330_vm12, %v296_v14, %v346_v28  ;;  %v10162_v14 = vmov 0.0  }
  0xf3   :  { %v301_v37 = vadd.f32 %v300_v34, %v8320_v27  ;;  %7391 = vmatpush3.bf16.msra.mxu1 %v7388_v29  ;;  %v361_v38 = vsel %vm329_vm13, %v291_v18, %v345_v30  ;;  %6372 = vmatprep.mubr.msk.f32.mxu0 %vm8139_vm4, %v10162_v14  ;;  %v8383_v18 = vpop.permute.xlu0 %385 }
  0xf4   :  { %vm332_vm14 = vcmp.gt.f32.partialorder %v306_v33, 0.0  ;;  %v348_v39 = vmul.f32 0.01, %v306_v33  ;;  %v7392_v40 = vpack.c.bf16 %v362_v36, %v361_v38  ;;  %10357 = vst [vmem:[#allocation18_spill] sm:$0xff] %v8383_v18  ;;  %v8389_v29 = vpop.permute.xlu1 %393 }
  0xf5   :  { %vm331_vm15 = vcmp.gt.f32.partialorder %v301_v37, 0.0  ;;  %v347_v42 = vmul.f32 0.01, %v301_v37  ;;  %v6283_v43 = vpop.f32.mrb[14].mxu0  ;;  %7916 = vset.pattern.permute.xlu1 %v10170_v2  ;;  %10360 = vst [vmem:[#allocation21_spill] sm:$0xff] %v8389_v29 }
  0xf6   :  { %v316_v45 = vadd.f32 %v6283_v43, %v8324_v41  ;;  %v310_v46 = vpop.f32.mrb[15].mxu0  ;;  %7393 = vmatprep.subr.bf16.mxu1 %v7392_v40  ;;  %v364_v47 = vsel %vm332_vm14, %v306_v33, %v348_v39 }
  0xf7   :  { %v311_v49 = vadd.f32 %v310_v46, %v8326_v44  ;;  %7395 = vmatpush3.bf16.msra.mxu1 %v7392_v40  ;;  %v363_v50 = vsel %vm331_vm15, %v301_v37, %v347_v42  ;;  %v8387_v28 = vpop.permute.xlu0 %397 }
  0xf8   :  { %vm334_vm2 = vcmp.gt.f32.partialorder %v316_v45, 0.0  ;;  %v350_v52 = vmul.f32 0.01, %v316_v45  ;;  %v7396_v53 = vpack.c.bf16 %v364_v47, %v363_v50  ;;  %10359 = vst [vmem:[#allocation20_spill] sm:$0xff] %v8387_v28  ;;  %v8393_v31 = vpop.permute.xlu1 %401 }
  0xf9   :  { %vm333_vm3 = vcmp.gt.f32.partialorder %v311_v49, 0.0  ;;  %v349_v54 = vmul.f32 0.01, %v311_v49  ;;  %10362 = vst [vmem:[#allocation23_spill] sm:$0xff] %v8393_v31 }
  0xfa   :  { %7397 = vmatprep.subr.bf16.mxu1 %v7396_v53  ;;  %v366_v55 = vsel %vm334_vm2, %v316_v45, %v350_v52 }
  0xfb   :  { %7399 = vmatpush3.bf16.msra.mxu1 %v7396_v53  ;;  %v365_v56 = vsel %vm333_vm3, %v311_v49, %v349_v54  ;;  %v8391_v30 = vpop.permute.xlu0 %405 }
  0xfc   :  { %v7400_v57 = vpack.c.bf16 %v366_v55, %v365_v56  ;;  %10361 = vst [vmem:[#allocation22_spill] sm:$0xff] %v8391_v30  ;;  %v8399_v43 = vpop.permute.xlu1 %409 }
  0xfd   :  { %10364 = vst [vmem:[#allocation25_spill] sm:$0xff] %v8399_v43 }
  0xfe   :  { %7401 = vmatprep.subr.bf16.mxu1 %v7400_v57 }
  0xff   :  { %7403 = vmatpush3.bf16.msra.mxu1 %v7400_v57  ;;  %v8397_v39 = vpop.permute.xlu0 %413 }
 0x100   :  { %10363 = vst [vmem:[#allocation24_spill] sm:$0xff] %v8397_v39 }
 0x102   :  { %6317 = vmatmul.mubr.f32.vlgmr.msra.gmra.mrb[0].mxu1 %v5425_v58 }
 0x103   :  { %6319 = vmatprep.mubr.f32.mxu1 %v5426_v59  ;;  %v8404_v59 = vpop.permute.xlu0 %421 }
 0x104   :  { %10365 = vst [vmem:[#allocation26_spill] sm:$0xff] %v8404_v59 }
 0x106   :  { %6320 = vmatmul.mubr.f32.gmra.mrb[2].mxu1 %v5427_v60 }
 0x107   :  { %6322 = vmatprep.mubr.f32.mxu1 %v5428_v61 }
 0x10a   :  { %6323 = vmatmul.mubr.f32.gmra.mrb[4].mxu1 %v5429_v62  ;;  %v8408_v62 = vpop.permute.xlu1 %417 }
 0x10b   :  { %6325 = vmatprep.mubr.f32.mxu1 %v5430_v1  ;;  %10366 = vst [vmem:[#allocation27_spill] sm:$0xff] %v8408_v62 }
 0x10e   :  { %6326 = vmatmul.mubr.f32.gmra.mrb[6].mxu1 %v5431_v3 }
 0x10f   :  { %6328 = vmatprep.mubr.f32.mxu1 %v5432_v5 }
 0x112   :  { %6329 = vmatmul.mubr.f32.gmra.mrb[8].mxu1 %v5433_v6 }
 0x113   :  { %6331 = vmatprep.mubr.f32.mxu1 %v5434_v7 }
 0x116   :  { %6332 = vmatmul.mubr.f32.gmra.mrb[10].mxu1 %v5435_v8 }
 0x117   :  { %6334 = vmatprep.mubr.f32.mxu1 %v5436_v9 }
 0x11a   :  { %6335 = vmatmul.mubr.f32.gmra.mrb[12].mxu1 %v5437_v10 }
 0x11b   :  { %6337 = vmatprep.mubr.f32.mxu1 %v5438_v11 }
 0x11e   :  { %6338 = vmatmul.mubr.f32.gmra.mrb[14].mxu1 %v5439_v12 }
 0x1d5   :  { %v6318_v33 = vpop.f32.mrb[0].mxu1 }
 0x1d6   :  { %v520_v34 = vadd.f32 %v6318_v33, %v8385_v19  ;;  %v514_v36 = vpop.f32.mrb[1].mxu1  ;;  %v8413_v33 = vpop.permute.xlu0 %429 }
 0x1d7   :  { %v515_v37 = vadd.f32 %v514_v36, %v8383_v18  ;;  %10367 = vst [vmem:[#allocation28_spill] sm:$0xff] %v8413_v33 }
 0x1d8   :  { %vm594_vm5 = vcmp.gt.f32.partialorder %v520_v34, 0.0  ;;  %v610_v38 = vmul.f32 0.01, %v520_v34 }
 0x1d9   :  { %vm593_vm6 = vcmp.gt.f32.partialorder %v515_v37, 0.0  ;;  %v609_v40 = vmul.f32 0.01, %v515_v37  ;;  %v6321_v42 = vpop.f32.mrb[2].mxu1 }
 0x1da   :  { %v626_v45 = vsel %vm594_vm5, %v520_v34, %v610_v38  ;;  %v530_v46 = vadd.f32 %v6321_v42, %v8387_v28  ;;  %v524_v47 = vpop.f32.mrb[3].mxu1 }
 0x1db   :  { %v625_v49 = vsel %vm593_vm6, %v515_v37, %v609_v40  ;;  %v525_v50 = vadd.f32 %v524_v47, %v8389_v29  ;;  %v8415_v37 = vpop.permute.xlu1 %425 }
 0x1dc   :  { %v7405_v52 = vpack.c.bf16 %v626_v45, %v625_v49  ;;  %vm596_vm7 = vcmp.gt.f32.partialorder %v530_v46, 0.0  ;;  %v612_v53 = vmul.f32 0.01, %v530_v46  ;;  %10368 = vst [vmem:[#allocation29_spill] sm:$0xff] %v8415_v37 }
 0x1dd   :  { %vm595_vm8 = vcmp.gt.f32.partialorder %v525_v50, 0.0  ;;  %v611_v54 = vmul.f32 0.01, %v525_v50  ;;  %v6324_v55 = vpop.f32.mrb[4].mxu1 }
 0x1de   :  { %v628_v56 = vsel %vm596_vm7, %v530_v46, %v612_v53  ;;  %v540_v57 = vadd.f32 %v6324_v55, %v8391_v30  ;;  %v534_v58 = vpop.f32.mrb[5].mxu1  ;;  %7406 = vmatpush3.bf16.msra.mxu0 %v7405_v52 }
 0x1df   :  { %v627_v60 = vsel %vm595_vm8, %v525_v50, %v611_v54  ;;  %v535_v61 = vadd.f32 %v534_v58, %v8393_v31  ;;  %7407 = vmatprep.subr.bf16.mxu0 %v10168_v13 }
 0x1e0   :  { %v7408_v1 = vpack.c.bf16 %v628_v56, %v627_v60  ;;  %vm598_vm9 = vcmp.gt.f32.partialorder %v540_v57, 0.0  ;;  %v614_v3 = vmul.f32 0.01, %v540_v57  ;;  %v8421_v56 = vpop.permute.xlu0 %437  ;;  %v8425_v60 = vpop.permute.xlu1 %433 }
 0x1e1   :  { %vm597_vm10 = vcmp.gt.f32.partialorder %v535_v61, 0.0  ;;  %v613_v5 = vmul.f32 0.01, %v535_v61  ;;  %v6327_v6 = vpop.f32.mrb[6].mxu1  ;;  %10369 = vst [vmem:[#allocation30_spill] sm:$0xff] %v8421_v56  ;;  %10370 = vst [vmem:[#allocation31_spill] sm:$0xff] %v8425_v60 }
 0x1e2   :  { %v630_v7 = vsel %vm598_vm9, %v540_v57, %v614_v3  ;;  %v550_v8 = vadd.f32 %v6327_v6, %v8397_v39  ;;  %v544_v9 = vpop.f32.mrb[7].mxu1  ;;  %7409 = vmatpush3.bf16.msra.mxu0 %v7408_v1 }
 0x1e3   :  { %v629_v10 = vsel %vm597_vm10, %v535_v61, %v613_v5  ;;  %v545_v11 = vadd.f32 %v544_v9, %v8399_v43  ;;  %7410 = vmatprep.subr.bf16.mxu0 %v10168_v13 }
 0x1e4   :  { %v7411_v12 = vpack.c.bf16 %v630_v7, %v629_v10  ;;  %vm600_vm11 = vcmp.gt.f32.partialorder %v550_v8, 0.0  ;;  %v616_v16 = vmul.f32 0.01, %v550_v8 }
 0x1e5   :  { %vm599_vm12 = vcmp.gt.f32.partialorder %v545_v11, 0.0  ;;  %v615_v34 = vmul.f32 0.01, %v545_v11  ;;  %v6330_v36 = vpop.f32.mrb[8].mxu1 }
 0x1e6   :  { %v632_v38 = vsel %vm600_vm11, %v550_v8, %v616_v16  ;;  %v560_v40 = vadd.f32 %v6330_v36, %v8404_v59  ;;  %v554_v42 = vpop.f32.mrb[9].mxu1  ;;  %7412 = vmatpush3.bf16.msra.mxu0 %v7411_v12  ;;  %v8430_v16 = vpop.permute.xlu0 %445 }
 0x1e7   :  { %v631_v45 = vsel %vm599_vm12, %v545_v11, %v615_v34  ;;  %v555_v46 = vadd.f32 %v554_v42, %v8408_v62  ;;  %7413 = vmatprep.subr.bf16.mxu0 %v10168_v13  ;;  %10371 = vst [vmem:[#allocation32_spill] sm:$0xff] %v8430_v16 }
 0x1e8   :  { %v7414_v47 = vpack.c.bf16 %v632_v38, %v631_v45  ;;  %vm602_vm13 = vcmp.gt.f32.partialorder %v560_v40, 0.0  ;;  %v618_v49 = vmul.f32 0.01, %v560_v40  ;;  %v8432_v38 = vpop.permute.xlu1 %441 }
 0x1e9   :  { %vm601_vm14 = vcmp.gt.f32.partialorder %v555_v46, 0.0  ;;  %v617_v50 = vmul.f32 0.01, %v555_v46  ;;  %v6333_v52 = vpop.f32.mrb[10].mxu1  ;;  %10372 = vst [vmem:[#allocation33_spill] sm:$0xff] %v8432_v38 }
 0x1ea   :  { %v634_v53 = vsel %vm602_vm13, %v560_v40, %v618_v49  ;;  %v570_v54 = vadd.f32 %v6333_v52, %v8413_v33  ;;  %v564_v55 = vpop.f32.mrb[11].mxu1  ;;  %7415 = vmatpush3.bf16.msra.mxu0 %v7414_v47 }
 0x1eb   :  { %v633_v57 = vsel %vm601_vm14, %v555_v46, %v617_v50  ;;  %v565_v58 = vadd.f32 %v564_v55, %v8415_v37  ;;  %7416 = vmatprep.subr.bf16.mxu0 %v10168_v13 }
 0x1ec   :  { %v7417_v61 = vpack.c.bf16 %v634_v53, %v633_v57  ;;  %vm604_vm15 = vcmp.gt.f32.partialorder %v570_v54, 0.0  ;;  %v620_v1 = vmul.f32 0.01, %v570_v54  ;;  %v5440_v57 = vld [vmem:[%s10154_s5 + $0x8] sm:$0xf] }
 0x1ed   :  { %vm603_vm2 = vcmp.gt.f32.partialorder %v565_v58, 0.0  ;;  %v619_v3 = vmul.f32 0.01, %v565_v58  ;;  %v6336_v5 = vpop.f32.mrb[12].mxu1 }
 0x1ee   :  { %v636_v6 = vsel %vm604_vm15, %v570_v54, %v620_v1  ;;  %v580_v7 = vadd.f32 %v6336_v5, %v8421_v56  ;;  %v574_v8 = vpop.f32.mrb[13].mxu1  ;;  %7418 = vmatpush3.bf16.msra.mxu0 %v7417_v61  ;;  %v8448_v61 = vld [vmem:[%s10151_s3 + $0x88] sm:$0xff]  ;;  %v8454_v1 = vld [vmem:[%s10151_s3 + $0x98] sm:$0xff] }
 0x1ef   :  { %v635_v9 = vsel %vm603_vm2, %v565_v58, %v619_v3  ;;  %v575_v10 = vadd.f32 %v574_v8, %v8425_v60  ;;  %7419 = vmatprep.subr.bf16.mxu0 %v10168_v13  ;;  %v5442_v58 = vld [vmem:[%s10151_s3 + $0x80] sm:$0xff]  ;;  %753 = vperm.xlu1 %7916, %v8448_v61   ;;  %v8459_v3 = vld [vmem:[%s10151_s3 + $0x90] sm:$0xff]  ;;  %v8466_v5 = vld [vmem:[%s10151_s3 + $0xa8] sm:$0xff] }
 0x1f0   :  { %v7420_v11 = vpack.c.bf16 %v636_v6, %v635_v9  ;;  %vm606_vm3 = vcmp.gt.f32.partialorder %v580_v7, 0.0  ;;  %v622_v12 = vmul.f32 0.01, %v580_v7  ;;  %748 = vperm.xlu0 %7915, %v5442_v58   ;;  %v5446_v6 = vld [vmem:[%s10151_s3 + $0xa0] sm:$0xff]  ;;  %v5448_v8 = vld [vmem:[%s10151_s3 + $0xb0] sm:$0xff]  ;;  %v5451_v9 = vld [vmem:[%s10151_s3 + $0xc8] sm:$0xff] }
 0x1f1   :  { %vm605_vm5 = vcmp.gt.f32.partialorder %v575_v10, 0.0  ;;  %v621_v34 = vmul.f32 0.01, %v575_v10  ;;  %v6339_v36 = vpop.f32.mrb[14].mxu1 }
 0x1f2   :  { %v638_v40 = vsel %vm606_vm3, %v580_v7, %v622_v12  ;;  %v590_v42 = vadd.f32 %v6339_v36, %v8430_v16  ;;  %v584_v45 = vpop.f32.mrb[15].mxu1  ;;  %7421 = vmatpush3.bf16.msra.mxu0 %v7420_v11  ;;  %v5449_v7 = vld [vmem:[%s10151_s3 + $0xb8] sm:$0xff]  ;;  %v5452_v12 = vld [vmem:[%s10151_s3 + $0xd0] sm:$0xff]  ;;  %v5454_v36 = vld [vmem:[%s10151_s3 + $0xe0] sm:$0xff] }
 0x1f3   :  { %v637_v46 = vsel %vm605_vm5, %v575_v10, %v621_v34  ;;  %v585_v47 = vadd.f32 %v584_v45, %v8432_v38  ;;  %7422 = vmatprep.subr.bf16.mxu0 %v10168_v13  ;;  %758 = vperm.xlu1 %7916, %v8459_v3   ;;  %v5450_v10 = vld [vmem:[%s10151_s3 + $0xc0] sm:$0xff]  ;;  %v5453_v11 = vld [vmem:[%s10151_s3 + $0xd8] sm:$0xff]  ;;  %v5455_v34 = vld [vmem:[%s10151_s3 + $0xe8] sm:$0xff]  ;;  %v8510_v45 = vpop.permute.xlu1 %647 }
 0x1f4   :  { %v7423_v49 = vpack.c.bf16 %v638_v40, %v637_v46  ;;  %vm608_vm6 = vcmp.gt.f32.partialorder %v590_v42, 0.0  ;;  %v624_v50 = vmul.f32 0.01, %v590_v42  ;;  %763 = vperm.xlu0 %7915, %v8454_v1   ;;  %v5457_v40 = vld [vmem:[%s10151_s3 + $0xf8] sm:$0xff]  ;;  %10373 = vst [vmem:[#allocation34_spill] sm:$0xff] %v8510_v45 }
 0x1f5   :  { %vm607_vm7 = vcmp.gt.f32.partialorder %v585_v47, 0.0  ;;  %v623_v52 = vmul.f32 0.01, %v585_v47 }
 0x1f6   :  { %v640_v53 = vsel %vm608_vm6, %v590_v42, %v624_v50  ;;  %7424 = vmatpush3.bf16.msra.mxu0 %v7423_v49  ;;  %v5456_v42 = vld [vmem:[%s10151_s3 + $0xf0] sm:$0xff] }
 0x1f7   :  { %v639_v54 = vsel %vm607_vm7, %v585_v47, %v623_v52  ;;  %7425 = vmatprep.subr.bf16.mxu0 %v10168_v13  ;;  %768 = vperm.xlu1 %7916, %v5446_v6  }
 0x1f8   :  { %v7426_v55 = vpack.c.bf16 %v640_v53, %v639_v54  ;;  %773 = vperm.xlu0 %7915, %v8466_v5  }
 0x1fa   :  { %7427 = vmatpush3.bf16.msra.mxu0 %v7426_v55 }
 0x1fb   :  { %778 = vperm.xlu1 %7916, %v5448_v8  }
 0x1fc   :  { %783 = vperm.xlu0 %7915, %v5449_v7  }
 0x1fd   :  { %6373 = vmatmul.mubr.f32.vlgmr.msra.gmra.mrb[16].mxu0 %v5440_v57 }
 0x1fe   :  { %6377 = vmatprep.mubr.msk.f32.mxu0 %vm138_vm0, %v5442_v58 }
 0x1ff   :  { %788 = vperm.xlu1 %7916, %v5450_v10  }
 0x200   :  { %793 = vperm.xlu0 %7915, %v5451_v9  }
 0x203   :  { %798 = vperm.xlu1 %7916, %v5452_v12  }
 0x204   :  { %803 = vperm.xlu0 %7915, %v5453_v11  }
 0x207   :  { %808 = vperm.xlu1 %7916, %v5454_v36  }
 0x208   :  { %813 = vperm.xlu0 %7915, %v5455_v34  }
 0x20b   :  { %818 = vperm.xlu1 %7916, %v5456_v42  }
 0x20c   :  { %823 = vperm.xlu0 %7915, %v5457_v40  }
 0x20f   :  { %7917 = vset.pattern.permute.xlu1 %v10166_v20 }
 0x210   :  { %7918 = vset.pattern.permute.xlu0 %v10166_v20  ;;  %1072 = vperm.xlu1 %7917, %v5442_v58  }
 0x211   :  { %1076 = vperm.xlu0 %7918, %v8448_v61  }
 0x214   :  { %1080 = vperm.xlu1 %7917, %v8459_v3  }
 0x215   :  { %1088 = vperm.xlu0 %7918, %v5446_v6  }
 0x218   :  { %1084 = vperm.xlu1 %7917, %v8454_v1  }
 0x219   :  { %1096 = vperm.xlu0 %7918, %v5448_v8  }
 0x21c   :  { %1092 = vperm.xlu1 %7917, %v8466_v5  }
 0x21d   :  { %1104 = vperm.xlu0 %7918, %v5450_v10  }
 0x220   :  { %1100 = vperm.xlu1 %7917, %v5449_v7  }
 0x221   :  { %1112 = vperm.xlu0 %7918, %v5452_v12  }
 0x224   :  { %1108 = vperm.xlu1 %7917, %v5451_v9  }
 0x225   :  { %1120 = vperm.xlu0 %7918, %v5454_v36  }
 0x228   :  { %1116 = vperm.xlu1 %7917, %v5453_v11  }
 0x229   :  { %1128 = vperm.xlu0 %7918, %v5456_v42  }
 0x22c   :  { %1124 = vperm.xlu1 %7917, %v5455_v34  }
 0x22d   :  { %7919 = vset.pattern.permute.xlu0 %v10164_v15 }
 0x230   :  { %1132 = vperm.xlu1 %7917, %v5457_v40  }
 0x234   :  { %7920 = vset.pattern.permute.xlu1 %v10170_v2 }
 0x2d0   :  { %v716_v46 = vpop.f32.mrb[16].mxu0 }
 0x2d1   :  { %v717_v47 = vadd.f32 %v716_v46, %v8510_v45  ;;  %v6374_v49 = vpop.f32.mrb[17].mxu0 }
 0x2d3   :  { %7930 = vtanh.f32 %v717_v47  ;;  %v722_v54 = vrot.slane %v717_v47, 2 }
 0x2d5   :  { %v724_v55 = vsub.f32 %v8205_v0, %v722_v54  ;;  %v5475_v0 = vld [vmem:[%s10152_s4 + $0x80] sm:$0xff] }
 0x2d6   :  { %6433 = vmatprep.mubr.f32.mxu1 %v5475_v0 }
 0x2dd   :  { %v7931_v50 = vpop.eup %7930 }
 0x2de   :  { %v725_v52 = vsub.f32 0.0, %v7931_v50 }
 0x2e0   :  { %v726_v53 = vmul.f32 1.442695, %v725_v52 }
 0x2e2   :  { %7932 = vpow2.f32 %v726_v53 }
 0x2ec   :  { %v7933_v57 = vpop.eup %7932 }
 0x2ed   :  { %v8514_v58 = vmul.f32 %v7933_v57, %v724_v55 }
 0x2ef   :  { %6375 = vmatprep.subr.msk.mxu0 %vm171_vm1, %v8514_v58 }
 0x2f0   :  { %6376 = vmatpush3.msk.msra.mxu0 %vm171_vm1, %v8514_v58 }
 0x2f1   :  { %6378 = vmatmul.mubr.msk.f32.vlgmr.msra.gmra.mrb[18].mxu0 %vm138_vm0, %v8448_v61  ;;  %7460 = vmatprep.subr.bf16.mxu0 %v10168_v13  ;;  %v8545_v61 = vpop.permute.xlu0 %748 }
 0x2f2   :  { %6380 = vmatprep.mubr.msk.f32.mxu0 %vm138_vm0, %v8459_v3  ;;  %10374 = vst [vmem:[#allocation35_spill] sm:$0xff] %v8545_v61 }
 0x2f5   :  { %6381 = vmatmul.mubr.msk.f32.gmra.mrb[20].mxu0 %vm138_vm0, %v8454_v1  ;;  %v8547_v1 = vpop.permute.xlu1 %753  ;;  %v8549_v3 = vpop.permute.xlu0 %763 }
 0x2f6   :  { %6383 = vmatprep.mubr.msk.f32.mxu0 %vm138_vm0, %v5446_v6  ;;  %10375 = vst [vmem:[#allocation36_spill] sm:$0xff] %v8547_v1  ;;  %10376 = vst [vmem:[#allocation37_spill] sm:$0xff] %v8549_v3 }
 0x2f9   :  { %6384 = vmatmul.mubr.msk.f32.gmra.mrb[22].mxu0 %vm138_vm0, %v8466_v5  ;;  %v8551_v5 = vpop.permute.xlu1 %758  ;;  %v8553_v6 = vpop.permute.xlu0 %773 }
 0x2fa   :  { %6386 = vmatprep.mubr.msk.f32.mxu0 %vm138_vm0, %v5448_v8  ;;  %10377 = vst [vmem:[#allocation38_spill] sm:$0xff] %v8551_v5  ;;  %10378 = vst [vmem:[#allocation39_spill] sm:$0xff] %v8553_v6 }
 0x2fd   :  { %6387 = vmatmul.mubr.msk.f32.gmra.mrb[24].mxu0 %vm138_vm0, %v5449_v7  ;;  %v8555_v7 = vpop.permute.xlu1 %768 }
 0x2fe   :  { %6389 = vmatprep.mubr.msk.f32.mxu0 %vm138_vm0, %v5450_v10  ;;  %10379 = vst [vmem:[#allocation40_spill] sm:$0xff] %v8555_v7 }
 0x301   :  { %6390 = vmatmul.mubr.msk.f32.gmra.mrb[26].mxu0 %vm138_vm0, %v5451_v9 }
 0x302   :  { %6392 = vmatprep.mubr.msk.f32.mxu0 %vm138_vm0, %v5452_v12 }
 0x305   :  { %6393 = vmatmul.mubr.msk.f32.gmra.mrb[28].mxu0 %vm138_vm0, %v5453_v11 }
 0x306   :  { %6395 = vmatprep.mubr.msk.f32.mxu0 %vm138_vm0, %v5454_v36 }
 0x309   :  { %6396 = vmatmul.mubr.msk.f32.gmra.mrb[30].mxu0 %vm138_vm0, %v5455_v34  ;;  %v8559_v34 = vpop.permute.xlu0 %783 }
 0x30a   :  { %6398 = vmatprep.mubr.msk.f32.mxu0 %vm138_vm0, %v5456_v42  ;;  %10380 = vst [vmem:[#allocation41_spill] sm:$0xff] %v8559_v34  ;;  %v8561_v42 = vpop.permute.xlu1 %778 }
 0x30b   :  { %10381 = vst [vmem:[#allocation42_spill] sm:$0xff] %v8561_v42 }
 0x30d   :  { %6399 = vmatmul.mubr.msk.f32.gmra.mrb[32].mxu0 %vm138_vm0, %v5457_v40 }
 0x30e   :  { %6489 = vmatprep.mubr.msk.f32.mxu0 %vm8139_vm4, %v10162_v14  ;;  %v8566_v14 = vpop.permute.xlu0 %793 }
 0x30f   :  { %10382 = vst [vmem:[#allocation43_spill] sm:$0xff] %v8566_v14 }
 0x3c4   :  { %v6379_v8 = vpop.f32.mrb[18].mxu0 }
 0x3c5   :  { %v933_v9 = vadd.f32 %v6379_v8, %v8547_v1  ;;  %v927_v10 = vpop.f32.mrb[19].mxu0 }
 0x3c6   :  { %v928_v11 = vadd.f32 %v927_v10, %v8545_v61 }
 0x3c7   :  { %vm1007_vm8 = vcmp.gt.f32.partialorder %v933_v9, 0.0  ;;  %v1023_v12 = vmul.f32 0.01, %v933_v9 }
 0x3c8   :  { %vm1006_vm9 = vcmp.gt.f32.partialorder %v928_v11, 0.0  ;;  %v1022_v36 = vmul.f32 0.01, %v928_v11  ;;  %v6382_v40 = vpop.f32.mrb[20].mxu0 }
 0x3c9   :  { %v943_v46 = vadd.f32 %v6382_v40, %v8549_v3  ;;  %v937_v47 = vpop.f32.mrb[21].mxu0  ;;  %v1039_v49 = vsel %vm1007_vm8, %v933_v9, %v1023_v12  ;;  %v8569_v12 = vpop.permute.xlu1 %788 }
 0x3ca   :  { %v938_v50 = vadd.f32 %v937_v47, %v8551_v5  ;;  %v1038_v52 = vsel %vm1006_vm9, %v928_v11, %v1022_v36  ;;  %10383 = vst [vmem:[#allocation44_spill] sm:$0xff] %v8569_v12 }
 0x3cb   :  { %vm1009_vm10 = vcmp.gt.f32.partialorder %v943_v46, 0.0  ;;  %v1025_v53 = vmul.f32 0.01, %v943_v46  ;;  %v7428_v54 = vpack.c.bf16 %v1039_v49, %v1038_v52 }
 0x3cc   :  { %vm1008_vm11 = vcmp.gt.f32.partialorder %v938_v50, 0.0  ;;  %v1024_v55 = vmul.f32 0.01, %v938_v50  ;;  %v6385_v57 = vpop.f32.mrb[22].mxu0 }
 0x3cd   :  { %v953_v0 = vadd.f32 %v6385_v57, %v8553_v6  ;;  %v947_v8 = vpop.f32.mrb[23].mxu0  ;;  %7429 = vmatprep.subr.bf16.mxu1 %v7428_v54  ;;  %v1041_v10 = vsel %vm1009_vm10, %v943_v46, %v1025_v53 }
 0x3ce   :  { %v948_v40 = vadd.f32 %v947_v8, %v8555_v7  ;;  %7431 = vmatpush3.bf16.msra.mxu1 %v7428_v54  ;;  %v1040_v9 = vsel %vm1008_vm11, %v938_v50, %v1024_v55  ;;  %v8573_v55 = vpop.permute.xlu0 %803 }
 0x3cf   :  { %vm1011_vm12 = vcmp.gt.f32.partialorder %v953_v0, 0.0  ;;  %v1027_v11 = vmul.f32 0.01, %v953_v0  ;;  %v7432_v36 = vpack.c.bf16 %v1041_v10, %v1040_v9  ;;  %10384 = vst [vmem:[#allocation45_spill] sm:$0xff] %v8573_v55  ;;  %v8575_v9 = vpop.permute.xlu1 %798 }
 0x3d0   :  { %vm1010_vm13 = vcmp.gt.f32.partialorder %v948_v40, 0.0  ;;  %v1026_v47 = vmul.f32 0.01, %v948_v40  ;;  %v6388_v49 = vpop.f32.mrb[24].mxu0  ;;  %10385 = vst [vmem:[#allocation46_spill] sm:$0xff] %v8575_v9 }
 0x3d1   :  { %v963_v52 = vadd.f32 %v6388_v49, %v8559_v34  ;;  %v957_v57 = vpop.f32.mrb[25].mxu0  ;;  %7433 = vmatprep.subr.bf16.mxu1 %v7432_v36  ;;  %v1043_v15 = vsel %vm1011_vm12, %v953_v0, %v1027_v11 }
 0x3d2   :  { %v958_v46 = vadd.f32 %v957_v57, %v8561_v42  ;;  %7435 = vmatpush3.bf16.msra.mxu1 %v7432_v36  ;;  %v1042_v53 = vsel %vm1010_vm13, %v948_v40, %v1026_v47  ;;  %v8580_v42 = vpop.permute.xlu0 %813 }
 0x3d3   :  { %vm1013_vm14 = vcmp.gt.f32.partialorder %v963_v52, 0.0  ;;  %v1029_v54 = vmul.f32 0.01, %v963_v52  ;;  %v7436_v50 = vpack.c.bf16 %v1043_v15, %v1042_v53  ;;  %10386 = vst [vmem:[#allocation47_spill] sm:$0xff] %v8580_v42 }
 0x3d4   :  { %vm1012_vm15 = vcmp.gt.f32.partialorder %v958_v46, 0.0  ;;  %v1028_v8 = vmul.f32 0.01, %v958_v46  ;;  %v6391_v10 = vpop.f32.mrb[26].mxu0 }
 0x3d5   :  { %v973_v20 = vadd.f32 %v6391_v10, %v8566_v14  ;;  %v967_v49 = vpop.f32.mrb[27].mxu0  ;;  %7437 = vmatprep.subr.bf16.mxu1 %v7436_v50  ;;  %v1045_v13 = vsel %vm1013_vm14, %v963_v52, %v1029_v54  ;;  %v8583_v54 = vpop.permute.xlu1 %808 }
 0x3d6   :  { %v968_v0 = vadd.f32 %v967_v49, %v8569_v12  ;;  %7439 = vmatpush3.bf16.msra.mxu1 %v7436_v50  ;;  %v1044_v11 = vsel %vm1012_vm15, %v958_v46, %v1028_v8  ;;  %10387 = vst [vmem:[#allocation48_spill] sm:$0xff] %v8583_v54 }
 0x3d7   :  { %vm1015_vm2 = vcmp.gt.f32.partialorder %v973_v20, 0.0  ;;  %v1031_v40 = vmul.f32 0.01, %v973_v20  ;;  %v7440_v36 = vpack.c.bf16 %v1045_v13, %v1044_v11 }
 0x3d8   :  { %vm1014_vm3 = vcmp.gt.f32.partialorder %v968_v0, 0.0  ;;  %v1030_v15 = vmul.f32 0.01, %v968_v0  ;;  %v6394_v47 = vpop.f32.mrb[28].mxu0 }
 0x3d9   :  { %v983_v57 = vadd.f32 %v6394_v47, %v8573_v55  ;;  %v977_v53 = vpop.f32.mrb[29].mxu0  ;;  %7441 = vmatprep.subr.bf16.mxu1 %v7440_v36  ;;  %v1047_v2 = vsel %vm1015_vm2, %v973_v20, %v1031_v40 }
 0x3da   :  { %v978_v10 = vadd.f32 %v977_v53, %v8575_v9  ;;  %7443 = vmatpush3.bf16.msra.mxu1 %v7440_v36  ;;  %v1046_v52 = vsel %vm1014_vm3, %v968_v0, %v1030_v15  ;;  %v8587_v15 = vpop.permute.xlu0 %823 }
 0x3db   :  { %vm1017_vm5 = vcmp.gt.f32.partialorder %v983_v57, 0.0  ;;  %v1033_v46 = vmul.f32 0.01, %v983_v57  ;;  %v7444_v50 = vpack.c.bf16 %v1047_v2, %v1046_v52  ;;  %10388 = vst [vmem:[#allocation49_spill] sm:$0xff] %v8587_v15  ;;  %v8589_v52 = vpop.permute.xlu1 %818 }
 0x3dc   :  { %vm1016_vm6 = vcmp.gt.f32.partialorder %v978_v10, 0.0  ;;  %v1032_v13 = vmul.f32 0.01, %v978_v10  ;;  %v6397_v8 = vpop.f32.mrb[30].mxu0  ;;  %10389 = vst [vmem:[#allocation50_spill] sm:$0xff] %v8589_v52 }
 0x3dd   :  { %v993_v49 = vadd.f32 %v6397_v8, %v8580_v42  ;;  %v987_v11 = vpop.f32.mrb[31].mxu0  ;;  %7445 = vmatprep.subr.bf16.mxu1 %v7444_v50  ;;  %v1049_v47 = vsel %vm1017_vm5, %v983_v57, %v1033_v46 }
 0x3de   :  { %v988_v20 = vadd.f32 %v987_v11, %v8583_v54  ;;  %7447 = vmatpush3.bf16.msra.mxu1 %v7444_v50  ;;  %v1048_v40 = vsel %vm1016_vm6, %v978_v10, %v1032_v13 }
 0x3df   :  { %vm1019_vm7 = vcmp.gt.f32.partialorder %v993_v49, 0.0  ;;  %v1035_v36 = vmul.f32 0.01, %v993_v49  ;;  %v7448_v0 = vpack.c.bf16 %v1049_v47, %v1048_v40 }
 0x3e0   :  { %vm1018_vm8 = vcmp.gt.f32.partialorder %v988_v20, 0.0  ;;  %v1034_v53 = vmul.f32 0.01, %v988_v20  ;;  %v6400_v2 = vpop.f32.mrb[32].mxu0 }
 0x3e1   :  { %v1003_v9 = vadd.f32 %v6400_v2, %v8587_v15  ;;  %v997_v8 = vpop.f32.mrb[33].mxu0  ;;  %7449 = vmatprep.subr.bf16.mxu1 %v7448_v0  ;;  %v1051_v42 = vsel %vm1019_vm7, %v993_v49, %v1035_v36  ;;  %v5476_v49 = vld [vmem:[%s10152_s4 + $0x88] sm:$0xff]  ;;  %v5483_v2 = vld [vmem:[%s10152_s4 + $0xc0] sm:$0xff] }
 0x3e2   :  { %v998_v57 = vadd.f32 %v997_v8, %v8589_v52  ;;  %7451 = vmatpush3.bf16.msra.mxu1 %v7448_v0  ;;  %v1050_v46 = vsel %vm1018_vm8, %v988_v20, %v1034_v53  ;;  %v5477_v20 = vld [vmem:[%s10152_s4 + $0x90] sm:$0xff]  ;;  %v5480_v36 = vld [vmem:[%s10152_s4 + $0xa8] sm:$0xff]  ;;  %v5482_v53 = vld [vmem:[%s10152_s4 + $0xb8] sm:$0xff] }
 0x3e3   :  { %vm1021_vm9 = vcmp.gt.f32.partialorder %v1003_v9, 0.0  ;;  %v1037_v10 = vmul.f32 0.01, %v1003_v9  ;;  %v7452_v50 = vpack.c.bf16 %v1051_v42, %v1050_v46  ;;  %v5478_v42 = vld [vmem:[%s10152_s4 + $0x98] sm:$0xff]  ;;  %v5481_v0 = vld [vmem:[%s10152_s4 + $0xb0] sm:$0xff]  ;;  %v5484_v8 = vld [vmem:[%s10152_s4 + $0xc8] sm:$0xff] }
 0x3e4   :  { %vm1020_vm10 = vcmp.gt.f32.partialorder %v998_v57, 0.0  ;;  %v1036_v13 = vmul.f32 0.01, %v998_v57  ;;  %v5486_v46 = vld [vmem:[%s10152_s4 + $0xd8] sm:$0xff] }
 0x3e5   :  { %7453 = vmatprep.subr.bf16.mxu1 %v7452_v50  ;;  %v1053_v11 = vsel %vm1021_vm9, %v1003_v9, %v1037_v10  ;;  %v5479_v9 = vld [vmem:[%s10152_s4 + $0xa0] sm:$0xff] }
 0x3e6   :  { %7455 = vmatpush3.bf16.msra.mxu1 %v7452_v50  ;;  %v1052_v47 = vsel %vm1020_vm10, %v998_v57, %v1036_v13  ;;  %v5485_v57 = vld [vmem:[%s10152_s4 + $0xd0] sm:$0xff]  ;;  %v5487_v10 = vld [vmem:[%s10152_s4 + $0xe0] sm:$0xff]  ;;  %v5488_v50 = vld [vmem:[%s10152_s4 + $0xe8] sm:$0xff] }
 0x3e7   :  { %v7456_v40 = vpack.c.bf16 %v1053_v11, %v1052_v47  ;;  %v5489_v13 = vld [vmem:[%s10152_s4 + $0xf0] sm:$0xff]  ;;  %v5490_v11 = vld [vmem:[%s10152_s4 + $0xf8] sm:$0xff]  ;;  %v5492_v47 = vld [vmem:[%s10153_s6 + $0x4] sm:$0xf] }
 0x3e8   :  { %1334 = vperm.xlu0 %7919, %v5492_v47  }
 0x3e9   :  { %7457 = vmatprep.subr.bf16.mxu1 %v7456_v40 }
 0x3ea   :  { %7459 = vmatpush3.bf16.msra.mxu1 %v7456_v40  ;;  %v10390_v40 = vmov 2  }
 0x3ec   :  { %7921 = vset.pattern.permute.xlu0 %v10390_v40 }
 0x3ed   :  { %6434 = vmatmul.mubr.f32.vlgmr.msra.gmra.mrb[16].mxu1 %v5476_v49  ;;  %v8642_v49 = vpop.permute.xlu1 %1072 }
 0x3ee   :  { %6436 = vmatprep.mubr.f32.mxu1 %v5477_v20  ;;  %10391 = vst [vmem:[#allocation51_spill] sm:$0xff] %v8642_v49 }
 0x3f1   :  { %6437 = vmatmul.mubr.f32.gmra.mrb[18].mxu1 %v5478_v42  ;;  %v8644_v20 = vpop.permute.xlu1 %1080 }
 0x3f2   :  { %6439 = vmatprep.mubr.f32.mxu1 %v5479_v9  ;;  %10392 = vst [vmem:[#allocation52_spill] sm:$0xff] %v8644_v20  ;;  %v8648_v9 = vpop.permute.xlu0 %1076 }
 0x3f3   :  { %10394 = vst [vmem:[#allocation54_spill] sm:$0xff] %v8648_v9 }
 0x3f5   :  { %6440 = vmatmul.mubr.f32.gmra.mrb[20].mxu1 %v5480_v36  ;;  %v8646_v42 = vpop.permute.xlu1 %1084 }
 0x3f6   :  { %6442 = vmatprep.mubr.f32.mxu1 %v5481_v0  ;;  %10393 = vst [vmem:[#allocation53_spill] sm:$0xff] %v8646_v42  ;;  %v8652_v0 = vpop.permute.xlu0 %1088 }
 0x3f7   :  { %10396 = vst [vmem:[#allocation56_spill] sm:$0xff] %v8652_v0 }
 0x3f9   :  { %6443 = vmatmul.mubr.f32.gmra.mrb[22].mxu1 %v5482_v53  ;;  %v8650_v36 = vpop.permute.xlu1 %1092 }
 0x3fa   :  { %6445 = vmatprep.mubr.f32.mxu1 %v5483_v2  ;;  %10395 = vst [vmem:[#allocation55_spill] sm:$0xff] %v8650_v36 }
 0x3fd   :  { %6446 = vmatmul.mubr.f32.gmra.mrb[24].mxu1 %v5484_v8 }
 0x3fe   :  { %6448 = vmatprep.mubr.f32.mxu1 %v5485_v57 }
 0x401   :  { %6449 = vmatmul.mubr.f32.gmra.mrb[26].mxu1 %v5486_v46 }
 0x402   :  { %6451 = vmatprep.mubr.f32.mxu1 %v5487_v10  ;;  %v8656_v10 = vpop.permute.xlu1 %1100 }
 0x403   :  { %10397 = vst [vmem:[#allocation57_spill] sm:$0xff] %v8656_v10 }
 0x405   :  { %6452 = vmatmul.mubr.f32.gmra.mrb[28].mxu1 %v5488_v50 }
 0x406   :  { %6454 = vmatprep.mubr.f32.mxu1 %v5489_v13  ;;  %v8663_v7 = vpop.permute.xlu1 %1108 }
 0x407   :  { %10399 = vst [vmem:[#allocation59_spill] sm:$0xff] %v8663_v7 }
 0x409   :  { %6455 = vmatmul.mubr.f32.gmra.mrb[30].mxu1 %v5490_v11  ;;  %v8658_v11 = vpop.permute.xlu0 %1096 }
 0x40a   :  { %10398 = vst [vmem:[#allocation58_spill] sm:$0xff] %v8658_v11 }
 0x4c0   :  { %v6435_v53 = vpop.f32.mrb[16].mxu1 }
 0x4c1   :  { %v1207_v2 = vadd.f32 %v6435_v53, %v8648_v9  ;;  %v1201_v8 = vpop.f32.mrb[17].mxu1 }
 0x4c2   :  { %v1202_v57 = vadd.f32 %v1201_v8, %v8642_v49 }
 0x4c3   :  { %vm1281_vm11 = vcmp.gt.f32.partialorder %v1207_v2, 0.0  ;;  %v1297_v46 = vmul.f32 0.01, %v1207_v2 }
 0x4c4   :  { %vm1280_vm12 = vcmp.gt.f32.partialorder %v1202_v57, 0.0  ;;  %v1296_v50 = vmul.f32 0.01, %v1202_v57  ;;  %v6438_v13 = vpop.f32.mrb[18].mxu1 }
 0x4c5   :  { %v1313_v47 = vsel %vm1281_vm11, %v1207_v2, %v1297_v46  ;;  %v1217_v52 = vadd.f32 %v6438_v13, %v8646_v42  ;;  %v1211_v15 = vpop.f32.mrb[19].mxu1  ;;  %v10400_v13 = vmov 0.0|0.0  }
 0x4c6   :  { %v1312_v54 = vsel %vm1280_vm12, %v1202_v57, %v1296_v50  ;;  %v1212_v55 = vadd.f32 %v1211_v15, %v8644_v20  ;;  %v8667_v57 = vpop.permute.xlu0 %1104 }
 0x4c7   :  { %v7461_v53 = vpack.c.bf16 %v1313_v47, %v1312_v54  ;;  %vm1283_vm13 = vcmp.gt.f32.partialorder %v1217_v52, 0.0  ;;  %v1299_v9 = vmul.f32 0.01, %v1217_v52  ;;  %10401 = vst [vmem:[#allocation60_spill] sm:$0xff] %v8667_v57 }
 0x4c8   :  { %vm1282_vm14 = vcmp.gt.f32.partialorder %v1212_v55, 0.0  ;;  %v1298_v8 = vmul.f32 0.01, %v1212_v55  ;;  %v6441_v49 = vpop.f32.mrb[20].mxu1 }
 0x4c9   :  { %v1315_v12 = vsel %vm1283_vm13, %v1217_v52, %v1299_v9  ;;  %v1227_v14 = vadd.f32 %v6441_v49, %v8650_v36  ;;  %v1221_v34 = vpop.f32.mrb[21].mxu1  ;;  %7462 = vmatpush3.bf16.msra.mxu0 %v7461_v53 }
 0x4ca   :  { %v1314_v2 = vsel %vm1282_vm14, %v1212_v55, %v1298_v8  ;;  %v1222_v46 = vadd.f32 %v1221_v34, %v8652_v0  ;;  %7463 = vmatprep.subr.bf16.mxu0 %v10400_v13  ;;  %v8672_v0 = vpop.permute.xlu1 %1116  ;;  %v8674_v36 = vpop.permute.xlu0 %1112 }
 0x4cb   :  { %v7464_v54 = vpack.c.bf16 %v1315_v12, %v1314_v2  ;;  %vm1285_vm15 = vcmp.gt.f32.partialorder %v1227_v14, 0.0  ;;  %v1301_v15 = vmul.f32 0.01, %v1227_v14  ;;  %10402 = vst [vmem:[#allocation61_spill] sm:$0xff] %v8672_v0  ;;  %10403 = vst [vmem:[#allocation62_spill] sm:$0xff] %v8674_v36 }
 0x4cc   :  { %vm1284_vm2 = vcmp.gt.f32.partialorder %v1222_v46, 0.0  ;;  %v1300_v50 = vmul.f32 0.01, %v1222_v46  ;;  %v6444_v47 = vpop.f32.mrb[22].mxu1 }
 0x4cd   :  { %v1317_v52 = vsel %vm1285_vm15, %v1227_v14, %v1301_v15  ;;  %v1237_v49 = vadd.f32 %v6444_v47, %v8656_v10  ;;  %v1231_v9 = vpop.f32.mrb[23].mxu1  ;;  %7465 = vmatpush3.bf16.msra.mxu0 %v7464_v54 }
 0x4ce   :  { %v1316_v53 = vsel %vm1284_vm2, %v1222_v46, %v1300_v50  ;;  %v1232_v55 = vadd.f32 %v1231_v9, %v8658_v11  ;;  %7466 = vmatprep.subr.bf16.mxu0 %v10400_v13 }
 0x4cf   :  { %v7467_v34 = vpack.c.bf16 %v1317_v52, %v1316_v53  ;;  %vm1287_vm3 = vcmp.gt.f32.partialorder %v1237_v49, 0.0  ;;  %v1303_v8 = vmul.f32 0.01, %v1237_v49 }
 0x4d0   :  { %vm1286_vm5 = vcmp.gt.f32.partialorder %v1232_v55, 0.0  ;;  %v1302_v12 = vmul.f32 0.01, %v1232_v55  ;;  %v6447_v2 = vpop.f32.mrb[24].mxu1 }
 0x4d1   :  { %v1319_v14 = vsel %vm1287_vm3, %v1237_v49, %v1303_v8  ;;  %v1247_v15 = vadd.f32 %v6447_v2, %v8663_v7  ;;  %v1241_v47 = vpop.f32.mrb[25].mxu1  ;;  %7468 = vmatpush3.bf16.msra.mxu0 %v7467_v34  ;;  %v8680_v49 = vpop.permute.xlu1 %1124 }
 0x4d2   :  { %v1318_v46 = vsel %vm1286_vm5, %v1232_v55, %v1302_v12  ;;  %v1242_v54 = vadd.f32 %v1241_v47, %v8667_v57  ;;  %7469 = vmatprep.subr.bf16.mxu0 %v10400_v13  ;;  %10404 = vst [vmem:[#allocation63_spill] sm:$0xff] %v8680_v49  ;;  %v8684_v34 = vpop.permute.xlu0 %1120 }
 0x4d3   :  { %v7470_v50 = vpack.c.bf16 %v1319_v14, %v1318_v46  ;;  %vm1289_vm6 = vcmp.gt.f32.partialorder %v1247_v15, 0.0  ;;  %v1305_v52 = vmul.f32 0.01, %v1247_v15  ;;  %10405 = vst [vmem:[#allocation64_spill] sm:$0xff] %v8684_v34 }
 0x4d4   :  { %vm1288_vm7 = vcmp.gt.f32.partialorder %v1242_v54, 0.0  ;;  %v1304_v9 = vmul.f32 0.01, %v1242_v54  ;;  %v6450_v53 = vpop.f32.mrb[26].mxu1 }
 0x4d5   :  { %v1321_v11 = vsel %vm1289_vm6, %v1247_v15, %v1305_v52  ;;  %v1257_v10 = vadd.f32 %v6450_v53, %v8672_v0  ;;  %v1251_v20 = vpop.f32.mrb[27].mxu1  ;;  %7471 = vmatpush3.bf16.msra.mxu0 %v7470_v50  ;;  %v8689_v53 = vpop.permute.xlu1 %1132 }
 0x4d6   :  { %v1320_v8 = vsel %vm1288_vm7, %v1242_v54, %v1304_v9  ;;  %v1252_v55 = vadd.f32 %v1251_v20, %v8674_v36  ;;  %7472 = vmatprep.subr.bf16.mxu0 %v10400_v13  ;;  %10406 = vst [vmem:[#allocation65_spill] sm:$0xff] %v8689_v53  ;;  %v8691_v36 = vpop.permute.xlu0 %1128 }
 0x4d7   :  { %v7473_v12 = vpack.c.bf16 %v1321_v11, %v1320_v8  ;;  %vm1291_vm8 = vcmp.gt.f32.partialorder %v1257_v10, 0.0  ;;  %v1307_v2 = vmul.f32 0.01, %v1257_v10  ;;  %10407 = vst [vmem:[#allocation66_spill] sm:$0xff] %v8691_v36 }
 0x4d8   :  { %vm1290_vm9 = vcmp.gt.f32.partialorder %v1252_v55, 0.0  ;;  %v1306_v14 = vmul.f32 0.01, %v1252_v55  ;;  %v6453_v47 = vpop.f32.mrb[28].mxu1 }
 0x4d9   :  { %v1323_v15 = vsel %vm1291_vm8, %v1257_v10, %v1307_v2  ;;  %v1267_v46 = vadd.f32 %v6453_v47, %v8680_v49  ;;  %v1261_v52 = vpop.f32.mrb[29].mxu1  ;;  %7474 = vmatpush3.bf16.msra.mxu0 %v7473_v12 }
 0x4da   :  { %v1322_v50 = vsel %vm1290_vm9, %v1252_v55, %v1306_v14  ;;  %v1262_v54 = vadd.f32 %v1261_v52, %v8684_v34  ;;  %7475 = vmatprep.subr.bf16.mxu0 %v10400_v13 }
 0x4db   :  { %v7476_v20 = vpack.c.bf16 %v1323_v15, %v1322_v50  ;;  %vm1293_vm10 = vcmp.gt.f32.partialorder %v1267_v46, 0.0  ;;  %v1309_v9 = vmul.f32 0.01, %v1267_v46 }
 0x4dc   :  { %vm1292_vm11 = vcmp.gt.f32.partialorder %v1262_v54, 0.0  ;;  %v1308_v11 = vmul.f32 0.01, %v1262_v54  ;;  %v6456_v8 = vpop.f32.mrb[30].mxu1 }
 0x4dd   :  { %v1325_v10 = vsel %vm1293_vm10, %v1267_v46, %v1309_v9  ;;  %v1277_v2 = vadd.f32 %v6456_v8, %v8689_v53  ;;  %v1271_v47 = vpop.f32.mrb[31].mxu1  ;;  %7477 = vmatpush3.bf16.msra.mxu0 %v7476_v20  ;;  %v1416_v20 = vld [vmem:[%s10151_s3] sm:$0xff]  ;;  %v8707_v9 = vld [vmem:[%s10151_s3 + $0x10] sm:$0xff]  ;;  %v8724_v8 = vld [vmem:[%s10151_s3 + $0x18] sm:$0xff]  ;;  %v10409_v53 = vmov 0  }
 0x4de   :  { %v1324_v55 = vsel %vm1292_vm11, %v1262_v54, %v1308_v11  ;;  %v1272_v12 = vadd.f32 %v1271_v47, %v8691_v36  ;;  %7478 = vmatprep.subr.bf16.mxu0 %v10400_v13  ;;  %v5491_v54 = vld [vmem:[%s10154_s5 + $0x4] sm:$0xf]  ;;  %1434 = vperm.xlu1 %7920, %v1416_v20   ;;  %v8719_v11 = vld [vmem:[%s10151_s3 + $0x28] sm:$0xff]  ;;  %v10408_v36 = vmov 3  }
 0x4df   :  { %v7479_v14 = vpack.c.bf16 %v1325_v10, %v1324_v55  ;;  %vm1295_vm12 = vcmp.gt.f32.partialorder %v1277_v2, 0.0  ;;  %v1311_v15 = vmul.f32 0.01, %v1277_v2  ;;  %1444 = vperm.xlu0 %7921, %v8707_v9   ;;  %v8731_v10 = vld [vmem:[%s10151_s3 + $0x38] sm:$0xff]  ;;  %v8740_v47 = vld [vmem:[%s10151_s3 + $0x48] sm:$0xff]  ;;  %v1422_v55 = vld [vmem:[%s10151_s3 + $0x30] sm:$0xff] }
 0x4e0   :  { %vm1294_vm13 = vcmp.gt.f32.partialorder %v1272_v12, 0.0  ;;  %v1310_v52 = vmul.f32 0.01, %v1272_v12 }
 0x4e1   :  { %v1327_v50 = vsel %vm1295_vm12, %v1277_v2, %v1311_v15  ;;  %7480 = vmatpush3.bf16.msra.mxu0 %v7479_v14  ;;  %v1420_v2 = vld [vmem:[%s10151_s3 + $0x20] sm:$0xff]  ;;  %v1429_v15 = vld [vmem:[%s10151_s3 + $0x68] sm:$0xff] }
 0x4e2   :  { %v1326_v34 = vsel %vm1294_vm13, %v1272_v12, %v1310_v52  ;;  %7481 = vmatprep.subr.bf16.mxu0 %v10400_v13  ;;  %v1427_v12 = vld [vmem:[%s10151_s3 + $0x58] sm:$0xff]  ;;  %v1424_v14 = vld [vmem:[%s10151_s3 + $0x40] sm:$0xff]  ;;  %v1426_v52 = vld [vmem:[%s10151_s3 + $0x50] sm:$0xff] }
 0x4e3   :  { %v7482_v46 = vpack.c.bf16 %v1327_v50, %v1326_v34  ;;  %v8713_v34 = vld [vmem:[%s10151_s3 + $0x8] sm:$0xff]  ;;  %1459 = vperm.xlu0 %7921, %v8719_v11   ;;  %v1431_v50 = vld [vmem:[%s10151_s3 + $0x78] sm:$0xff] }
 0x4e4   :  { %1439 = vperm.xlu1 %7920, %v8713_v34  }
 0x4e5   :  { %7483 = vmatpush3.bf16.msra.mxu0 %v7482_v46  ;;  %v1428_v46 = vld [vmem:[%s10151_s3 + $0x60] sm:$0xff] }
 0x4e7   :  { %1469 = vperm.xlu0 %7921, %v8731_v10  }
 0x4e8   :  { %6490 = vmatmul.mubr.f32.vlgmr.msra.gmra.mrb[34].mxu0 %v5491_v54  ;;  %1449 = vperm.xlu1 %7920, %v8724_v8   ;;  %v1430_v54 = vld [vmem:[%s10151_s3 + $0x70] sm:$0xff] }
 0x4e9   :  { %6494 = vmatprep.mubr.msk.f32.mxu0 %vm138_vm0, %v1416_v20 }
 0x4eb   :  { %1479 = vperm.xlu0 %7921, %v8740_v47  }
 0x4ec   :  { %1454 = vperm.xlu1 %7920, %v1420_v2  }
 0x4ef   :  { %1489 = vperm.xlu0 %7921, %v1427_v12  }
 0x4f0   :  { %1464 = vperm.xlu1 %7920, %v1422_v55  }
 0x4f3   :  { %1499 = vperm.xlu0 %7921, %v1429_v15  }
 0x4f4   :  { %1474 = vperm.xlu1 %7920, %v1424_v14  }
 0x4f7   :  { %1509 = vperm.xlu0 %7921, %v1431_v50  }
 0x4f8   :  { %1484 = vperm.xlu1 %7920, %v1426_v52  }
 0x4fb   :  { %7923 = vset.pattern.permute.xlu0 %v10408_v36 }
 0x4fc   :  { %1494 = vperm.xlu1 %7920, %v1428_v46   ;;  %1762 = vperm.xlu0 %7923, %v8713_v34  }
 0x500   :  { %1504 = vperm.xlu1 %7920, %v1430_v54   ;;  %1774 = vperm.xlu0 %7923, %v1420_v2  }
 0x504   :  { %7922 = vset.pattern.permute.xlu1 %v10408_v36  ;;  %1782 = vperm.xlu0 %7923, %v1422_v55  }
 0x505   :  { %1758 = vperm.xlu1 %7922, %v1416_v20   ;;  %v8777_v20 = vpop.permute.xlu0 %1334 }
 0x506   :  { %10410 = vst [vmem:[#allocation67_spill] sm:$0xff] %v8777_v20 }
 0x508   :  { %1790 = vperm.xlu0 %7923, %v1424_v14  }
 0x509   :  { %1766 = vperm.xlu1 %7922, %v8707_v9  }
 0x50c   :  { %1798 = vperm.xlu0 %7923, %v1426_v52  }
 0x50d   :  { %1770 = vperm.xlu1 %7922, %v8724_v8  }
 0x510   :  { %1806 = vperm.xlu0 %7923, %v1428_v46  }
 0x511   :  { %1778 = vperm.xlu1 %7922, %v8719_v11  }
 0x514   :  { %1814 = vperm.xlu0 %7923, %v1430_v54  }
 0x515   :  { %1786 = vperm.xlu1 %7922, %v8731_v10  }
 0x518   :  { %7924 = vset.pattern.permute.xlu0 %v10409_v53  ;;  %v7968_v53 = vld [vmem:[%s10150_s0] sm:$0xf] }
 0x519   :  { %1794 = vperm.xlu1 %7922, %v8740_v47  }
 0x51d   :  { %1802 = vperm.xlu1 %7922, %v1427_v12  }
 0x521   :  { %1810 = vperm.xlu1 %7922, %v1429_v15  }
 0x525   :  { %1818 = vperm.xlu1 %7922, %v1431_v50  }
 0x529   :  { %7925 = vset.pattern.permute.xlu1 %v10390_v40 }
 0x5bb   :  { %v1403_v36 = vpop.f32.mrb[34].mxu0 }
 0x5bc   :  { %v1404_v49 = vadd.f32 %v1403_v36, %v8777_v20  ;;  %v6491_v0 = vpop.f32.mrb[35].mxu0 }
 0x5be   :  { %7934 = vtanh.f32 %v1404_v49  ;;  %v1408_v5 = vsub.f32 %v7968_v53, %v1404_v49 }
 0x5c8   :  { %v7935_v57 = vpop.eup %7934 }
 0x5c9   :  { %v1409_v7 = vsub.f32 0.0, %v7935_v57 }
 0x5cb   :  { %v1410_v42 = vmul.f32 1.442695, %v1409_v7 }
 0x5cd   :  { %7936 = vpow2.f32 %v1410_v42 }
 0x5d7   :  { %v7937_v6 = vpop.eup %7936 }
 0x5d8   :  { %v1413_v3 = vrot.slane %v7937_v6, 6  ;;  %v8816_v6 = vpop.permute.xlu0 %1444 }
 0x5d9   :  { %10412 = vst [vmem:[#allocation68_spill] sm:$0xff] %v8816_v6 }
 0x5da   :  { %v1415_v61 = vmul.f32 %v1413_v3, %v1408_v5  ;;  %v8812_v3 = vpop.permute.xlu1 %1434 }
 0x5dc   :  { %v1513_v1 = vrot.slane %v1415_v61, 2  ;;  %v10411_v61 = vmov 0.0   ;;  %v8820_v42 = vpop.permute.xlu0 %1459 }
 0x5dd   :  { %10413 = vst [vmem:[#allocation69_spill] sm:$0xff] %v8820_v42 }
 0x5de   :  { %6492 = vmatprep.subr.msk.mxu0 %vm171_vm1, %v1513_v1  ;;  %v8814_v5 = vpop.permute.xlu1 %1439 }
 0x5df   :  { %6493 = vmatpush3.msk.msra.mxu0 %vm171_vm1, %v1513_v1  ;;  %v1741_v1 = vld [vmem:[%s10152_s4] sm:$0xff] }
 0x5e0   :  { %6495 = vmatmul.mubr.msk.f32.vlgmr.msra.gmra.mrb[36].mxu0 %vm138_vm0, %v8713_v34  ;;  %7516 = vmatprep.subr.bf16.mxu0 %v10400_v13  ;;  %v8826_v34 = vpop.permute.xlu0 %1469 }
 0x5e1   :  { %6497 = vmatprep.mubr.msk.f32.mxu0 %vm138_vm0, %v8707_v9  ;;  %6550 = vmatprep.mubr.f32.mxu1 %v1741_v1  ;;  %10415 = vst [vmem:[#allocation71_spill] sm:$0xff] %v8826_v34 }
 0x5e2   :  { %v8818_v7 = vpop.permute.xlu1 %1449 }
 0x5e4   :  { %6498 = vmatmul.mubr.msk.f32.gmra.mrb[38].mxu0 %vm138_vm0, %v8724_v8 }
 0x5e5   :  { %6500 = vmatprep.mubr.msk.f32.mxu0 %vm138_vm0, %v1420_v2 }
 0x5e6   :  { %v8822_v36 = vpop.permute.xlu1 %1454 }
 0x5e7   :  { %10414 = vst [vmem:[#allocation70_spill] sm:$0xff] %v8822_v36 }
 0x5e8   :  { %6501 = vmatmul.mubr.msk.f32.gmra.mrb[40].mxu0 %vm138_vm0, %v8719_v11 }
 0x5e9   :  { %6503 = vmatprep.mubr.msk.f32.mxu0 %vm138_vm0, %v1422_v55 }
 0x5ec   :  { %6504 = vmatmul.mubr.msk.f32.gmra.mrb[42].mxu0 %vm138_vm0, %v8731_v10  ;;  %v8828_v10 = vpop.permute.xlu1 %1464 }
 0x5ed   :  { %6506 = vmatprep.mubr.msk.f32.mxu0 %vm138_vm0, %v1424_v14  ;;  %10416 = vst [vmem:[#allocation72_spill] sm:$0xff] %v8828_v10 }
 0x5f0   :  { %6507 = vmatmul.mubr.msk.f32.gmra.mrb[44].mxu0 %vm138_vm0, %v8740_v47 }
 0x5f1   :  { %6509 = vmatprep.mubr.msk.f32.mxu0 %vm138_vm0, %v1426_v52 }
 0x5f4   :  { %6510 = vmatmul.mubr.msk.f32.gmra.mrb[46].mxu0 %vm138_vm0, %v1427_v12 }
 0x5f5   :  { %6512 = vmatprep.mubr.msk.f32.mxu0 %vm138_vm0, %v1428_v46 }
 0x5f8   :  { %6513 = vmatmul.mubr.msk.f32.gmra.mrb[48].mxu0 %vm138_vm0, %v1429_v15 }
 0x5f9   :  { %6515 = vmatprep.mubr.msk.f32.mxu0 %vm138_vm0, %v1430_v54 }
 0x5fc   :  { %6516 = vmatmul.mubr.msk.f32.gmra.mrb[50].mxu0 %vm138_vm0, %v1431_v50 }
 0x5fd   :  { %6606 = vmatprep.mubr.msk.f32.mxu0 %vm8139_vm4, %v10411_v61 }
 0x6b3   :  { %v6496_v0 = vpop.f32.mrb[36].mxu0 }
 0x6b4   :  { %v1620_v57 = vadd.f32 %v6496_v0, %v8814_v5  ;;  %v1614_v49 = vpop.f32.mrb[37].mxu0 }
 0x6b5   :  { %v1615_v53 = vadd.f32 %v1614_v49, %v8812_v3  ;;  %v8833_v49 = vpop.permute.xlu0 %1479 }
 0x6b6   :  { %vm1694_vm14 = vcmp.gt.f32.partialorder %v1620_v57, 0.0  ;;  %v1710_v9 = vmul.f32 0.01, %v1620_v57  ;;  %10417 = vst [vmem:[#allocation73_spill] sm:$0xff] %v8833_v49 }
 0x6b7   :  { %vm1693_vm15 = vcmp.gt.f32.partialorder %v1615_v53, 0.0  ;;  %v1709_v11 = vmul.f32 0.01, %v1615_v53  ;;  %v6499_v8 = vpop.f32.mrb[38].mxu0 }
 0x6b8   :  { %v1630_v2 = vadd.f32 %v6499_v8, %v8818_v7  ;;  %v1624_v47 = vpop.f32.mrb[39].mxu0  ;;  %v1726_v55 = vsel %vm1694_vm14, %v1620_v57, %v1710_v9  ;;  %v8836_v9 = vpop.permute.xlu1 %1474 }
 0x6b9   :  { %v1625_v12 = vadd.f32 %v1624_v47, %v8816_v6  ;;  %v1725_v14 = vsel %vm1693_vm15, %v1615_v53, %v1709_v11  ;;  %10418 = vst [vmem:[#allocation74_spill] sm:$0xff] %v8836_v9 }
 0x6ba   :  { %vm1696_vm2 = vcmp.gt.f32.partialorder %v1630_v2, 0.0  ;;  %v1712_v15 = vmul.f32 0.01, %v1630_v2  ;;  %v7484_v52 = vpack.c.bf16 %v1726_v55, %v1725_v14 }
 0x6bb   :  { %vm1695_vm3 = vcmp.gt.f32.partialorder %v1625_v12, 0.0  ;;  %v1711_v50 = vmul.f32 0.01, %v1625_v12  ;;  %v6502_v46 = vpop.f32.mrb[40].mxu0 }
 0x6bc   :  { %v1640_v54 = vadd.f32 %v6502_v46, %v8820_v42  ;;  %v1634_v1 = vpop.f32.mrb[41].mxu0  ;;  %7485 = vmatprep.subr.bf16.mxu1 %v7484_v52  ;;  %v1728_v0 = vsel %vm1696_vm2, %v1630_v2, %v1712_v15 }
 0x6bd   :  { %v1635_v8 = vadd.f32 %v1634_v1, %v8822_v36  ;;  %7487 = vmatpush3.bf16.msra.mxu1 %v7484_v52  ;;  %v1727_v57 = vsel %vm1695_vm3, %v1625_v12, %v1711_v50  ;;  %v8840_v50 = vpop.permute.xlu0 %1489 }
 0x6be   :  { %vm1698_vm5 = vcmp.gt.f32.partialorder %v1640_v54, 0.0  ;;  %v1714_v53 = vmul.f32 0.01, %v1640_v54  ;;  %v7488_v11 = vpack.c.bf16 %v1728_v0, %v1727_v57  ;;  %10419 = vst [vmem:[#allocation75_spill] sm:$0xff] %v8840_v50  ;;  %v8842_v57 = vpop.permute.xlu1 %1484 }
 0x6bf   :  { %vm1697_vm6 = vcmp.gt.f32.partialorder %v1635_v8, 0.0  ;;  %v1713_v47 = vmul.f32 0.01, %v1635_v8  ;;  %v6505_v55 = vpop.f32.mrb[42].mxu0  ;;  %10420 = vst [vmem:[#allocation76_spill] sm:$0xff] %v8842_v57 }
 0x6c0   :  { %v1650_v14 = vadd.f32 %v6505_v55, %v8826_v34  ;;  %v1644_v46 = vpop.f32.mrb[43].mxu0  ;;  %7489 = vmatprep.subr.bf16.mxu1 %v7488_v11  ;;  %v1730_v42 = vsel %vm1698_vm5, %v1640_v54, %v1714_v53 }
 0x6c1   :  { %v1645_v2 = vadd.f32 %v1644_v46, %v8828_v10  ;;  %7491 = vmatpush3.bf16.msra.mxu1 %v7488_v11  ;;  %v1729_v15 = vsel %vm1697_vm6, %v1635_v8, %v1713_v47  ;;  %v8847_v6 = vpop.permute.xlu0 %1499 }
 0x6c2   :  { %vm1700_vm7 = vcmp.gt.f32.partialorder %v1650_v14, 0.0  ;;  %v1716_v52 = vmul.f32 0.01, %v1650_v14  ;;  %v7492_v12 = vpack.c.bf16 %v1730_v42, %v1729_v15  ;;  %10421 = vst [vmem:[#allocation77_spill] sm:$0xff] %v8847_v6 }
 0x6c3   :  { %vm1699_vm8 = vcmp.gt.f32.partialorder %v1645_v2, 0.0  ;;  %v1715_v1 = vmul.f32 0.01, %v1645_v2  ;;  %v6508_v0 = vpop.f32.mrb[44].mxu0 }
 0x6c4   :  { %v1660_v36 = vadd.f32 %v6508_v0, %v8833_v49  ;;  %v1654_v55 = vpop.f32.mrb[45].mxu0  ;;  %7493 = vmatprep.subr.bf16.mxu1 %v7492_v12  ;;  %v1732_v34 = vsel %vm1700_vm7, %v1650_v14, %v1716_v52  ;;  %v8850_v52 = vpop.permute.xlu1 %1494 }
 0x6c5   :  { %v1655_v54 = vadd.f32 %v1654_v55, %v8836_v9  ;;  %7495 = vmatpush3.bf16.msra.mxu1 %v7492_v12  ;;  %v1731_v53 = vsel %vm1699_vm8, %v1645_v2, %v1715_v1  ;;  %10422 = vst [vmem:[#allocation78_spill] sm:$0xff] %v8850_v52 }
 0x6c6   :  { %vm1702_vm9 = vcmp.gt.f32.partialorder %v1660_v36, 0.0  ;;  %v1718_v8 = vmul.f32 0.01, %v1660_v36  ;;  %v7496_v11 = vpack.c.bf16 %v1732_v34, %v1731_v53 }
 0x6c7   :  { %vm1701_vm10 = vcmp.gt.f32.partialorder %v1655_v54, 0.0  ;;  %v1717_v42 = vmul.f32 0.01, %v1655_v54  ;;  %v6511_v47 = vpop.f32.mrb[46].mxu0 }
 0x6c8   :  { %v1670_v46 = vadd.f32 %v6511_v47, %v8840_v50  ;;  %v1664_v15 = vpop.f32.mrb[47].mxu0  ;;  %7497 = vmatprep.subr.bf16.mxu1 %v7496_v11  ;;  %v1734_v10 = vsel %vm1702_vm9, %v1660_v36, %v1718_v8 }
 0x6c9   :  { %v1665_v0 = vadd.f32 %v1664_v15, %v8842_v57  ;;  %7499 = vmatpush3.bf16.msra.mxu1 %v7496_v11  ;;  %v1733_v14 = vsel %vm1701_vm10, %v1655_v54, %v1717_v42  ;;  %v8854_v42 = vpop.permute.xlu0 %1509 }
 0x6ca   :  { %vm1704_vm11 = vcmp.gt.f32.partialorder %v1670_v46, 0.0  ;;  %v1720_v2 = vmul.f32 0.01, %v1670_v46  ;;  %v7500_v12 = vpack.c.bf16 %v1734_v10, %v1733_v14  ;;  %10423 = vst [vmem:[#allocation79_spill] sm:$0xff] %v8854_v42  ;;  %v8856_v14 = vpop.permute.xlu1 %1504 }
 0x6cb   :  { %vm1703_vm12 = vcmp.gt.f32.partialorder %v1665_v0, 0.0  ;;  %v1719_v34 = vmul.f32 0.01, %v1665_v0  ;;  %v6514_v1 = vpop.f32.mrb[48].mxu0  ;;  %10424 = vst [vmem:[#allocation80_spill] sm:$0xff] %v8856_v14 }
 0x6cc   :  { %v1680_v55 = vadd.f32 %v6514_v1, %v8847_v6  ;;  %v1674_v53 = vpop.f32.mrb[49].mxu0  ;;  %7501 = vmatprep.subr.bf16.mxu1 %v7500_v12  ;;  %v1736_v47 = vsel %vm1704_vm11, %v1670_v46, %v1720_v2 }
 0x6cd   :  { %v1675_v36 = vadd.f32 %v1674_v53, %v8850_v52  ;;  %7503 = vmatpush3.bf16.msra.mxu1 %v7500_v12  ;;  %v1735_v8 = vsel %vm1703_vm12, %v1665_v0, %v1719_v34 }
 0x6ce   :  { %vm1706_vm13 = vcmp.gt.f32.partialorder %v1680_v55, 0.0  ;;  %v1722_v11 = vmul.f32 0.01, %v1680_v55  ;;  %v7504_v54 = vpack.c.bf16 %v1736_v47, %v1735_v8 }
 0x6cf   :  { %vm1705_vm14 = vcmp.gt.f32.partialorder %v1675_v36, 0.0  ;;  %v1721_v15 = vmul.f32 0.01, %v1675_v36  ;;  %v6517_v10 = vpop.f32.mrb[50].mxu0 }
 0x6d0   :  { %v1690_v57 = vadd.f32 %v6517_v10, %v8854_v42  ;;  %v1684_v1 = vpop.f32.mrb[51].mxu0  ;;  %7505 = vmatprep.subr.bf16.mxu1 %v7504_v54  ;;  %v1738_v6 = vsel %vm1706_vm13, %v1680_v55, %v1722_v11  ;;  %v1742_v55 = vld [vmem:[%s10152_s4 + $0x8] sm:$0xff]  ;;  %v1749_v10 = vld [vmem:[%s10152_s4 + $0x40] sm:$0xff] }
 0x6d1   :  { %v1685_v46 = vadd.f32 %v1684_v1, %v8856_v14  ;;  %7507 = vmatpush3.bf16.msra.mxu1 %v7504_v54  ;;  %v1737_v2 = vsel %vm1705_vm14, %v1675_v36, %v1721_v15  ;;  %v1743_v36 = vld [vmem:[%s10152_s4 + $0x10] sm:$0xff]  ;;  %v1746_v11 = vld [vmem:[%s10152_s4 + $0x28] sm:$0xff]  ;;  %v1748_v15 = vld [vmem:[%s10152_s4 + $0x38] sm:$0xff] }
 0x6d2   :  { %vm1708_vm15 = vcmp.gt.f32.partialorder %v1690_v57, 0.0  ;;  %v1724_v0 = vmul.f32 0.01, %v1690_v57  ;;  %v7508_v12 = vpack.c.bf16 %v1738_v6, %v1737_v2  ;;  %v1744_v6 = vld [vmem:[%s10152_s4 + $0x18] sm:$0xff]  ;;  %v1747_v54 = vld [vmem:[%s10152_s4 + $0x30] sm:$0xff]  ;;  %v1750_v1 = vld [vmem:[%s10152_s4 + $0x48] sm:$0xff] }
 0x6d3   :  { %vm1707_vm2 = vcmp.gt.f32.partialorder %v1685_v46, 0.0  ;;  %v1723_v34 = vmul.f32 0.01, %v1685_v46  ;;  %v1752_v2 = vld [vmem:[%s10152_s4 + $0x58] sm:$0xff] }
 0x6d4   :  { %7509 = vmatprep.subr.bf16.mxu1 %v7508_v12  ;;  %v1740_v53 = vsel %vm1708_vm15, %v1690_v57, %v1724_v0  ;;  %v1745_v57 = vld [vmem:[%s10152_s4 + $0x20] sm:$0xff] }
 0x6d5   :  { %7511 = vmatpush3.bf16.msra.mxu1 %v7508_v12  ;;  %v1739_v47 = vsel %vm1707_vm2, %v1685_v46, %v1723_v34  ;;  %v1751_v46 = vld [vmem:[%s10152_s4 + $0x50] sm:$0xff]  ;;  %v1753_v0 = vld [vmem:[%s10152_s4 + $0x60] sm:$0xff]  ;;  %v1754_v12 = vld [vmem:[%s10152_s4 + $0x68] sm:$0xff] }
 0x6d6   :  { %v7512_v8 = vpack.c.bf16 %v1740_v53, %v1739_v47  ;;  %v1755_v34 = vld [vmem:[%s10152_s4 + $0x70] sm:$0xff]  ;;  %v1756_v53 = vld [vmem:[%s10152_s4 + $0x78] sm:$0xff]  ;;  %v7969_v47 = vld [vmem:[%s10152_s4 + $0x100] sm:$0xff] }
 0x6d8   :  { %7513 = vmatprep.subr.bf16.mxu1 %v7512_v8 }
 0x6d9   :  { %7515 = vmatpush3.bf16.msra.mxu1 %v7512_v8  ;;  %v2015_v8 = vld [vmem:[%s10153_s6] sm:$0xf] }
 0x6da   :  { %2018 = vperm.xlu0 %7924, %v2015_v8  }
 0x6dc   :  { %6551 = vmatmul.mubr.f32.vlgmr.msra.gmra.mrb[32].mxu1 %v1742_v55  ;;  %v8912_v55 = vpop.permute.xlu1 %1758 }
 0x6dd   :  { %6553 = vmatprep.mubr.f32.mxu1 %v1743_v36  ;;  %10425 = vst [vmem:[#allocation81_spill] sm:$0xff] %v8912_v55 }
 0x6de   :  { %7926 = vset.pattern.permute.xlu0 %v10390_v40 }
 0x6e0   :  { %6554 = vmatmul.mubr.f32.gmra.mrb[34].mxu1 %v1744_v6  ;;  %v8914_v36 = vpop.permute.xlu1 %1766 }
 0x6e1   :  { %6556 = vmatprep.mubr.f32.mxu1 %v1745_v57  ;;  %10426 = vst [vmem:[#allocation82_spill] sm:$0xff] %v8914_v36  ;;  %v8918_v57 = vpop.permute.xlu0 %1762 }
 0x6e2   :  { %10427 = vst [vmem:[#allocation83_spill] sm:$0xff] %v8918_v57 }
 0x6e4   :  { %6557 = vmatmul.mubr.f32.gmra.mrb[36].mxu1 %v1746_v11  ;;  %v8916_v6 = vpop.permute.xlu1 %1770 }
 0x6e5   :  { %6559 = vmatprep.mubr.f32.mxu1 %v1747_v54  ;;  %v8922_v54 = vpop.permute.xlu0 %1774 }
 0x6e6   :  { %10429 = vst [vmem:[#allocation85_spill] sm:$0xff] %v8922_v54 }
 0x6e8   :  { %6560 = vmatmul.mubr.f32.gmra.mrb[38].mxu1 %v1748_v15  ;;  %v8920_v11 = vpop.permute.xlu1 %1778 }
 0x6e9   :  { %6562 = vmatprep.mubr.f32.mxu1 %v1749_v10  ;;  %10428 = vst [vmem:[#allocation84_spill] sm:$0xff] %v8920_v11 }
 0x6ec   :  { %6563 = vmatmul.mubr.f32.gmra.mrb[40].mxu1 %v1750_v1 }
 0x6ed   :  { %6565 = vmatprep.mubr.f32.mxu1 %v1751_v46 }
 0x6f0   :  { %6566 = vmatmul.mubr.f32.gmra.mrb[42].mxu1 %v1752_v2  ;;  %v8926_v2 = vpop.permute.xlu1 %1786 }
 0x6f1   :  { %6568 = vmatprep.mubr.f32.mxu1 %v1753_v0  ;;  %10430 = vst [vmem:[#allocation86_spill] sm:$0xff] %v8926_v2 }
 0x6f4   :  { %6569 = vmatmul.mubr.f32.gmra.mrb[44].mxu1 %v1754_v12  ;;  %v8933_v49 = vpop.permute.xlu1 %1794 }
 0x6f5   :  { %6571 = vmatprep.mubr.f32.mxu1 %v1755_v34  ;;  %v8928_v34 = vpop.permute.xlu0 %1782  ;;  %10432 = vst [vmem:[#allocation88_spill] sm:$0xff] %v8933_v49 }
 0x6f6   :  { %10431 = vst [vmem:[#allocation87_spill] sm:$0xff] %v8928_v34 }
 0x6f8   :  { %6572 = vmatmul.mubr.f32.gmra.mrb[46].mxu1 %v1756_v53 }
 0x6f9   :  { %6667 = vmatprep.mubr.f32.mxu1 %v7969_v47 }
 0x7af   :  { %v6552_v15 = vpop.f32.mrb[32].mxu1 }
 0x7b0   :  { %v1893_v10 = vadd.f32 %v6552_v15, %v8918_v57  ;;  %v1887_v1 = vpop.f32.mrb[33].mxu1 }
 0x7b1   :  { %v1888_v46 = vadd.f32 %v1887_v1, %v8912_v55 }
 0x7b2   :  { %vm1967_vm3 = vcmp.gt.f32.partialorder %v1893_v10, 0.0  ;;  %v1983_v40 = vmul.f32 0.01, %v1893_v10 }
 0x7b3   :  { %vm1966_vm5 = vcmp.gt.f32.partialorder %v1888_v46, 0.0  ;;  %v1982_v0 = vmul.f32 0.01, %v1888_v46  ;;  %v6555_v12 = vpop.f32.mrb[34].mxu1 }
 0x7b4   :  { %v1999_v53 = vsel %vm1967_vm3, %v1893_v10, %v1983_v40  ;;  %v1903_v47 = vadd.f32 %v6555_v12, %v8916_v6  ;;  %v1897_v8 = vpop.f32.mrb[35].mxu1 }
 0x7b5   :  { %v1998_v14 = vsel %vm1966_vm5, %v1888_v46, %v1982_v0  ;;  %v1898_v42 = vadd.f32 %v1897_v8, %v8914_v36  ;;  %v8937_v46 = vpop.permute.xlu0 %1790 }
 0x7b6   :  { %v7517_v15 = vpack.c.bf16 %v1999_v53, %v1998_v14  ;;  %vm1969_vm6 = vcmp.gt.f32.partialorder %v1903_v47, 0.0  ;;  %v1985_v57 = vmul.f32 0.01, %v1903_v47  ;;  %10433 = vst [vmem:[#allocation89_spill] sm:$0xff] %v8937_v46 }
 0x7b7   :  { %vm1968_vm7 = vcmp.gt.f32.partialorder %v1898_v42, 0.0  ;;  %v1984_v1 = vmul.f32 0.01, %v1898_v42  ;;  %v6558_v55 = vpop.f32.mrb[36].mxu1 }
 0x7b8   :  { %v2001_v52 = vsel %vm1969_vm6, %v1903_v47, %v1985_v57  ;;  %v1913_v50 = vadd.f32 %v6558_v55, %v8920_v11  ;;  %v1907_v9 = vpop.f32.mrb[37].mxu1  ;;  %7518 = vmatpush3.bf16.msra.mxu0 %v7517_v15 }
 0x7b9   :  { %v2000_v10 = vsel %vm1968_vm7, %v1898_v42, %v1984_v1  ;;  %v1908_v40 = vadd.f32 %v1907_v9, %v8922_v54  ;;  %7519 = vmatprep.subr.bf16.mxu0 %v10400_v13  ;;  %v8942_v1 = vpop.permute.xlu1 %1802  ;;  %v8944_v54 = vpop.permute.xlu0 %1798 }
 0x7ba   :  { %v7520_v14 = vpack.c.bf16 %v2001_v52, %v2000_v10  ;;  %vm1971_vm8 = vcmp.gt.f32.partialorder %v1913_v50, 0.0  ;;  %v1987_v0 = vmul.f32 0.01, %v1913_v50  ;;  %10434 = vst [vmem:[#allocation90_spill] sm:$0xff] %v8942_v1  ;;  %10435 = vst [vmem:[#allocation91_spill] sm:$0xff] %v8944_v54 }
 0x7bb   :  { %vm1970_vm9 = vcmp.gt.f32.partialorder %v1908_v40, 0.0  ;;  %v1986_v12 = vmul.f32 0.01, %v1908_v40  ;;  %v6561_v53 = vpop.f32.mrb[38].mxu1 }
 0x7bc   :  { %v2003_v57 = vsel %vm1971_vm8, %v1913_v50, %v1987_v0  ;;  %v1923_v55 = vadd.f32 %v6561_v53, %v8926_v2  ;;  %v1917_v47 = vpop.f32.mrb[39].mxu1  ;;  %7521 = vmatpush3.bf16.msra.mxu0 %v7520_v14 }
 0x7bd   :  { %v2002_v8 = vsel %vm1970_vm9, %v1908_v40, %v1986_v12  ;;  %v1918_v42 = vadd.f32 %v1917_v47, %v8928_v34  ;;  %7522 = vmatprep.subr.bf16.mxu0 %v10400_v13 }
 0x7be   :  { %v7523_v9 = vpack.c.bf16 %v2003_v57, %v2002_v8  ;;  %vm1973_vm10 = vcmp.gt.f32.partialorder %v1923_v55, 0.0  ;;  %v1989_v15 = vmul.f32 0.01, %v1923_v55 }
 0x7bf   :  { %vm1972_vm11 = vcmp.gt.f32.partialorder %v1918_v42, 0.0  ;;  %v1988_v52 = vmul.f32 0.01, %v1918_v42  ;;  %v6564_v10 = vpop.f32.mrb[40].mxu1 }
 0x7c0   :  { %v2005_v50 = vsel %vm1973_vm10, %v1923_v55, %v1989_v15  ;;  %v1933_v0 = vadd.f32 %v6564_v10, %v8933_v49  ;;  %v1927_v53 = vpop.f32.mrb[41].mxu1  ;;  %7524 = vmatpush3.bf16.msra.mxu0 %v7523_v9  ;;  %v8950_v55 = vpop.permute.xlu1 %1810 }
 0x7c1   :  { %v2004_v40 = vsel %vm1972_vm11, %v1918_v42, %v1988_v52  ;;  %v1928_v14 = vadd.f32 %v1927_v53, %v8937_v46  ;;  %7525 = vmatprep.subr.bf16.mxu0 %v10400_v13  ;;  %10436 = vst [vmem:[#allocation92_spill] sm:$0xff] %v8950_v55  ;;  %v8954_v9 = vpop.permute.xlu0 %1806 }
 0x7c2   :  { %v7526_v12 = vpack.c.bf16 %v2005_v50, %v2004_v40  ;;  %vm1975_vm12 = vcmp.gt.f32.partialorder %v1933_v0, 0.0  ;;  %v1991_v57 = vmul.f32 0.01, %v1933_v0  ;;  %10437 = vst [vmem:[#allocation93_spill] sm:$0xff] %v8954_v9 }
 0x7c3   :  { %vm1974_vm13 = vcmp.gt.f32.partialorder %v1928_v14, 0.0  ;;  %v1990_v47 = vmul.f32 0.01, %v1928_v14  ;;  %v6567_v8 = vpop.f32.mrb[42].mxu1 }
 0x7c4   :  { %v2007_v34 = vsel %vm1975_vm12, %v1933_v0, %v1991_v57  ;;  %v1943_v2 = vadd.f32 %v6567_v8, %v8942_v1  ;;  %v1937_v11 = vpop.f32.mrb[43].mxu1  ;;  %7527 = vmatpush3.bf16.msra.mxu0 %v7526_v12  ;;  %v8959_v8 = vpop.permute.xlu1 %1818 }
 0x7c5   :  { %v2006_v15 = vsel %vm1974_vm13, %v1928_v14, %v1990_v47  ;;  %v1938_v42 = vadd.f32 %v1937_v11, %v8944_v54  ;;  %7528 = vmatprep.subr.bf16.mxu0 %v10400_v13  ;;  %10438 = vst [vmem:[#allocation94_spill] sm:$0xff] %v8959_v8  ;;  %v8961_v54 = vpop.permute.xlu0 %1814 }
 0x7c6   :  { %v7529_v52 = vpack.c.bf16 %v2007_v34, %v2006_v15  ;;  %vm1977_vm14 = vcmp.gt.f32.partialorder %v1943_v2, 0.0  ;;  %v1993_v10 = vmul.f32 0.01, %v1943_v2  ;;  %10439 = vst [vmem:[#allocation95_spill] sm:$0xff] %v8961_v54 }
 0x7c7   :  { %vm1976_vm15 = vcmp.gt.f32.partialorder %v1938_v42, 0.0  ;;  %v1992_v50 = vmul.f32 0.01, %v1938_v42  ;;  %v6570_v53 = vpop.f32.mrb[44].mxu1 }
 0x7c8   :  { %v2009_v0 = vsel %vm1977_vm14, %v1943_v2, %v1993_v10  ;;  %v1953_v40 = vadd.f32 %v6570_v53, %v8950_v55  ;;  %v1947_v57 = vpop.f32.mrb[45].mxu1  ;;  %7530 = vmatpush3.bf16.msra.mxu0 %v7529_v52 }
 0x7c9   :  { %v2008_v12 = vsel %vm1976_vm15, %v1938_v42, %v1992_v50  ;;  %v1948_v14 = vadd.f32 %v1947_v57, %v8954_v9  ;;  %7531 = vmatprep.subr.bf16.mxu0 %v10400_v13  ;;  %v8969_v57 = vld [vmem:[%s10155_s1] sm:$0xf] }
 0x7ca   :  { %v7532_v11 = vpack.c.bf16 %v2009_v0, %v2008_v12  ;;  %vm1979_vm2 = vcmp.gt.f32.partialorder %v1953_v40, 0.0  ;;  %v1995_v47 = vmul.f32 0.01, %v1953_v40 }
 0x7cb   :  { %vm1978_vm3 = vcmp.gt.f32.partialorder %v1948_v14, 0.0  ;;  %v1994_v34 = vmul.f32 0.01, %v1948_v14  ;;  %v6573_v15 = vpop.f32.mrb[46].mxu1 }
 0x7cc   :  { %v2011_v2 = vsel %vm1979_vm2, %v1953_v40, %v1995_v47  ;;  %v1963_v10 = vadd.f32 %v6573_v15, %v8959_v8  ;;  %v1957_v53 = vpop.f32.mrb[47].mxu1  ;;  %7533 = vmatpush3.bf16.msra.mxu0 %v7532_v11  ;;  %v7970_v15 = vld [vmem:[%s10151_s3 + $0x100] sm:$0xff] }
 0x7cd   :  { %v2010_v42 = vsel %vm1978_vm3, %v1948_v14, %v1994_v34  ;;  %v1958_v52 = vadd.f32 %v1957_v53, %v8961_v54  ;;  %7534 = vmatprep.subr.bf16.mxu0 %v10400_v13  ;;  %v2102_v14 = vrot.slane %v8969_v57, 2  ;;  %v2014_v34 = vld [vmem:[%s10154_s5] sm:$0xf]  ;;  %v7973_v53 = vld [vmem:[%s10151_s3 + $0x118] sm:$0xff] }
 0x7ce   :  { %v7535_v50 = vpack.c.bf16 %v2011_v2, %v2010_v42  ;;  %vm1981_vm5 = vcmp.gt.f32.partialorder %v1963_v10, 0.0  ;;  %v1997_v0 = vmul.f32 0.01, %v1963_v10  ;;  %v7971_v2 = vld [vmem:[%s10151_s3 + $0x108] sm:$0xff]  ;;  %v7974_v42 = vld [vmem:[%s10151_s3 + $0x120] sm:$0xff] }
 0x7cf   :  { %vm1980_vm6 = vcmp.gt.f32.partialorder %v1958_v52, 0.0  ;;  %v1996_v12 = vmul.f32 0.01, %v1958_v52 }
 0x7d0   :  { %v2013_v40 = vsel %vm1981_vm5, %v1963_v10, %v1997_v0  ;;  %7536 = vmatpush3.bf16.msra.mxu0 %v7535_v50  ;;  %v7972_v10 = vld [vmem:[%s10151_s3 + $0x110] sm:$0xff]  ;;  %v7977_v0 = vld [vmem:[%s10151_s3 + $0x138] sm:$0xff]  ;;  %vm5381_vm5 = vcmask 9216  }
 0x7d1   :  { %v2012_v47 = vsel %vm1980_vm6, %v1958_v52, %v1996_v12  ;;  %7537 = vmatprep.subr.bf16.mxu0 %v10400_v13  ;;  %v7975_v52 = vld [vmem:[%s10151_s3 + $0x128] sm:$0xff]  ;;  %v7976_v50 = vld [vmem:[%s10151_s3 + $0x130] sm:$0xff]  ;;  %v7978_v12 = vld [vmem:[%s10151_s3 + $0x140] sm:$0xff] }
 0x7d2   :  { %v7538_v11 = vpack.c.bf16 %v2013_v40, %v2012_v47  ;;  %v7979_v40 = vld [vmem:[%s10151_s3 + $0x148] sm:$0xff]  ;;  %v7980_v47 = vld [vmem:[%s10151_s3 + $0x150] sm:$0xff] }
 0x7d4   :  { %7539 = vmatpush3.bf16.msra.mxu0 %v7538_v11  ;;  %v7982_v11 = vld [vmem:[%s10151_s3 + $0x160] sm:$0xff] }
 0x7d5   :  { %6609 = vmatprep.subr.msk.mxu0 %vm171_vm1, %v2102_v14 }
 0x7d7   :  { %6607 = vmatmul.mubr.f32.vlgmr.msra.gmra.mrb[52].mxu0 %v2014_v34  ;;  %v7983_v34 = vld [vmem:[%s10151_s3 + $0x168] sm:$0xff] }
 0x7d8   :  { %6610 = vmatpush3.msk.msra.mxu0 %vm171_vm1, %v2102_v14  ;;  %6611 = vmatprep.mubr.msk.f32.mxu0 %vm138_vm0, %v7970_v15  ;;  %v7981_v14 = vld [vmem:[%s10151_s3 + $0x158] sm:$0xff]  ;;  %v7984_v15 = vld [vmem:[%s10151_s3 + $0x170] sm:$0xff] }
 0x7d9   :  { %7572 = vmatprep.subr.bf16.mxu0 %v10400_v13 }
 0x7db   :  { %6612 = vmatmul.mubr.msk.f32.vlgmr.msra.gmra.mrb[54].mxu0 %vm138_vm0, %v7971_v2  ;;  %v7985_v2 = vld [vmem:[%s10151_s3 + $0x178] sm:$0xff] }
 0x7dc   :  { %6614 = vmatprep.mubr.msk.f32.mxu0 %vm138_vm0, %v7972_v10  ;;  %v9045_v10 = vpop.permute.xlu0 %2018 }
 0x7dd   :  { %10440 = vst [vmem:[#allocation96_spill] sm:$0xff] %v9045_v10 }
 0x7df   :  { %6615 = vmatmul.mubr.msk.f32.gmra.mrb[56].mxu0 %vm138_vm0, %v7973_v53 }
 0x7e0   :  { %6617 = vmatprep.mubr.msk.f32.mxu0 %vm138_vm0, %v7974_v42 }
 0x7e3   :  { %6618 = vmatmul.mubr.msk.f32.gmra.mrb[58].mxu0 %vm138_vm0, %v7975_v52 }
 0x7e4   :  { %6620 = vmatprep.mubr.msk.f32.mxu0 %vm138_vm0, %v7976_v50 }
 0x7e7   :  { %6621 = vmatmul.mubr.msk.f32.gmra.mrb[60].mxu0 %vm138_vm0, %v7977_v0 }
 0x7e8   :  { %6623 = vmatprep.mubr.msk.f32.mxu0 %vm138_vm0, %v7978_v12 }
 0x7eb   :  { %6624 = vmatmul.mubr.msk.f32.gmra.mrb[62].mxu0 %vm138_vm0, %v7979_v40 }
 0x7ec   :  { %6626 = vmatprep.mubr.msk.f32.mxu0 %vm138_vm0, %v7980_v47 }
 0x7ef   :  { %6627 = vmatmul.mubr.msk.f32.gmra.mrb[64].mxu0 %vm138_vm0, %v7981_v14 }
 0x7f0   :  { %6629 = vmatprep.mubr.msk.f32.mxu0 %vm138_vm0, %v7982_v11 }
 0x7f3   :  { %6630 = vmatmul.mubr.msk.f32.gmra.mrb[66].mxu0 %vm138_vm0, %v7983_v34 }
 0x7f4   :  { %6632 = vmatprep.mubr.msk.f32.mxu0 %vm138_vm0, %v7984_v15 }
 0x7f7   :  { %6633 = vmatmul.mubr.msk.f32.gmra.mrb[68].mxu0 %vm138_vm0, %v7985_v2 }
 0x7f8   :  { %6723 = vmatprep.mubr.msk.f32.mxu0 %vm8139_vm4, %v10411_v61 }
 0x8aa   :  { %v2087_v53 = vpop.f32.mrb[52].mxu0 }
 0x8ab   :  { %v9048_v42 = vadd.f32 %v2087_v53, %v9045_v10  ;;  %v6608_v52 = vpop.f32.mrb[53].mxu0 }
 0x8ad   :  { %7938 = vtanh.f32 %v9048_v42 }
 0x8ae   :  { %v6613_v50 = vpop.f32.mrb[54].mxu0 }
 0x8af   :  { %v2177_v0 = vadd.f32 %v6613_v50, %v8288_v24  ;;  %v2171_v12 = vpop.f32.mrb[55].mxu0 }
 0x8b0   :  { %v2172_v40 = vadd.f32 %v2171_v12, %v8284_v22 }
 0x8b1   :  { %vm2251_vm7 = vcmp.gt.f32.partialorder %v2177_v0, 0.0  ;;  %v2267_v47 = vmul.f32 0.01, %v2177_v0 }
 0x8b2   :  { %vm2250_vm8 = vcmp.gt.f32.partialorder %v2172_v40, 0.0  ;;  %v2266_v14 = vmul.f32 0.01, %v2172_v40  ;;  %v6616_v11 = vpop.f32.mrb[56].mxu0 }
 0x8b3   :  { %v2187_v34 = vadd.f32 %v6616_v11, %v8286_v23  ;;  %v2181_v15 = vpop.f32.mrb[57].mxu0  ;;  %v2283_v2 = vsel %vm2251_vm7, %v2177_v0, %v2267_v47 }
 0x8b4   :  { %v2182_v53 = vadd.f32 %v2181_v15, %v8282_v21  ;;  %v2282_v52 = vsel %vm2250_vm8, %v2172_v40, %v2266_v14 }
 0x8b5   :  { %vm2253_vm9 = vcmp.gt.f32.partialorder %v2187_v34, 0.0  ;;  %v2269_v10 = vmul.f32 0.01, %v2187_v34  ;;  %v7540_v54 = vpack.c.bf16 %v2283_v2, %v2282_v52 }
 0x8b6   :  { %vm2252_vm10 = vcmp.gt.f32.partialorder %v2182_v53, 0.0  ;;  %v2268_v50 = vmul.f32 0.01, %v2182_v53  ;;  %v6619_v24 = vpop.f32.mrb[58].mxu0 }
 0x8b7   :  { %v7939_v8 = vpop.eup %7938  ;;  %v2197_v12 = vadd.f32 %v6619_v24, %v8290_v25  ;;  %v2191_v22 = vpop.f32.mrb[59].mxu0  ;;  %7541 = vmatprep.subr.bf16.mxu1 %v7540_v54  ;;  %v2285_v9 = vsel %vm2253_vm9, %v2187_v34, %v2269_v10 }
 0x8b8   :  { %v2096_v55 = vsub.f32 0.0, %v7939_v8  ;;  %v2192_v11 = vadd.f32 %v2191_v22, %v8292_v26  ;;  %7543 = vmatpush3.bf16.msra.mxu1 %v7540_v54  ;;  %v2284_v0 = vsel %vm2252_vm10, %v2182_v53, %v2268_v50 }
 0x8b9   :  { %vm2255_vm11 = vcmp.gt.f32.partialorder %v2197_v12, 0.0  ;;  %v2271_v47 = vmul.f32 0.01, %v2197_v12  ;;  %v7544_v40 = vpack.c.bf16 %v2285_v9, %v2284_v0 }
 0x8ba   :  { %v2097_v14 = vmul.f32 1.442695, %v2096_v55  ;;  %vm2254_vm12 = vcmp.gt.f32.partialorder %v2192_v11, 0.0  ;;  %v2270_v15 = vmul.f32 0.01, %v2192_v11  ;;  %v6622_v2 = vpop.f32.mrb[60].mxu0 }
 0x8bb   :  { %v2207_v52 = vadd.f32 %v6622_v2, %v8296_v32  ;;  %v2201_v21 = vpop.f32.mrb[61].mxu0  ;;  %7545 = vmatprep.subr.bf16.mxu1 %v7544_v40  ;;  %v2287_v24 = vsel %vm2255_vm11, %v2197_v12, %v2271_v47  ;;  %v2093_v47 = vrot.slane %v9048_v42, 2 }
 0x8bc   :  { %7940 = vpow2.f32 %v2097_v14  ;;  %v2202_v10 = vadd.f32 %v2201_v21, %v8298_v35  ;;  %7547 = vmatpush3.bf16.msra.mxu1 %v7544_v40  ;;  %v2286_v8 = vsel %vm2254_vm12, %v2192_v11, %v2270_v15 }
 0x8bd   :  { %vm2257_vm13 = vcmp.gt.f32.partialorder %v2207_v52, 0.0  ;;  %v2273_v22 = vmul.f32 0.01, %v2207_v52  ;;  %v7548_v54 = vpack.c.bf16 %v2287_v24, %v2286_v8 }
 0x8be   :  { %vm2256_vm14 = vcmp.gt.f32.partialorder %v2202_v10, 0.0  ;;  %v2272_v34 = vmul.f32 0.01, %v2202_v10  ;;  %v6625_v9 = vpop.f32.mrb[62].mxu0 }
 0x8bf   :  { %v2217_v55 = vadd.f32 %v6625_v9, %v8303_v48  ;;  %v2211_v53 = vpop.f32.mrb[63].mxu0  ;;  %7549 = vmatprep.subr.bf16.mxu1 %v7548_v54  ;;  %v2289_v50 = vsel %vm2257_vm13, %v2207_v52, %v2273_v22  ;;  %v2095_v22 = vsub.f32 %v8514_v58, %v2093_v47 }
 0x8c0   :  { %v2212_v0 = vadd.f32 %v2211_v53, %v8306_v51  ;;  %7551 = vmatpush3.bf16.msra.mxu1 %v7548_v54  ;;  %v2288_v12 = vsel %vm2256_vm14, %v2202_v10, %v2272_v34 }
 0x8c1   :  { %vm2259_vm15 = vcmp.gt.f32.partialorder %v2217_v55, 0.0  ;;  %v2275_v21 = vmul.f32 0.01, %v2217_v55  ;;  %v7552_v11 = vpack.c.bf16 %v2289_v50, %v2288_v12 }
 0x8c2   :  { %vm2258_vm2 = vcmp.gt.f32.partialorder %v2212_v0, 0.0  ;;  %v2274_v40 = vmul.f32 0.01, %v2212_v0  ;;  %v6628_v14 = vpop.f32.mrb[64].mxu0 }
 0x8c3   :  { %v2227_v15 = vadd.f32 %v6628_v14, %v8310_v63  ;;  %v2221_v2 = vpop.f32.mrb[65].mxu0  ;;  %7553 = vmatprep.subr.bf16.mxu1 %v7552_v11  ;;  %v2291_v24 = vsel %vm2259_vm15, %v2217_v55, %v2275_v21 }
 0x8c4   :  { %v2222_v8 = vadd.f32 %v2221_v2, %v8312_v4  ;;  %7555 = vmatpush3.bf16.msra.mxu1 %v7552_v11  ;;  %v2290_v52 = vsel %vm2258_vm2, %v2212_v0, %v2274_v40 }
 0x8c5   :  { %vm2261_vm3 = vcmp.gt.f32.partialorder %v2227_v15, 0.0  ;;  %v2277_v10 = vmul.f32 0.01, %v2227_v15  ;;  %v7556_v42 = vpack.c.bf16 %v2291_v24, %v2290_v52 }
 0x8c6   :  { %v7941_v54 = vpop.eup %7940  ;;  %vm2260_vm6 = vcmp.gt.f32.partialorder %v2222_v8, 0.0  ;;  %v2276_v34 = vmul.f32 0.01, %v2222_v8  ;;  %v6631_v9 = vpop.f32.mrb[66].mxu0 }
 0x8c7   :  { %v9065_v53 = vmul.f32 %v7941_v54, %v2095_v22  ;;  %v2237_v50 = vadd.f32 %v6631_v9, %v8317_v17  ;;  %v2231_v12 = vpop.f32.mrb[67].mxu0  ;;  %7557 = vmatprep.subr.bf16.mxu1 %v7556_v42  ;;  %v2293_v55 = vsel %vm2261_vm3, %v2227_v15, %v2277_v10  ;;  %v7986_v9 = vld [vmem:[%s10152_s4 + $0x108] sm:$0xff] }
 0x8c8   :  { %v2232_v21 = vadd.f32 %v2231_v12, %v8320_v27  ;;  %7559 = vmatpush3.bf16.msra.mxu1 %v7556_v42  ;;  %v2292_v0 = vsel %vm2260_vm6, %v2222_v8, %v2276_v34  ;;  %v7988_v12 = vld [vmem:[%s10152_s4 + $0x118] sm:$0xff]  ;;  %v10462_v27 = vld [vmem:[#allocation56_spill] sm:$0xff] }
 0x8c9   :  { %5384 = vst.msk [vmem:[%s10156_s11 + $0x4] sm:$0x3] %vm5381_vm5, %v9065_v53  ;;  %vm2263_vm7 = vcmp.gt.f32.partialorder %v2237_v50, 0.0  ;;  %v2279_v58 = vmul.f32 0.01, %v2237_v50  ;;  %v7560_v47 = vpack.c.bf16 %v2293_v55, %v2292_v0  ;;  %v7989_v55 = vld [vmem:[%s10152_s4 + $0x120] sm:$0xff] }
 0x8ca   :  { %vm2262_vm8 = vcmp.gt.f32.partialorder %v2232_v21, 0.0  ;;  %v2278_v11 = vmul.f32 0.01, %v2232_v21  ;;  %v6634_v40 = vpop.f32.mrb[68].mxu0  ;;  %v7991_v0 = vld [vmem:[%s10152_s4 + $0x130] sm:$0xff] }
 0x8cb   :  { %v2247_v14 = vadd.f32 %v6634_v40, %v8324_v41  ;;  %v2241_v2 = vpop.f32.mrb[69].mxu0  ;;  %7561 = vmatprep.subr.bf16.mxu1 %v7560_v47  ;;  %v2295_v15 = vsel %vm2263_vm7, %v2237_v50, %v2279_v58  ;;  %v7987_v50 = vld [vmem:[%s10152_s4 + $0x110] sm:$0xff]  ;;  %v7992_v58 = vld [vmem:[%s10152_s4 + $0x138] sm:$0xff] }
 0x8cc   :  { %v2242_v24 = vadd.f32 %v2241_v2, %v8326_v44  ;;  %7563 = vmatpush3.bf16.msra.mxu1 %v7560_v47  ;;  %v2294_v8 = vsel %vm2262_vm8, %v2232_v21, %v2278_v11  ;;  %v7990_v21 = vld [vmem:[%s10152_s4 + $0x128] sm:$0xff]  ;;  %v7993_v47 = vld [vmem:[%s10152_s4 + $0x140] sm:$0xff]  ;;  %v7995_v40 = vld [vmem:[%s10152_s4 + $0x150] sm:$0xff] }
 0x8cd   :  { %vm2265_vm9 = vcmp.gt.f32.partialorder %v2247_v14, 0.0  ;;  %v2281_v52 = vmul.f32 0.01, %v2247_v14  ;;  %v7564_v22 = vpack.c.bf16 %v2295_v15, %v2294_v8  ;;  %v7994_v11 = vld [vmem:[%s10152_s4 + $0x148] sm:$0xff]  ;;  %v7997_v2 = vld [vmem:[%s10152_s4 + $0x160] sm:$0xff]  ;;  %v8000_v8 = vld [vmem:[%s10152_s4 + $0x178] sm:$0xff] }
 0x8ce   :  { %vm2264_vm10 = vcmp.gt.f32.partialorder %v2242_v24, 0.0  ;;  %v2280_v10 = vmul.f32 0.01, %v2242_v24  ;;  %v7998_v15 = vld [vmem:[%s10152_s4 + $0x168] sm:$0xff] }
 0x8cf   :  { %7565 = vmatprep.subr.bf16.mxu1 %v7564_v22  ;;  %v2297_v42 = vsel %vm2265_vm9, %v2247_v14, %v2281_v52  ;;  %v7996_v14 = vld [vmem:[%s10152_s4 + $0x158] sm:$0xff]  ;;  %v8001_v52 = vld [vmem:[%s10152_s4 + $0x80] sm:$0xff] }
 0x8d0   :  { %7567 = vmatpush3.bf16.msra.mxu1 %v7564_v22  ;;  %v2296_v54 = vsel %vm2264_vm10, %v2242_v24, %v2280_v10  ;;  %v7999_v24 = vld [vmem:[%s10152_s4 + $0x170] sm:$0xff] }
 0x8d1   :  { %v7568_v34 = vpack.c.bf16 %v2297_v42, %v2296_v54 }
 0x8d3   :  { %7569 = vmatprep.subr.bf16.mxu1 %v7568_v34 }
 0x8d4   :  { %7571 = vmatpush3.bf16.msra.mxu1 %v7568_v34 }
 0x8d7   :  { %6668 = vmatmul.mubr.f32.vlgmr.msra.gmra.mrb[48].mxu1 %v7986_v9 }
 0x8d8   :  { %6670 = vmatprep.mubr.f32.mxu1 %v7987_v50 }
 0x8db   :  { %6671 = vmatmul.mubr.f32.gmra.mrb[50].mxu1 %v7988_v12 }
 0x8dc   :  { %6673 = vmatprep.mubr.f32.mxu1 %v7989_v55 }
 0x8df   :  { %6674 = vmatmul.mubr.f32.gmra.mrb[52].mxu1 %v7990_v21 }
 0x8e0   :  { %6676 = vmatprep.mubr.f32.mxu1 %v7991_v0 }
 0x8e3   :  { %6677 = vmatmul.mubr.f32.gmra.mrb[54].mxu1 %v7992_v58 }
 0x8e4   :  { %6679 = vmatprep.mubr.f32.mxu1 %v7993_v47 }
 0x8e7   :  { %6680 = vmatmul.mubr.f32.gmra.mrb[56].mxu1 %v7994_v11 }
 0x8e8   :  { %6682 = vmatprep.mubr.f32.mxu1 %v7995_v40 }
 0x8eb   :  { %6683 = vmatmul.mubr.f32.gmra.mrb[58].mxu1 %v7996_v14 }
 0x8ec   :  { %6685 = vmatprep.mubr.f32.mxu1 %v7997_v2 }
 0x8ef   :  { %6686 = vmatmul.mubr.f32.gmra.mrb[60].mxu1 %v7998_v15 }
 0x8f0   :  { %6688 = vmatprep.mubr.f32.mxu1 %v7999_v24 }
 0x8f3   :  { %6689 = vmatmul.mubr.f32.gmra.mrb[62].mxu1 %v8000_v8 }
 0x8f4   :  { %6784 = vmatprep.mubr.f32.mxu1 %v8001_v52 }
 0x9aa   :  { %v6669_v22 = vpop.f32.mrb[48].mxu1 }
 0x9ab   :  { %v2370_v10 = vadd.f32 %v6669_v22, %v8385_v19  ;;  %v2364_v42 = vpop.f32.mrb[49].mxu1 }
 0x9ac   :  { %v2365_v54 = vadd.f32 %v2364_v42, %v8383_v18 }
 0x9ad   :  { %vm2444_vm11 = vcmp.gt.f32.partialorder %v2370_v10, 0.0  ;;  %v2460_v34 = vmul.f32 0.01, %v2370_v10 }
 0x9ae   :  { %vm2443_vm12 = vcmp.gt.f32.partialorder %v2365_v54, 0.0  ;;  %v2459_v9 = vmul.f32 0.01, %v2365_v54  ;;  %v6672_v50 = vpop.f32.mrb[50].mxu1 }
 0x9af   :  { %v2476_v12 = vsel %vm2444_vm11, %v2370_v10, %v2460_v34  ;;  %v2380_v55 = vadd.f32 %v6672_v50, %v8387_v28  ;;  %v2374_v21 = vpop.f32.mrb[51].mxu1 }
 0x9b0   :  { %v2475_v0 = vsel %vm2443_vm12, %v2365_v54, %v2459_v9  ;;  %v2375_v58 = vadd.f32 %v2374_v21, %v8389_v29 }
 0x9b1   :  { %v7573_v47 = vpack.c.bf16 %v2476_v12, %v2475_v0  ;;  %vm2446_vm13 = vcmp.gt.f32.partialorder %v2380_v55, 0.0  ;;  %v2462_v11 = vmul.f32 0.01, %v2380_v55 }
 0x9b2   :  { %vm2445_vm14 = vcmp.gt.f32.partialorder %v2375_v58, 0.0  ;;  %v2461_v40 = vmul.f32 0.01, %v2375_v58  ;;  %v6675_v14 = vpop.f32.mrb[52].mxu1 }
 0x9b3   :  { %v2478_v2 = vsel %vm2446_vm13, %v2380_v55, %v2462_v11  ;;  %v2390_v15 = vadd.f32 %v6675_v14, %v8391_v30  ;;  %v2384_v24 = vpop.f32.mrb[53].mxu1  ;;  %7574 = vmatpush3.bf16.msra.mxu0 %v7573_v47  ;;  %v10456_v30 = vld [vmem:[#allocation50_spill] sm:$0xff] }
 0x9b4   :  { %v2477_v8 = vsel %vm2445_vm14, %v2375_v58, %v2461_v40  ;;  %v2385_v52 = vadd.f32 %v2384_v24, %v8393_v31  ;;  %7575 = vmatprep.subr.bf16.mxu0 %v10400_v13 }
 0x9b5   :  { %v7576_v22 = vpack.c.bf16 %v2478_v2, %v2477_v8  ;;  %vm2448_vm15 = vcmp.gt.f32.partialorder %v2390_v15, 0.0  ;;  %v2464_v10 = vmul.f32 0.01, %v2390_v15 }
 0x9b6   :  { %vm2447_vm2 = vcmp.gt.f32.partialorder %v2385_v52, 0.0  ;;  %v2463_v42 = vmul.f32 0.01, %v2385_v52  ;;  %v6678_v54 = vpop.f32.mrb[54].mxu1 }
 0x9b7   :  { %v2480_v34 = vsel %vm2448_vm15, %v2390_v15, %v2464_v10  ;;  %v2400_v9 = vadd.f32 %v6678_v54, %v8397_v39  ;;  %v2394_v50 = vpop.f32.mrb[55].mxu1  ;;  %7577 = vmatpush3.bf16.msra.mxu0 %v7576_v22  ;;  %v10454_v39 = vld [vmem:[#allocation48_spill] sm:$0xff] }
 0x9b8   :  { %v2479_v12 = vsel %vm2447_vm2, %v2385_v52, %v2463_v42  ;;  %v2395_v55 = vadd.f32 %v2394_v50, %v8399_v43  ;;  %7578 = vmatprep.subr.bf16.mxu0 %v10400_v13 }
 0x9b9   :  { %v7579_v21 = vpack.c.bf16 %v2480_v34, %v2479_v12  ;;  %vm2450_vm3 = vcmp.gt.f32.partialorder %v2400_v9, 0.0  ;;  %v2466_v0 = vmul.f32 0.01, %v2400_v9 }
 0x9ba   :  { %vm2449_vm6 = vcmp.gt.f32.partialorder %v2395_v55, 0.0  ;;  %v2465_v58 = vmul.f32 0.01, %v2395_v55  ;;  %v6681_v47 = vpop.f32.mrb[56].mxu1 }
 0x9bb   :  { %v2482_v11 = vsel %vm2450_vm3, %v2400_v9, %v2466_v0  ;;  %v2410_v40 = vadd.f32 %v6681_v47, %v8404_v59  ;;  %v2404_v14 = vpop.f32.mrb[57].mxu1  ;;  %7580 = vmatpush3.bf16.msra.mxu0 %v7579_v21  ;;  %v10452_v59 = vld [vmem:[#allocation46_spill] sm:$0xff] }
 0x9bc   :  { %v2481_v2 = vsel %vm2449_vm6, %v2395_v55, %v2465_v58  ;;  %v2405_v15 = vadd.f32 %v2404_v14, %v8408_v62  ;;  %7581 = vmatprep.subr.bf16.mxu0 %v10400_v13 }
 0x9bd   :  { %v7582_v24 = vpack.c.bf16 %v2482_v11, %v2481_v2  ;;  %vm2452_vm7 = vcmp.gt.f32.partialorder %v2410_v40, 0.0  ;;  %v2468_v8 = vmul.f32 0.01, %v2410_v40 }
 0x9be   :  { %vm2451_vm8 = vcmp.gt.f32.partialorder %v2405_v15, 0.0  ;;  %v2467_v52 = vmul.f32 0.01, %v2405_v15  ;;  %v6684_v22 = vpop.f32.mrb[58].mxu1 }
 0x9bf   :  { %v2484_v10 = vsel %vm2452_vm7, %v2410_v40, %v2468_v8  ;;  %v2420_v42 = vadd.f32 %v6684_v22, %v8413_v33  ;;  %v2414_v54 = vpop.f32.mrb[59].mxu1  ;;  %7583 = vmatpush3.bf16.msra.mxu0 %v7582_v24  ;;  %v10450_v33 = vld [vmem:[#allocation44_spill] sm:$0xff] }
 0x9c0   :  { %v2483_v34 = vsel %vm2451_vm8, %v2405_v15, %v2467_v52  ;;  %v2415_v9 = vadd.f32 %v2414_v54, %v8415_v37  ;;  %7584 = vmatprep.subr.bf16.mxu0 %v10400_v13 }
 0x9c1   :  { %v7585_v50 = vpack.c.bf16 %v2484_v10, %v2483_v34  ;;  %vm2454_vm9 = vcmp.gt.f32.partialorder %v2420_v42, 0.0  ;;  %v2470_v12 = vmul.f32 0.01, %v2420_v42 }
 0x9c2   :  { %vm2453_vm10 = vcmp.gt.f32.partialorder %v2415_v9, 0.0  ;;  %v2469_v55 = vmul.f32 0.01, %v2415_v9  ;;  %v6687_v21 = vpop.f32.mrb[60].mxu1 }
 0x9c3   :  { %v2486_v0 = vsel %vm2454_vm9, %v2420_v42, %v2470_v12  ;;  %v2430_v58 = vadd.f32 %v6687_v21, %v8421_v56  ;;  %v2424_v47 = vpop.f32.mrb[61].mxu1  ;;  %7586 = vmatpush3.bf16.msra.mxu0 %v7585_v50  ;;  %v8002_v21 = vld [vmem:[%s10154_s5 + $0x8] sm:$0xf]  ;;  %v10448_v56 = vld [vmem:[#allocation42_spill] sm:$0xff] }
 0x9c4   :  { %v2485_v11 = vsel %vm2453_vm10, %v2415_v9, %v2469_v55  ;;  %v2425_v40 = vadd.f32 %v2424_v47, %v8425_v60  ;;  %7587 = vmatprep.subr.bf16.mxu0 %v10400_v13 }
 0x9c5   :  { %v7588_v14 = vpack.c.bf16 %v2486_v0, %v2485_v11  ;;  %vm2456_vm11 = vcmp.gt.f32.partialorder %v2430_v58, 0.0  ;;  %v2472_v2 = vmul.f32 0.01, %v2430_v58  ;;  %v8003_v0 = vld [vmem:[%s10151_s3 + $0x80] sm:$0xff] }
 0x9c6   :  { %vm2455_vm12 = vcmp.gt.f32.partialorder %v2425_v40, 0.0  ;;  %v2471_v15 = vmul.f32 0.01, %v2425_v40  ;;  %v6690_v24 = vpop.f32.mrb[62].mxu1 }
 0x9c7   :  { %v2488_v8 = vsel %vm2456_vm11, %v2430_v58, %v2472_v2  ;;  %v2440_v52 = vadd.f32 %v6690_v24, %v8430_v16  ;;  %v2434_v22 = vpop.f32.mrb[63].mxu1  ;;  %7589 = vmatpush3.bf16.msra.mxu0 %v7588_v14 }
 0x9c8   :  { %v2487_v10 = vsel %vm2455_vm12, %v2425_v40, %v2471_v15  ;;  %v2435_v42 = vadd.f32 %v2434_v22, %v8432_v38  ;;  %7590 = vmatprep.subr.bf16.mxu0 %v10400_v13  ;;  %v8004_v22 = vld [vmem:[%s10151_s3 + $0x88] sm:$0xff]  ;;  %v10446_v38 = vld [vmem:[#allocation40_spill] sm:$0xff] }
 0x9c9   :  { %v7591_v54 = vpack.c.bf16 %v2488_v8, %v2487_v10  ;;  %vm2458_vm13 = vcmp.gt.f32.partialorder %v2440_v52, 0.0  ;;  %v2474_v34 = vmul.f32 0.01, %v2440_v52  ;;  %v8006_v10 = vld [vmem:[%s10151_s3 + $0x98] sm:$0xff] }
 0x9ca   :  { %vm2457_vm14 = vcmp.gt.f32.partialorder %v2435_v42, 0.0  ;;  %v2473_v9 = vmul.f32 0.01, %v2435_v42 }
 0x9cb   :  { %v2490_v50 = vsel %vm2458_vm13, %v2440_v52, %v2474_v34  ;;  %7592 = vmatpush3.bf16.msra.mxu0 %v7591_v54  ;;  %v8008_v54 = vld [vmem:[%s10151_s3 + $0xa8] sm:$0xff]  ;;  %v8009_v34 = vld [vmem:[%s10151_s3 + $0xb0] sm:$0xff] }
 0x9cc   :  { %v2489_v12 = vsel %vm2457_vm14, %v2435_v42, %v2473_v9  ;;  %7593 = vmatprep.subr.bf16.mxu0 %v10400_v13  ;;  %v8007_v42 = vld [vmem:[%s10151_s3 + $0xa0] sm:$0xff]  ;;  %v8010_v9 = vld [vmem:[%s10151_s3 + $0xb8] sm:$0xff] }
 0x9cd   :  { %v7594_v55 = vpack.c.bf16 %v2490_v50, %v2489_v12  ;;  %v8011_v50 = vld [vmem:[%s10151_s3 + $0xc0] sm:$0xff]  ;;  %v8012_v12 = vld [vmem:[%s10151_s3 + $0xc8] sm:$0xff] }
 0x9cf   :  { %7595 = vmatpush3.bf16.msra.mxu0 %v7594_v55  ;;  %v8013_v55 = vld [vmem:[%s10151_s3 + $0xd0] sm:$0xff] }
 0x9d2   :  { %6724 = vmatmul.mubr.f32.vlgmr.msra.gmra.mrb[70].mxu0 %v8002_v21  ;;  %v8014_v21 = vld [vmem:[%s10151_s3 + $0xd8] sm:$0xff] }
 0x9d3   :  { %6728 = vmatprep.mubr.msk.f32.mxu0 %vm138_vm0, %v8003_v0  ;;  %v8015_v0 = vld [vmem:[%s10151_s3 + $0xe0] sm:$0xff] }
 0xaa5   :  { %v2557_v58 = vpop.f32.mrb[70].mxu0 }
 0xaa6   :  { %v2558_v47 = vadd.f32 %v2557_v58, %v8510_v45  ;;  %v6725_v11 = vpop.f32.mrb[71].mxu0  ;;  %v8016_v58 = vld [vmem:[%s10151_s3 + $0xe8] sm:$0xff] }
 0xaa7   :  { %v8018_v11 = vld [vmem:[%s10151_s3 + $0xf8] sm:$0xff] }
 0xaa8   :  { %7942 = vtanh.f32 %v2558_v47  ;;  %v2563_v15 = vrot.slane %v2558_v47, 2  ;;  %v8017_v47 = vld [vmem:[%s10151_s3 + $0xf0] sm:$0xff] }
 0xaaa   :  { %v2565_v24 = vsub.f32 %v8969_v57, %v2563_v15  ;;  %v8005_v57 = vld [vmem:[%s10151_s3 + $0x90] sm:$0xff] }
 0xab2   :  { %v7943_v40 = vpop.eup %7942 }
 0xab3   :  { %v2566_v14 = vsub.f32 0.0, %v7943_v40 }
 0xab5   :  { %v2567_v2 = vmul.f32 1.442695, %v2566_v14  ;;  %v10441_v14 = vld [vmem:[#allocation36_spill] sm:$0xff] }
 0xab7   :  { %7944 = vpow2.f32 %v2567_v2 }
 0xac1   :  { %v7945_v8 = vpop.eup %7944 }
 0xac2   :  { %v9156_v52 = vmul.f32 %v7945_v8, %v2565_v24  ;;  %v10442_v24 = vld [vmem:[#allocation35_spill] sm:$0xff] }
 0xac4   :  { %6726 = vmatprep.subr.msk.mxu0 %vm171_vm1, %v9156_v52 }
 0xac5   :  { %6727 = vmatpush3.msk.msra.mxu0 %vm171_vm1, %v9156_v52 }
 0xac6   :  { %6729 = vmatmul.mubr.msk.f32.vlgmr.msra.gmra.mrb[72].mxu0 %vm138_vm0, %v8004_v22  ;;  %7628 = vmatprep.subr.bf16.mxu0 %v10400_v13 }
 0xac7   :  { %6731 = vmatprep.mubr.msk.f32.mxu0 %vm138_vm0, %v8005_v57 }
 0xaca   :  { %6732 = vmatmul.mubr.msk.f32.gmra.mrb[74].mxu0 %vm138_vm0, %v8006_v10 }
 0xacb   :  { %6734 = vmatprep.mubr.msk.f32.mxu0 %vm138_vm0, %v8007_v42  ;;  %v10443_v42 = vld [vmem:[#allocation37_spill] sm:$0xff] }
 0xace   :  { %6735 = vmatmul.mubr.msk.f32.gmra.mrb[76].mxu0 %vm138_vm0, %v8008_v54 }
 0xacf   :  { %6737 = vmatprep.mubr.msk.f32.mxu0 %vm138_vm0, %v8009_v34 }
 0xad2   :  { %6738 = vmatmul.mubr.msk.f32.gmra.mrb[78].mxu0 %vm138_vm0, %v8010_v9 }
 0xad3   :  { %6740 = vmatprep.mubr.msk.f32.mxu0 %vm138_vm0, %v8011_v50  ;;  %v10444_v50 = vld [vmem:[#allocation38_spill] sm:$0xff] }
 0xad6   :  { %6741 = vmatmul.mubr.msk.f32.gmra.mrb[80].mxu0 %vm138_vm0, %v8012_v12 }
 0xad7   :  { %6743 = vmatprep.mubr.msk.f32.mxu0 %vm138_vm0, %v8013_v55 }
 0xada   :  { %6744 = vmatmul.mubr.msk.f32.gmra.mrb[82].mxu0 %vm138_vm0, %v8014_v21 }
 0xadb   :  { %6746 = vmatprep.mubr.msk.f32.mxu0 %vm138_vm0, %v8015_v0 }
 0xade   :  { %6747 = vmatmul.mubr.msk.f32.gmra.mrb[84].mxu0 %vm138_vm0, %v8016_v58 }
 0xadf   :  { %6749 = vmatprep.mubr.msk.f32.mxu0 %vm138_vm0, %v8017_v47 }
 0xae2   :  { %6750 = vmatmul.mubr.msk.f32.gmra.mrb[86].mxu0 %vm138_vm0, %v8018_v11  ;;  %v10445_v11 = vld [vmem:[#allocation39_spill] sm:$0xff] }
 0xae3   :  { %6840 = vmatprep.mubr.msk.f32.mxu0 %vm8139_vm4, %v10411_v61 }
 0xb99   :  { %v6730_v40 = vpop.f32.mrb[72].mxu0 }
 0xb9a   :  { %v2645_v2 = vadd.f32 %v6730_v40, %v10441_v14  ;;  %v2639_v15 = vpop.f32.mrb[73].mxu0  ;;  %v9583_v14 = vld [vmem:[%s10157_s7 + $0x20] sm:$0xff] }
 0xb9b   :  { %v2640_v8 = vadd.f32 %v2639_v15, %v10442_v24  ;;  %v9578_v24 = vld [vmem:[%s10157_s7 + $0x38] sm:$0xff] }
 0xb9c   :  { %vm2719_vm15 = vcmp.gt.f32.partialorder %v2645_v2, 0.0  ;;  %v2735_v22 = vmul.f32 0.01, %v2645_v2 }
 0xb9d   :  { %vm2718_vm2 = vcmp.gt.f32.partialorder %v2640_v8, 0.0  ;;  %v2734_v57 = vmul.f32 0.01, %v2640_v8  ;;  %v6733_v10 = vpop.f32.mrb[74].mxu0 }
 0xb9e   :  { %v2655_v54 = vadd.f32 %v6733_v10, %v10443_v42  ;;  %v2649_v34 = vpop.f32.mrb[75].mxu0  ;;  %v2751_v9 = vsel %vm2719_vm15, %v2645_v2, %v2735_v22  ;;  %v9571_v42 = vld [vmem:[%s10157_s7 + $0x18] sm:$0xff] }
 0xb9f   :  { %v2650_v12 = vadd.f32 %v2649_v34, %v10444_v50  ;;  %v2750_v55 = vsel %vm2718_vm2, %v2640_v8, %v2734_v57  ;;  %v10447_v34 = vld [vmem:[#allocation41_spill] sm:$0xff] }
 0xba0   :  { %vm2721_vm3 = vcmp.gt.f32.partialorder %v2655_v54, 0.0  ;;  %v2737_v21 = vmul.f32 0.01, %v2655_v54  ;;  %v7596_v0 = vpack.c.bf16 %v2751_v9, %v2750_v55 }
 0xba1   :  { %vm2720_vm6 = vcmp.gt.f32.partialorder %v2650_v12, 0.0  ;;  %v2736_v58 = vmul.f32 0.01, %v2650_v12  ;;  %v6736_v47 = vpop.f32.mrb[76].mxu0 }
 0xba2   :  { %v2665_v40 = vadd.f32 %v6736_v47, %v10445_v11  ;;  %v2659_v15 = vpop.f32.mrb[77].mxu0  ;;  %7597 = vmatprep.subr.bf16.mxu1 %v7596_v0  ;;  %v2753_v45 = vsel %vm2721_vm3, %v2655_v54, %v2737_v21  ;;  %v10485_v11 = vld [vmem:[#allocation80_spill] sm:$0xff] }
 0xba3   :  { %v2660_v16 = vadd.f32 %v2659_v15, %v10446_v38  ;;  %7599 = vmatpush3.bf16.msra.mxu1 %v7596_v0  ;;  %v2752_v10 = vsel %vm2720_vm6, %v2650_v12, %v2736_v58  ;;  %v10449_v58 = vld [vmem:[#allocation43_spill] sm:$0xff] }
 0xba4   :  { %vm2723_vm7 = vcmp.gt.f32.partialorder %v2665_v40, 0.0  ;;  %v2739_v2 = vmul.f32 0.01, %v2665_v40  ;;  %v7600_v22 = vpack.c.bf16 %v2753_v45, %v2752_v10 }
 0xba5   :  { %vm2722_vm8 = vcmp.gt.f32.partialorder %v2660_v16, 0.0  ;;  %v2738_v8 = vmul.f32 0.01, %v2660_v16  ;;  %v6739_v57 = vpop.f32.mrb[78].mxu0 }
 0xba6   :  { %v2675_v9 = vadd.f32 %v6739_v57, %v10447_v34  ;;  %v2669_v55 = vpop.f32.mrb[79].mxu0  ;;  %7601 = vmatprep.subr.bf16.mxu1 %v7600_v22  ;;  %v2755_v60 = vsel %vm2723_vm7, %v2665_v40, %v2739_v2  ;;  %v10483_v34 = vld [vmem:[#allocation78_spill] sm:$0xff] }
 0xba7   :  { %v2670_v47 = vadd.f32 %v2669_v55, %v10448_v56  ;;  %7603 = vmatpush3.bf16.msra.mxu1 %v7600_v22  ;;  %v2754_v37 = vsel %vm2722_vm8, %v2660_v16, %v2738_v8  ;;  %v10451_v8 = vld [vmem:[#allocation45_spill] sm:$0xff] }
 0xba8   :  { %vm2725_vm9 = vcmp.gt.f32.partialorder %v2675_v9, 0.0  ;;  %v2741_v54 = vmul.f32 0.01, %v2675_v9  ;;  %v7604_v21 = vpack.c.bf16 %v2755_v60, %v2754_v37 }
 0xba9   :  { %vm2724_vm10 = vcmp.gt.f32.partialorder %v2670_v47, 0.0  ;;  %v2740_v12 = vmul.f32 0.01, %v2670_v47  ;;  %v6742_v0 = vpop.f32.mrb[80].mxu0 }
 0xbaa   :  { %v2685_v45 = vadd.f32 %v6742_v0, %v10449_v58  ;;  %v2679_v15 = vpop.f32.mrb[81].mxu0  ;;  %7605 = vmatprep.subr.bf16.mxu1 %v7604_v21  ;;  %v2757_v10 = vsel %vm2725_vm9, %v2675_v9, %v2741_v54  ;;  %v10481_v58 = vld [vmem:[#allocation76_spill] sm:$0xff] }
 0xbab   :  { %v2680_v57 = vadd.f32 %v2679_v15, %v10450_v33  ;;  %7607 = vmatpush3.bf16.msra.mxu1 %v7604_v21  ;;  %v2756_v62 = vsel %vm2724_vm10, %v2670_v47, %v2740_v12  ;;  %v10453_v12 = vld [vmem:[#allocation47_spill] sm:$0xff] }
 0xbac   :  { %vm2727_vm11 = vcmp.gt.f32.partialorder %v2685_v45, 0.0  ;;  %v2743_v40 = vmul.f32 0.01, %v2685_v45  ;;  %v7608_v2 = vpack.c.bf16 %v2757_v10, %v2756_v62 }
 0xbad   :  { %vm2726_vm12 = vcmp.gt.f32.partialorder %v2680_v57, 0.0  ;;  %v2742_v16 = vmul.f32 0.01, %v2680_v57  ;;  %v6745_v22 = vpop.f32.mrb[82].mxu0 }
 0xbae   :  { %v2695_v37 = vadd.f32 %v6745_v22, %v10451_v8  ;;  %v2689_v60 = vpop.f32.mrb[83].mxu0  ;;  %7609 = vmatprep.subr.bf16.mxu1 %v7608_v2  ;;  %v2759_v55 = vsel %vm2727_vm11, %v2685_v45, %v2743_v40  ;;  %v10479_v8 = vld [vmem:[#allocation74_spill] sm:$0xff] }
 0xbaf   :  { %v2690_v0 = vadd.f32 %v2689_v60, %v10452_v59  ;;  %7611 = vmatpush3.bf16.msra.mxu1 %v7608_v2  ;;  %v2758_v43 = vsel %vm2726_vm12, %v2680_v57, %v2742_v16  ;;  %v10455_v16 = vld [vmem:[#allocation49_spill] sm:$0xff] }
 0xbb0   :  { %vm2729_vm13 = vcmp.gt.f32.partialorder %v2695_v37, 0.0  ;;  %v2745_v9 = vmul.f32 0.01, %v2695_v37  ;;  %v7612_v54 = vpack.c.bf16 %v2759_v55, %v2758_v43 }
 0xbb1   :  { %vm2728_vm14 = vcmp.gt.f32.partialorder %v2690_v0, 0.0  ;;  %v2744_v47 = vmul.f32 0.01, %v2690_v0  ;;  %v6748_v21 = vpop.f32.mrb[84].mxu0 }
 0xbb2   :  { %v2705_v62 = vadd.f32 %v6748_v21, %v10453_v12  ;;  %v2699_v15 = vpop.f32.mrb[85].mxu0  ;;  %7613 = vmatprep.subr.bf16.mxu1 %v7612_v54  ;;  %v2761_v10 = vsel %vm2729_vm13, %v2695_v37, %v2745_v9  ;;  %v10477_v12 = vld [vmem:[#allocation72_spill] sm:$0xff] }
 0xbb3   :  { %v2700_v22 = vadd.f32 %v2699_v15, %v10454_v39  ;;  %7615 = vmatpush3.bf16.msra.mxu1 %v7612_v54  ;;  %v2760_v31 = vsel %vm2728_vm14, %v2690_v0, %v2744_v47  ;;  %v8020_v15 = vld [vmem:[%s10152_s4 + $0x90] sm:$0xff] }
 0xbb4   :  { %vm2731_vm15 = vcmp.gt.f32.partialorder %v2705_v62, 0.0  ;;  %v2747_v45 = vmul.f32 0.01, %v2705_v62  ;;  %v7616_v40 = vpack.c.bf16 %v2761_v10, %v2760_v31  ;;  %v8022_v10 = vld [vmem:[%s10152_s4 + $0xa0] sm:$0xff] }
 0xbb5   :  { %vm2730_vm2 = vcmp.gt.f32.partialorder %v2700_v22, 0.0  ;;  %v2746_v57 = vmul.f32 0.01, %v2700_v22  ;;  %v6751_v2 = vpop.f32.mrb[86].mxu0 }
 0xbb6   :  { %v2715_v43 = vadd.f32 %v6751_v2, %v10455_v16  ;;  %v2709_v60 = vpop.f32.mrb[87].mxu0  ;;  %7617 = vmatprep.subr.bf16.mxu1 %v7616_v40  ;;  %v2763_v55 = vsel %vm2731_vm15, %v2705_v62, %v2747_v45  ;;  %v8019_v62 = vld [vmem:[%s10152_s4 + $0x88] sm:$0xff]  ;;  %v8024_v45 = vld [vmem:[%s10152_s4 + $0xb0] sm:$0xff] }
 0xbb7   :  { %v2710_v21 = vadd.f32 %v2709_v60, %v10456_v30  ;;  %7619 = vmatpush3.bf16.msra.mxu1 %v7616_v40  ;;  %v2762_v29 = vsel %vm2730_vm2, %v2700_v22, %v2746_v57  ;;  %v8023_v22 = vld [vmem:[%s10152_s4 + $0xa8] sm:$0xff]  ;;  %v8025_v40 = vld [vmem:[%s10152_s4 + $0xb8] sm:$0xff]  ;;  %v8026_v57 = vld [vmem:[%s10152_s4 + $0xc0] sm:$0xff] }
 0xbb8   :  { %vm2733_vm3 = vcmp.gt.f32.partialorder %v2715_v43, 0.0  ;;  %v2749_v37 = vmul.f32 0.01, %v2715_v43  ;;  %v7620_v9 = vpack.c.bf16 %v2763_v55, %v2762_v29  ;;  %v8021_v29 = vld [vmem:[%s10152_s4 + $0x98] sm:$0xff]  ;;  %v8027_v2 = vld [vmem:[%s10152_s4 + $0xc8] sm:$0xff]  ;;  %v8030_v55 = vld [vmem:[%s10152_s4 + $0xe0] sm:$0xff] }
 0xbb9   :  { %vm2732_vm6 = vcmp.gt.f32.partialorder %v2710_v21, 0.0  ;;  %v2748_v0 = vmul.f32 0.01, %v2710_v21  ;;  %v8029_v60 = vld [vmem:[%s10152_s4 + $0xd8] sm:$0xff]  ;;  %v10475_v30 = vld [vmem:[#allocation70_spill] sm:$0xff] }
 0xbba   :  { %7621 = vmatprep.subr.bf16.mxu1 %v7620_v9  ;;  %v2765_v54 = vsel %vm2733_vm3, %v2715_v43, %v2749_v37  ;;  %v8028_v43 = vld [vmem:[%s10152_s4 + $0xd0] sm:$0xff] }
 0xbbb   :  { %7623 = vmatpush3.bf16.msra.mxu1 %v7620_v9  ;;  %v2764_v31 = vsel %vm2732_vm6, %v2710_v21, %v2748_v0  ;;  %v8031_v21 = vld [vmem:[%s10152_s4 + $0xe8] sm:$0xff]  ;;  %v8032_v37 = vld [vmem:[%s10152_s4 + $0xf0] sm:$0xff]  ;;  %v8033_v9 = vld [vmem:[%s10152_s4 + $0xf8] sm:$0xff] }
 0xbbc   :  { %v7624_v47 = vpack.c.bf16 %v2765_v54, %v2764_v31  ;;  %v9289_v0 = vld [vmem:[%s10152_s4] sm:$0xff] }
 0xbbd   :  { %v10457_v31 = vld [vmem:[#allocation54_spill] sm:$0xff] }
 0xbbe   :  { %7625 = vmatprep.subr.bf16.mxu1 %v7624_v47 }
 0xbbf   :  { %7627 = vmatpush3.bf16.msra.mxu1 %v7624_v47 }
 0xbc2   :  { %6785 = vmatmul.mubr.f32.vlgmr.msra.gmra.mrb[64].mxu1 %v8019_v62 }
 0xbc3   :  { %6787 = vmatprep.mubr.f32.mxu1 %v8020_v15  ;;  %v10458_v15 = vld [vmem:[#allocation51_spill] sm:$0xff] }
 0xbc6   :  { %6788 = vmatmul.mubr.f32.gmra.mrb[66].mxu1 %v8021_v29 }
 0xbc7   :  { %6790 = vmatprep.mubr.f32.mxu1 %v8022_v10 }
 0xbca   :  { %6791 = vmatmul.mubr.f32.gmra.mrb[68].mxu1 %v8023_v22 }
 0xbcb   :  { %6793 = vmatprep.mubr.f32.mxu1 %v8024_v45 }
 0xbce   :  { %6794 = vmatmul.mubr.f32.gmra.mrb[70].mxu1 %v8025_v40 }
 0xbcf   :  { %6796 = vmatprep.mubr.f32.mxu1 %v8026_v57  ;;  %v10459_v57 = vld [vmem:[#allocation53_spill] sm:$0xff] }
 0xbd2   :  { %6797 = vmatmul.mubr.f32.gmra.mrb[72].mxu1 %v8027_v2 }
 0xbd3   :  { %6799 = vmatprep.mubr.f32.mxu1 %v8028_v43 }
 0xbd6   :  { %6800 = vmatmul.mubr.f32.gmra.mrb[74].mxu1 %v8029_v60 }
 0xbd7   :  { %6802 = vmatprep.mubr.f32.mxu1 %v8030_v55  ;;  %v10460_v55 = vld [vmem:[#allocation52_spill] sm:$0xff] }
 0xbda   :  { %6803 = vmatmul.mubr.f32.gmra.mrb[76].mxu1 %v8031_v21 }
 0xbdb   :  { %6805 = vmatprep.mubr.f32.mxu1 %v8032_v37 }
 0xbde   :  { %6806 = vmatmul.mubr.f32.gmra.mrb[78].mxu1 %v8033_v9 }
 0xbdf   :  { %6901 = vmatprep.mubr.f32.mxu1 %v9289_v0 }
 0xc95   :  { %v6786_v54 = vpop.f32.mrb[64].mxu1 }
 0xc96   :  { %v2838_v47 = vadd.f32 %v6786_v54, %v10457_v31  ;;  %v2832_v62 = vpop.f32.mrb[65].mxu1 }
 0xc97   :  { %v2833_v29 = vadd.f32 %v2832_v62, %v10458_v15  ;;  %v10461_v62 = vld [vmem:[#allocation55_spill] sm:$0xff] }
 0xc98   :  { %vm2912_vm7 = vcmp.gt.f32.partialorder %v2838_v47, 0.0  ;;  %v2928_v10 = vmul.f32 0.01, %v2838_v47 }
 0xc99   :  { %vm2911_vm8 = vcmp.gt.f32.partialorder %v2833_v29, 0.0  ;;  %v2927_v22 = vmul.f32 0.01, %v2833_v29  ;;  %v6789_v45 = vpop.f32.mrb[66].mxu1 }
 0xc9a   :  { %v2944_v40 = vsel %vm2912_vm7, %v2838_v47, %v2928_v10  ;;  %v2848_v2 = vadd.f32 %v6789_v45, %v10459_v57  ;;  %v2842_v43 = vpop.f32.mrb[67].mxu1  ;;  %v10474_v57 = vld [vmem:[#allocation69_spill] sm:$0xff] }
 0xc9b   :  { %v2943_v60 = vsel %vm2911_vm8, %v2833_v29, %v2927_v22  ;;  %v2843_v21 = vadd.f32 %v2842_v43, %v10460_v55  ;;  %v10463_v43 = vld [vmem:[#allocation57_spill] sm:$0xff] }
 0xc9c   :  { %v7629_v37 = vpack.c.bf16 %v2944_v40, %v2943_v60  ;;  %vm2914_vm9 = vcmp.gt.f32.partialorder %v2848_v2, 0.0  ;;  %v2930_v9 = vmul.f32 0.01, %v2848_v2 }
 0xc9d   :  { %vm2913_vm10 = vcmp.gt.f32.partialorder %v2843_v21, 0.0  ;;  %v2929_v54 = vmul.f32 0.01, %v2843_v21  ;;  %v6792_v28 = vpop.f32.mrb[68].mxu1 }
 0xc9e   :  { %v2946_v18 = vsel %vm2914_vm9, %v2848_v2, %v2930_v9  ;;  %v2858_v19 = vadd.f32 %v6792_v28, %v10461_v62  ;;  %v2852_v44 = vpop.f32.mrb[69].mxu1  ;;  %7630 = vmatpush3.bf16.msra.mxu0 %v7629_v37  ;;  %v10464_v28 = vld [vmem:[#allocation58_spill] sm:$0xff] }
 0xc9f   :  { %v2945_v41 = vsel %vm2913_vm10, %v2843_v21, %v2929_v54  ;;  %v2853_v47 = vadd.f32 %v2852_v44, %v10462_v27  ;;  %7631 = vmatprep.subr.bf16.mxu0 %v10400_v13  ;;  %v10465_v54 = vld [vmem:[#allocation59_spill] sm:$0xff] }
 0xca0   :  { %v7632_v10 = vpack.c.bf16 %v2946_v18, %v2945_v41  ;;  %vm2916_vm11 = vcmp.gt.f32.partialorder %v2858_v19, 0.0  ;;  %v2932_v29 = vmul.f32 0.01, %v2858_v19 }
 0xca1   :  { %vm2915_vm12 = vcmp.gt.f32.partialorder %v2853_v47, 0.0  ;;  %v2931_v22 = vmul.f32 0.01, %v2853_v47  ;;  %v6795_v45 = vpop.f32.mrb[70].mxu1 }
 0xca2   :  { %v2948_v40 = vsel %vm2916_vm11, %v2858_v19, %v2932_v29  ;;  %v2868_v60 = vadd.f32 %v6795_v45, %v10463_v43  ;;  %v2862_v17 = vpop.f32.mrb[71].mxu1  ;;  %7633 = vmatpush3.bf16.msra.mxu0 %v7632_v10  ;;  %v10466_v29 = vld [vmem:[#allocation60_spill] sm:$0xff] }
 0xca3   :  { %v2947_v2 = vsel %vm2915_vm12, %v2853_v47, %v2931_v22  ;;  %v2863_v9 = vadd.f32 %v2862_v17, %v10464_v28  ;;  %7634 = vmatprep.subr.bf16.mxu0 %v10400_v13 }
 0xca4   :  { %v7635_v21 = vpack.c.bf16 %v2948_v40, %v2947_v2  ;;  %vm2918_vm13 = vcmp.gt.f32.partialorder %v2868_v60, 0.0  ;;  %v2934_v44 = vmul.f32 0.01, %v2868_v60  ;;  %v10467_v2 = vld [vmem:[#allocation61_spill] sm:$0xff] }
 0xca5   :  { %vm2917_vm14 = vcmp.gt.f32.partialorder %v2863_v9, 0.0  ;;  %v2933_v41 = vmul.f32 0.01, %v2863_v9  ;;  %v6798_v18 = vpop.f32.mrb[72].mxu1 }
 0xca6   :  { %v2950_v37 = vsel %vm2918_vm13, %v2868_v60, %v2934_v44  ;;  %v2878_v4 = vadd.f32 %v6798_v18, %v10465_v54  ;;  %v2872_v63 = vpop.f32.mrb[73].mxu1  ;;  %7636 = vmatpush3.bf16.msra.mxu0 %v7635_v21  ;;  %v10468_v44 = vld [vmem:[#allocation62_spill] sm:$0xff]  ;;  %v10473_v54 = vld [vmem:[#allocation68_spill] sm:$0xff] }
 0xca7   :  { %v2949_v19 = vsel %vm2917_vm14, %v2863_v9, %v2933_v41  ;;  %v2873_v45 = vadd.f32 %v2872_v63, %v10466_v29  ;;  %7637 = vmatprep.subr.bf16.mxu0 %v10400_v13 }
 0xca8   :  { %v7638_v47 = vpack.c.bf16 %v2950_v37, %v2949_v19  ;;  %vm2920_vm15 = vcmp.gt.f32.partialorder %v2878_v4, 0.0  ;;  %v2936_v17 = vmul.f32 0.01, %v2878_v4  ;;  %v10469_v19 = vld [vmem:[#allocation63_spill] sm:$0xff] }
 0xca9   :  { %vm2919_vm2 = vcmp.gt.f32.partialorder %v2873_v45, 0.0  ;;  %v2935_v10 = vmul.f32 0.01, %v2873_v45  ;;  %v6801_v22 = vpop.f32.mrb[74].mxu1 }
 0xcaa   :  { %v2952_v40 = vsel %vm2920_vm15, %v2878_v4, %v2936_v17  ;;  %v2888_v51 = vadd.f32 %v6801_v22, %v10467_v2  ;;  %v2882_v48 = vpop.f32.mrb[75].mxu1  ;;  %7639 = vmatpush3.bf16.msra.mxu0 %v7638_v47  ;;  %v10470_v17 = vld [vmem:[#allocation64_spill] sm:$0xff] }
 0xcab   :  { %v2951_v60 = vsel %vm2919_vm2, %v2873_v45, %v2935_v10  ;;  %v2883_v18 = vadd.f32 %v2882_v48, %v10468_v44  ;;  %7640 = vmatprep.subr.bf16.mxu0 %v10400_v13 }
 0xcac   :  { %v7641_v9 = vpack.c.bf16 %v2952_v40, %v2951_v60  ;;  %vm2922_vm3 = vcmp.gt.f32.partialorder %v2888_v51, 0.0  ;;  %v2938_v63 = vmul.f32 0.01, %v2888_v51  ;;  %v10471_v60 = vld [vmem:[#allocation65_spill] sm:$0xff] }
 0xcad   :  { %vm2921_vm6 = vcmp.gt.f32.partialorder %v2883_v18, 0.0  ;;  %v2937_v21 = vmul.f32 0.01, %v2883_v18  ;;  %v6804_v41 = vpop.f32.mrb[76].mxu1 }
 0xcae   :  { %v2954_v37 = vsel %vm2922_vm3, %v2888_v51, %v2938_v63  ;;  %v2898_v35 = vadd.f32 %v6804_v41, %v10469_v19  ;;  %v2892_v32 = vpop.f32.mrb[77].mxu1  ;;  %7642 = vmatpush3.bf16.msra.mxu0 %v7641_v9  ;;  %v10472_v63 = vld [vmem:[#allocation66_spill] sm:$0xff] }
 0xcaf   :  { %v2953_v4 = vsel %vm2921_vm6, %v2883_v18, %v2937_v21  ;;  %v2893_v22 = vadd.f32 %v2892_v32, %v10470_v17  ;;  %7643 = vmatprep.subr.bf16.mxu0 %v10400_v13 }
 0xcb0   :  { %v7644_v45 = vpack.c.bf16 %v2954_v37, %v2953_v4  ;;  %vm2924_vm7 = vcmp.gt.f32.partialorder %v2898_v35, 0.0  ;;  %v2940_v48 = vmul.f32 0.01, %v2898_v35  ;;  %v8035_v4 = vld [vmem:[%s10154_s5 + $0x4] sm:$0xf] }
 0xcb1   :  { %vm2923_vm8 = vcmp.gt.f32.partialorder %v2893_v22, 0.0  ;;  %v2939_v47 = vmul.f32 0.01, %v2893_v22  ;;  %v6807_v10 = vpop.f32.mrb[78].mxu1 }
 0xcb2   :  { %v2956_v40 = vsel %vm2924_vm7, %v2898_v35, %v2940_v48  ;;  %v2908_v26 = vadd.f32 %v6807_v10, %v10471_v60  ;;  %v2902_v25 = vpop.f32.mrb[79].mxu1  ;;  %7645 = vmatpush3.bf16.msra.mxu0 %v7644_v45 }
 0xcb3   :  { %v2955_v51 = vsel %vm2923_vm8, %v2893_v22, %v2939_v47  ;;  %v2903_v41 = vadd.f32 %v2902_v25, %v10472_v63  ;;  %7646 = vmatprep.subr.bf16.mxu0 %v10400_v13  ;;  %v9321_v25 = vld [vmem:[%s10151_s3] sm:$0xff] }
 0xcb4   :  { %v7647_v18 = vpack.c.bf16 %v2956_v40, %v2955_v51  ;;  %vm2926_vm9 = vcmp.gt.f32.partialorder %v2908_v26, 0.0  ;;  %v2942_v32 = vmul.f32 0.01, %v2908_v26  ;;  %v8037_v51 = vld [vmem:[%s10155_s1] sm:$0xf] }
 0xcb5   :  { %vm2925_vm10 = vcmp.gt.f32.partialorder %v2903_v41, 0.0  ;;  %v2941_v9 = vmul.f32 0.01, %v2903_v41 }
 0xcb6   :  { %v2958_v21 = vsel %vm2926_vm9, %v2908_v26, %v2942_v32  ;;  %7648 = vmatpush3.bf16.msra.mxu0 %v7647_v18 }
 0xcb7   :  { %v2957_v37 = vsel %vm2925_vm10, %v2903_v41, %v2941_v9  ;;  %7649 = vmatprep.subr.bf16.mxu0 %v10400_v13 }
 0xcb8   :  { %v7650_v35 = vpack.c.bf16 %v2958_v21, %v2957_v37  ;;  %v9334_v21 = vld [vmem:[%s10151_s3 + $0x8] sm:$0xff]  ;;  %v9342_v37 = vld [vmem:[%s10151_s3 + $0x10] sm:$0xff] }
 0xcba   :  { %7651 = vmatpush3.bf16.msra.mxu0 %v7650_v35  ;;  %v9349_v35 = vld [vmem:[%s10151_s3 + $0x18] sm:$0xff] }
 0xcbd   :  { %6841 = vmatmul.mubr.f32.vlgmr.msra.gmra.mrb[88].mxu0 %v8035_v4  ;;  %v9356_v4 = vld [vmem:[%s10151_s3 + $0x20] sm:$0xff] }
 0xcbe   :  { %6845 = vmatprep.mubr.msk.f32.mxu0 %vm138_vm0, %v9321_v25 }
 0xd90   :  { %v3025_v26 = vpop.f32.mrb[88].mxu0 }
 0xd91   :  { %v3026_v22 = vadd.f32 %v3025_v26, %v8777_v20  ;;  %v6842_v45 = vpop.f32.mrb[89].mxu0  ;;  %v9363_v26 = vld [vmem:[%s10151_s3 + $0x28] sm:$0xff] }
 0xd92   :  { %v9377_v45 = vld [vmem:[%s10151_s3 + $0x38] sm:$0xff] }
 0xd93   :  { %7946 = vtanh.f32 %v3026_v22  ;;  %v3030_v41 = vsub.f32 %v8037_v51, %v3026_v22  ;;  %v9370_v22 = vld [vmem:[%s10151_s3 + $0x30] sm:$0xff]  ;;  %v9412_v51 = vld [vmem:[%s10151_s3 + $0x60] sm:$0xff] }
 0xd9d   :  { %v7947_v48 = vpop.eup %7946 }
 0xd9e   :  { %v3031_v47 = vsub.f32 0.0, %v7947_v48  ;;  %v9384_v48 = vld [vmem:[%s10151_s3 + $0x40] sm:$0xff] }
 0xda0   :  { %v3032_v10 = vmul.f32 1.442695, %v3031_v47  ;;  %v9391_v47 = vld [vmem:[%s10151_s3 + $0x48] sm:$0xff] }
 0xda2   :  { %7948 = vpow2.f32 %v3032_v10  ;;  %v9398_v10 = vld [vmem:[%s10151_s3 + $0x50] sm:$0xff] }
 0xdac   :  { %v7949_v40 = vpop.eup %7948 }
 0xdad   :  { %v3035_v18 = vrot.slane %v7949_v40, 6  ;;  %v9405_v40 = vld [vmem:[%s10151_s3 + $0x58] sm:$0xff] }
 0xdaf   :  { %v3037_v32 = vmul.f32 %v3035_v18, %v3030_v41  ;;  %v9419_v41 = vld [vmem:[%s10151_s3 + $0x68] sm:$0xff]  ;;  %v9426_v18 = vld [vmem:[%s10151_s3 + $0x70] sm:$0xff] }
 0xdb1   :  { %v3039_v9 = vrot.slane %v3037_v32, 2  ;;  %v9433_v32 = vld [vmem:[%s10151_s3 + $0x78] sm:$0xff] }
 0xdb3   :  { %6843 = vmatprep.subr.msk.mxu0 %vm171_vm1, %v3039_v9 }
 0xdb4   :  { %6844 = vmatpush3.msk.msra.mxu0 %vm171_vm1, %v3039_v9 }
 0xdb5   :  { %6846 = vmatmul.mubr.msk.f32.vlgmr.msra.gmra.mrb[90].mxu0 %vm138_vm0, %v9334_v21  ;;  %7684 = vmatprep.subr.bf16.mxu0 %v10400_v13 }
 0xdb6   :  { %6848 = vmatprep.mubr.msk.f32.mxu0 %vm138_vm0, %v9342_v37 }
 0xdb9   :  { %6849 = vmatmul.mubr.msk.f32.gmra.mrb[92].mxu0 %vm138_vm0, %v9349_v35 }
 0xdba   :  { %6851 = vmatprep.mubr.msk.f32.mxu0 %vm138_vm0, %v9356_v4 }
 0xdbd   :  { %6852 = vmatmul.mubr.msk.f32.gmra.mrb[94].mxu0 %vm138_vm0, %v9363_v26 }
 0xdbe   :  { %6854 = vmatprep.mubr.msk.f32.mxu0 %vm138_vm0, %v9370_v22 }
 0xdc1   :  { %6855 = vmatmul.mubr.msk.f32.gmra.mrb[96].mxu0 %vm138_vm0, %v9377_v45 }
 0xdc2   :  { %6857 = vmatprep.mubr.msk.f32.mxu0 %vm138_vm0, %v9384_v48 }
 0xdc5   :  { %6858 = vmatmul.mubr.msk.f32.gmra.mrb[98].mxu0 %vm138_vm0, %v9391_v47 }
 0xdc6   :  { %6860 = vmatprep.mubr.msk.f32.mxu0 %vm138_vm0, %v9398_v10 }
 0xdc9   :  { %6861 = vmatmul.mubr.msk.f32.gmra.mrb[100].mxu0 %vm138_vm0, %v9405_v40 }
 0xdca   :  { %6863 = vmatprep.mubr.msk.f32.mxu0 %vm138_vm0, %v9412_v51 }
 0xdcd   :  { %6864 = vmatmul.mubr.msk.f32.gmra.mrb[102].mxu0 %vm138_vm0, %v9419_v41 }
 0xdce   :  { %6866 = vmatprep.mubr.msk.f32.mxu0 %vm138_vm0, %v9426_v18 }
 0xdd1   :  { %6867 = vmatmul.mubr.msk.f32.gmra.mrb[104].mxu0 %vm138_vm0, %v9433_v32 }
 0xdd2   :  { %6957 = vmatprep.mubr.msk.f32.mxu0 %vm8139_vm4, %v10411_v61 }
 0xe88   :  { %v6847_v9 = vpop.f32.mrb[90].mxu0 }
 0xe89   :  { %v3114_v23 = vadd.f32 %v6847_v9, %v8814_v5  ;;  %v3108_v20 = vpop.f32.mrb[91].mxu0 }
 0xe8a   :  { %v3109_v63 = vadd.f32 %v3108_v20, %v8812_v3 }
 0xe8b   :  { %vm3188_vm11 = vcmp.gt.f32.partialorder %v3114_v23, 0.0  ;;  %v3204_v60 = vmul.f32 0.01, %v3114_v23 }
 0xe8c   :  { %vm3187_vm12 = vcmp.gt.f32.partialorder %v3109_v63, 0.0  ;;  %v3203_v17 = vmul.f32 0.01, %v3109_v63  ;;  %v6850_v19 = vpop.f32.mrb[92].mxu0 }
 0xe8d   :  { %v3124_v44 = vadd.f32 %v6850_v19, %v8818_v7  ;;  %v3118_v2 = vpop.f32.mrb[93].mxu0  ;;  %v3220_v29 = vsel %vm3188_vm11, %v3114_v23, %v3204_v60 }
 0xe8e   :  { %v3119_v28 = vadd.f32 %v3118_v2, %v10473_v54  ;;  %v3219_v43 = vsel %vm3187_vm12, %v3109_v63, %v3203_v17  ;;  %v10476_v63 = vld [vmem:[#allocation71_spill] sm:$0xff] }
 0xe8f   :  { %vm3190_vm13 = vcmp.gt.f32.partialorder %v3124_v44, 0.0  ;;  %v3206_v27 = vmul.f32 0.01, %v3124_v44  ;;  %v7652_v62 = vpack.c.bf16 %v3220_v29, %v3219_v43 }
 0xe90   :  { %vm3189_vm14 = vcmp.gt.f32.partialorder %v3119_v28, 0.0  ;;  %v3205_v9 = vmul.f32 0.01, %v3119_v28  ;;  %v6853_v55 = vpop.f32.mrb[94].mxu0 }
 0xe91   :  { %v3134_v20 = vadd.f32 %v6853_v55, %v10474_v57  ;;  %v3128_v15 = vpop.f32.mrb[95].mxu0  ;;  %7653 = vmatprep.subr.bf16.mxu1 %v7652_v62  ;;  %v3222_v31 = vsel %vm3190_vm13, %v3124_v44, %v3206_v27  ;;  %v10478_v44 = vld [vmem:[#allocation73_spill] sm:$0xff] }
 0xe92   :  { %v3129_v16 = vadd.f32 %v3128_v15, %v10475_v30  ;;  %7655 = vmatpush3.bf16.msra.mxu1 %v7652_v62  ;;  %v3221_v19 = vsel %vm3189_vm14, %v3119_v28, %v3205_v9 }
 0xe93   :  { %vm3192_vm15 = vcmp.gt.f32.partialorder %v3134_v20, 0.0  ;;  %v3208_v23 = vmul.f32 0.01, %v3134_v20  ;;  %v7656_v60 = vpack.c.bf16 %v3222_v31, %v3221_v19 }
 0xe94   :  { %vm3191_vm2 = vcmp.gt.f32.partialorder %v3129_v16, 0.0  ;;  %v3207_v2 = vmul.f32 0.01, %v3129_v16  ;;  %v6856_v17 = vpop.f32.mrb[96].mxu0 }
 0xe95   :  { %v3144_v43 = vadd.f32 %v6856_v17, %v10476_v63  ;;  %v3138_v29 = vpop.f32.mrb[97].mxu0  ;;  %7657 = vmatprep.subr.bf16.mxu1 %v7656_v60  ;;  %v3224_v39 = vsel %vm3192_vm15, %v3134_v20, %v3208_v23 }
 0xe96   :  { %v3139_v55 = vadd.f32 %v3138_v29, %v10477_v12  ;;  %7659 = vmatpush3.bf16.msra.mxu1 %v7656_v60  ;;  %v3223_v59 = vsel %vm3191_vm2, %v3129_v16, %v3207_v2  ;;  %v10480_v2 = vld [vmem:[#allocation75_spill] sm:$0xff] }
 0xe97   :  { %vm3194_vm3 = vcmp.gt.f32.partialorder %v3144_v43, 0.0  ;;  %v3210_v27 = vmul.f32 0.01, %v3144_v43  ;;  %v7660_v15 = vpack.c.bf16 %v3224_v39, %v3223_v59 }
 0xe98   :  { %vm3193_vm6 = vcmp.gt.f32.partialorder %v3139_v55, 0.0  ;;  %v3209_v62 = vmul.f32 0.01, %v3139_v55  ;;  %v6859_v28 = vpop.f32.mrb[98].mxu0 }
 0xe99   :  { %v3154_v31 = vadd.f32 %v6859_v28, %v10478_v44  ;;  %v3148_v9 = vpop.f32.mrb[99].mxu0  ;;  %7661 = vmatprep.subr.bf16.mxu1 %v7660_v15  ;;  %v3226_v19 = vsel %vm3194_vm3, %v3144_v43, %v3210_v27 }
 0xe9a   :  { %v3149_v17 = vadd.f32 %v3148_v9, %v10479_v8  ;;  %7663 = vmatpush3.bf16.msra.mxu1 %v7660_v15  ;;  %v3225_v33 = vsel %vm3193_vm6, %v3139_v55, %v3209_v62  ;;  %v10482_v62 = vld [vmem:[#allocation77_spill] sm:$0xff] }
 0xe9b   :  { %vm3196_vm7 = vcmp.gt.f32.partialorder %v3154_v31, 0.0  ;;  %v3212_v20 = vmul.f32 0.01, %v3154_v31  ;;  %v7664_v23 = vpack.c.bf16 %v3226_v19, %v3225_v33 }
 0xe9c   :  { %vm3195_vm8 = vcmp.gt.f32.partialorder %v3149_v17, 0.0  ;;  %v3211_v16 = vmul.f32 0.01, %v3149_v17  ;;  %v6862_v60 = vpop.f32.mrb[100].mxu0 }
 0xe9d   :  { %v3164_v39 = vadd.f32 %v6862_v60, %v10480_v2  ;;  %v3158_v59 = vpop.f32.mrb[101].mxu0  ;;  %7665 = vmatprep.subr.bf16.mxu1 %v7664_v23  ;;  %v3228_v29 = vsel %vm3196_vm7, %v3154_v31, %v3212_v20  ;;  %v10506_v2 = vld [vmem:[#allocation85_spill] sm:$0xff] }
 0xe9e   :  { %v3159_v28 = vadd.f32 %v3158_v59, %v10481_v58  ;;  %7667 = vmatpush3.bf16.msra.mxu1 %v7664_v23  ;;  %v3227_v56 = vsel %vm3195_vm8, %v3149_v17, %v3211_v16  ;;  %v10484_v16 = vld [vmem:[#allocation79_spill] sm:$0xff] }
 0xe9f   :  { %vm3198_vm9 = vcmp.gt.f32.partialorder %v3164_v39, 0.0  ;;  %v3214_v43 = vmul.f32 0.01, %v3164_v39  ;;  %v7668_v27 = vpack.c.bf16 %v3228_v29, %v3227_v56 }
 0xea0   :  { %vm3197_vm10 = vcmp.gt.f32.partialorder %v3159_v28, 0.0  ;;  %v3213_v55 = vmul.f32 0.01, %v3159_v28  ;;  %v6865_v15 = vpop.f32.mrb[102].mxu0 }
 0xea1   :  { %v3174_v33 = vadd.f32 %v6865_v15, %v10482_v62  ;;  %v3168_v9 = vpop.f32.mrb[103].mxu0  ;;  %7669 = vmatprep.subr.bf16.mxu1 %v7668_v27  ;;  %v3230_v19 = vsel %vm3198_vm9, %v3164_v39, %v3214_v43 }
 0xea2   :  { %v3169_v60 = vadd.f32 %v3168_v9, %v10483_v34  ;;  %7671 = vmatpush3.bf16.msra.mxu1 %v7668_v27  ;;  %v3229_v38 = vsel %vm3197_vm10, %v3159_v28, %v3213_v55  ;;  %v9470_v9 = vld [vmem:[%s10152_s4 + $0x18] sm:$0xff] }
 0xea3   :  { %vm3200_vm11 = vcmp.gt.f32.partialorder %v3174_v33, 0.0  ;;  %v3216_v31 = vmul.f32 0.01, %v3174_v33  ;;  %v7672_v20 = vpack.c.bf16 %v3230_v19, %v3229_v38  ;;  %10488 = vst [vmem:[#allocation70_spill] sm:$0xff] %v9470_v9  ;;  %v9476_v19 = vld [vmem:[%s10152_s4 + $0x20] sm:$0xff] }
 0xea4   :  { %vm3199_vm12 = vcmp.gt.f32.partialorder %v3169_v60, 0.0  ;;  %v3215_v17 = vmul.f32 0.01, %v3169_v60  ;;  %v6868_v23 = vpop.f32.mrb[104].mxu0  ;;  %10489 = vst [vmem:[#allocation71_spill] sm:$0xff] %v9476_v19 }
 0xea5   :  { %v3184_v56 = vadd.f32 %v6868_v23, %v10484_v16  ;;  %v3178_v59 = vpop.f32.mrb[105].mxu0  ;;  %7673 = vmatprep.subr.bf16.mxu1 %v7672_v20  ;;  %v3232_v29 = vsel %vm3200_vm11, %v3174_v33, %v3216_v31  ;;  %v9458_v33 = vld [vmem:[%s10152_s4 + $0x8] sm:$0xff]  ;;  %v9488_v31 = vld [vmem:[%s10152_s4 + $0x30] sm:$0xff] }
 0xea6   :  { %v3179_v15 = vadd.f32 %v3178_v59, %v10485_v11  ;;  %7675 = vmatpush3.bf16.msra.mxu1 %v7672_v20  ;;  %v3231_v50 = vsel %vm3199_vm12, %v3169_v60, %v3215_v17  ;;  %10486 = vst [vmem:[#allocation68_spill] sm:$0xff] %v9458_v33  ;;  %v9482_v60 = vld [vmem:[%s10152_s4 + $0x28] sm:$0xff]  ;;  %10491 = vst [vmem:[#allocation73_spill] sm:$0xff] %v9488_v31  ;;  %v9494_v20 = vld [vmem:[%s10152_s4 + $0x38] sm:$0xff] }
 0xea7   :  { %vm3202_vm13 = vcmp.gt.f32.partialorder %v3184_v56, 0.0  ;;  %v3218_v39 = vmul.f32 0.01, %v3184_v56  ;;  %v7676_v43 = vpack.c.bf16 %v3232_v29, %v3231_v50  ;;  %v9464_v50 = vld [vmem:[%s10152_s4 + $0x10] sm:$0xff]  ;;  %10490 = vst [vmem:[#allocation72_spill] sm:$0xff] %v9482_v60  ;;  %10492 = vst [vmem:[#allocation74_spill] sm:$0xff] %v9494_v20 }
 0xea8   :  { %vm3201_vm14 = vcmp.gt.f32.partialorder %v3179_v15, 0.0  ;;  %v3217_v28 = vmul.f32 0.01, %v3179_v15  ;;  %10487 = vst [vmem:[#allocation69_spill] sm:$0xff] %v9464_v50  ;;  %v9500_v17 = vld [vmem:[%s10152_s4 + $0x40] sm:$0xff]  ;;  %v9506_v23 = vld [vmem:[%s10152_s4 + $0x48] sm:$0xff] }
 0xea9   :  { %7677 = vmatprep.subr.bf16.mxu1 %v7676_v43  ;;  %v3234_v27 = vsel %vm3202_vm13, %v3184_v56, %v3218_v39  ;;  %10493 = vst [vmem:[#allocation97_spill] sm:$0xff] %v9500_v17  ;;  %10494 = vst [vmem:[#allocation98_spill] sm:$0xff] %v9506_v23  ;;  %v9512_v56 = vld [vmem:[%s10152_s4 + $0x50] sm:$0xff]  ;;  %v9518_v59 = vld [vmem:[%s10152_s4 + $0x58] sm:$0xff] }
 0xeaa   :  { %7679 = vmatpush3.bf16.msra.mxu1 %v7676_v43  ;;  %v3233_v38 = vsel %vm3201_vm14, %v3179_v15, %v3217_v28  ;;  %10495 = vst [vmem:[#allocation99_spill] sm:$0xff] %v9512_v56  ;;  %10496 = vst [vmem:[#allocation100_spill] sm:$0xff] %v9518_v59  ;;  %v9524_v29 = vld [vmem:[%s10152_s4 + $0x60] sm:$0xff]  ;;  %v9530_v15 = vld [vmem:[%s10152_s4 + $0x68] sm:$0xff] }
 0xeab   :  { %v7680_v55 = vpack.c.bf16 %v3234_v27, %v3233_v38  ;;  %10497 = vst [vmem:[#allocation101_spill] sm:$0xff] %v9524_v29  ;;  %10498 = vst [vmem:[#allocation102_spill] sm:$0xff] %v9530_v15  ;;  %v9536_v39 = vld [vmem:[%s10152_s4 + $0x70] sm:$0xff]  ;;  %v9542_v43 = vld [vmem:[%s10152_s4 + $0x78] sm:$0xff] }
 0xeac   :  { %10499 = vst [vmem:[#allocation103_spill] sm:$0xff] %v9536_v39  ;;  %10500 = vst [vmem:[#allocation104_spill] sm:$0xff] %v9542_v43  ;;  %v9548_v28 = vld [vmem:[%s10157_s7] sm:$0xff]  ;;  %v9554_v27 = vld [vmem:[%s10157_s7 + $0x10] sm:$0xff] }
 0xead   :  { %7681 = vmatprep.subr.bf16.mxu1 %v7680_v55  ;;  %3517 = vperm.xlu1 %7925, %v9548_v28   ;;  %v9560_v38 = vld [vmem:[%s10157_s7 + $0x8] sm:$0xff] }
 0xeae   :  { %7683 = vmatpush3.bf16.msra.mxu1 %v7680_v55  ;;  %3527 = vperm.xlu0 %7926, %v9554_v27   ;;  %v9566_v55 = vld [vmem:[%s10157_s7 + $0x28] sm:$0xff] }
 0xeb1   :  { %6902 = vmatmul.mubr.f32.vlgmr.msra.gmra.mrb[80].mxu1 %v9458_v33  ;;  %3522 = vperm.xlu1 %7925, %v9560_v38  }
 0xeb2   :  { %6904 = vmatprep.mubr.f32.mxu1 %v9464_v50  ;;  %3542 = vperm.xlu0 %7926, %v9566_v55  }
 0xeb5   :  { %6905 = vmatmul.mubr.f32.gmra.mrb[82].mxu1 %v9470_v9  ;;  %3532 = vperm.xlu1 %7925, %v9571_v42  }
 0xeb6   :  { %6907 = vmatprep.mubr.f32.mxu1 %v9476_v19  ;;  %3552 = vperm.xlu0 %7926, %v9578_v24  }
 0xeb9   :  { %6908 = vmatmul.mubr.f32.gmra.mrb[84].mxu1 %v9482_v60  ;;  %3537 = vperm.xlu1 %7925, %v9583_v14  }
 0xeba   :  { %6910 = vmatprep.mubr.f32.mxu1 %v9488_v31 }
 0xebd   :  { %6911 = vmatmul.mubr.f32.gmra.mrb[86].mxu1 %v9494_v20 }
 0xebe   :  { %6913 = vmatprep.mubr.f32.mxu1 %v9500_v17 }
 0xec1   :  { %6914 = vmatmul.mubr.f32.gmra.mrb[88].mxu1 %v9506_v23  ;;  %v10504_v23 = vld [vmem:[#allocation81_spill] sm:$0xff] }
 0xec2   :  { %6916 = vmatprep.mubr.f32.mxu1 %v9512_v56 }
 0xec5   :  { %6917 = vmatmul.mubr.f32.gmra.mrb[90].mxu1 %v9518_v59  ;;  %v10503_v59 = vld [vmem:[#allocation83_spill] sm:$0xff] }
 0xec6   :  { %6919 = vmatprep.mubr.f32.mxu1 %v9524_v29 }
 0xec9   :  { %6920 = vmatmul.mubr.f32.gmra.mrb[92].mxu1 %v9530_v15  ;;  %v10502_v15 = vmov 0  }
 0xeca   :  { %6922 = vmatprep.mubr.f32.mxu1 %v9536_v39  ;;  %v10501_v39 = vmov 3  }
 0xecb   :  { %7928 = vset.pattern.permute.xlu0 %v10501_v39 }
 0xecc   :  { %3716 = vperm.xlu0 %7928, %v9560_v38  }
 0xecd   :  { %6923 = vmatmul.mubr.f32.gmra.mrb[94].mxu1 %v9542_v43  ;;  %v9590_v43 = vld [vmem:[%s10157_s7 + $0x30] sm:$0xff] }
 0xece   :  { %3547 = vperm.xlu1 %7925, %v9590_v43  }
 0xed0   :  { %3728 = vperm.xlu0 %7928, %v9583_v14  }
 0xed2   :  { %7927 = vset.pattern.permute.xlu1 %v10501_v39 }
 0xed3   :  { %3712 = vperm.xlu1 %7927, %v9548_v28  }
 0xed4   :  { %3736 = vperm.xlu0 %7928, %v9590_v43  }
 0xed7   :  { %3720 = vperm.xlu1 %7927, %v9554_v27  }
 0xed8   :  { %7929 = vset.pattern.permute.xlu0 %v10502_v15 }
 0xedb   :  { %3724 = vperm.xlu1 %7927, %v9571_v42  }
 0xedf   :  { %3732 = vperm.xlu1 %7927, %v9566_v55  }
 0xee3   :  { %3740 = vperm.xlu1 %7927, %v9578_v24  }
 0xf84   :  { %v6903_v29 = vpop.f32.mrb[80].mxu1 }
 0xf85   :  { %v3307_v56 = vadd.f32 %v6903_v29, %v10503_v59  ;;  %v3301_v39 = vpop.f32.mrb[81].mxu1 }
 0xf86   :  { %v3302_v17 = vadd.f32 %v3301_v39, %v10504_v23  ;;  %v10505_v39 = vld [vmem:[#allocation84_spill] sm:$0xff] }
 0xf87   :  { %vm3381_vm15 = vcmp.gt.f32.partialorder %v3307_v56, 0.0  ;;  %v3397_v20 = vmul.f32 0.01, %v3307_v56 }
 0xf88   :  { %vm3380_vm2 = vcmp.gt.f32.partialorder %v3302_v17, 0.0  ;;  %v3396_v31 = vmul.f32 0.01, %v3302_v17  ;;  %v6906_v60 = vpop.f32.mrb[82].mxu1 }
 0xf89   :  { %v3413_v19 = vsel %vm3381_vm15, %v3307_v56, %v3397_v20  ;;  %v3317_v15 = vadd.f32 %v6906_v60, %v8916_v6  ;;  %v3311_v9 = vpop.f32.mrb[83].mxu1 }
 0xf8a   :  { %v3412_v50 = vsel %vm3380_vm2, %v3302_v17, %v3396_v31  ;;  %v3312_v33 = vadd.f32 %v3311_v9, %v8914_v36  ;;  %v10507_v17 = vld [vmem:[#allocation86_spill] sm:$0xff] }
 0xf8b   :  { %v7685_v11 = vpack.c.bf16 %v3413_v19, %v3412_v50  ;;  %vm3383_vm3 = vcmp.gt.f32.partialorder %v3317_v15, 0.0  ;;  %v3399_v16 = vmul.f32 0.01, %v3317_v15 }
 0xf8c   :  { %vm3382_vm6 = vcmp.gt.f32.partialorder %v3312_v33, 0.0  ;;  %v3398_v29 = vmul.f32 0.01, %v3312_v33  ;;  %v6909_v59 = vpop.f32.mrb[84].mxu1 }
 0xf8d   :  { %v3415_v34 = vsel %vm3383_vm3, %v3317_v15, %v3399_v16  ;;  %v3327_v23 = vadd.f32 %v6909_v59, %v10505_v39  ;;  %v3321_v62 = vpop.f32.mrb[85].mxu1  ;;  %7686 = vmatpush3.bf16.msra.mxu0 %v7685_v11  ;;  %v10508_v59 = vld [vmem:[#allocation87_spill] sm:$0xff] }
 0xf8e   :  { %v3414_v58 = vsel %vm3382_vm6, %v3312_v33, %v3398_v29  ;;  %v3322_v20 = vadd.f32 %v3321_v62, %v10506_v2  ;;  %7687 = vmatprep.subr.bf16.mxu0 %v10400_v13 }
 0xf8f   :  { %v7688_v60 = vpack.c.bf16 %v3415_v34, %v3414_v58  ;;  %vm3385_vm7 = vcmp.gt.f32.partialorder %v3327_v23, 0.0  ;;  %v3401_v31 = vmul.f32 0.01, %v3327_v23 }
 0xf90   :  { %vm3384_vm8 = vcmp.gt.f32.partialorder %v3322_v20, 0.0  ;;  %v3400_v50 = vmul.f32 0.01, %v3322_v20  ;;  %v6912_v9 = vpop.f32.mrb[86].mxu1 }
 0xf91   :  { %v3417_v19 = vsel %vm3385_vm7, %v3327_v23, %v3401_v31  ;;  %v3337_v56 = vadd.f32 %v6912_v9, %v10507_v17  ;;  %v3331_v36 = vpop.f32.mrb[87].mxu1  ;;  %7689 = vmatpush3.bf16.msra.mxu0 %v7688_v60  ;;  %vm3743_vm7 = vcmask 523264  }
 0xf92   :  { %v3416_v16 = vsel %vm3384_vm8, %v3322_v20, %v3400_v50  ;;  %v3332_v15 = vadd.f32 %v3331_v36, %v10508_v59  ;;  %7690 = vmatprep.subr.bf16.mxu0 %v10400_v13 }
 0xf93   :  { %v7691_v11 = vpack.c.bf16 %v3417_v19, %v3416_v16  ;;  %vm3387_vm9 = vcmp.gt.f32.partialorder %v3337_v56, 0.0  ;;  %v3403_v62 = vmul.f32 0.01, %v3337_v56 }
 0xf94   :  { %vm3386_vm10 = vcmp.gt.f32.partialorder %v3332_v15, 0.0  ;;  %v3402_v34 = vmul.f32 0.01, %v3332_v15  ;;  %v6915_v58 = vpop.f32.mrb[88].mxu1 }
 0xf95   :  { %v3419_v33 = vsel %vm3387_vm9, %v3337_v56, %v3403_v62  ;;  %v3347_v29 = vadd.f32 %v6915_v58, %v8933_v49  ;;  %v3341_v2 = vpop.f32.mrb[89].mxu1  ;;  %7692 = vmatpush3.bf16.msra.mxu0 %v7691_v11  ;;  %v10509_v62 = vld [vmem:[#allocation91_spill] sm:$0xff] }
 0xf96   :  { %v3418_v23 = vsel %vm3386_vm10, %v3332_v15, %v3402_v34  ;;  %v3342_v31 = vadd.f32 %v3341_v2, %v8937_v46  ;;  %7693 = vmatprep.subr.bf16.mxu0 %v10400_v13 }
 0xf97   :  { %v7694_v20 = vpack.c.bf16 %v3419_v33, %v3418_v23  ;;  %vm3389_vm11 = vcmp.gt.f32.partialorder %v3347_v29, 0.0  ;;  %v3405_v36 = vmul.f32 0.01, %v3347_v29  ;;  %v10510_v23 = vld [vmem:[#allocation92_spill] sm:$0xff] }
 0xf98   :  { %vm3388_vm12 = vcmp.gt.f32.partialorder %v3342_v31, 0.0  ;;  %v3404_v60 = vmul.f32 0.01, %v3342_v31  ;;  %v6918_v50 = vpop.f32.mrb[90].mxu1 }
 0xf99   :  { %v3421_v9 = vsel %vm3389_vm11, %v3347_v29, %v3405_v36  ;;  %v3357_v19 = vadd.f32 %v6918_v50, %v8942_v1  ;;  %v3351_v16 = vpop.f32.mrb[91].mxu1  ;;  %7695 = vmatpush3.bf16.msra.mxu0 %v7694_v20  ;;  %v10511_v36 = vld [vmem:[#allocation93_spill] sm:$0xff] }
 0xf9a   :  { %v3420_v56 = vsel %vm3388_vm12, %v3342_v31, %v3404_v60  ;;  %v3352_v58 = vadd.f32 %v3351_v16, %v10509_v62  ;;  %7696 = vmatprep.subr.bf16.mxu0 %v10400_v13 }
 0xf9b   :  { %v7697_v15 = vpack.c.bf16 %v3421_v9, %v3420_v56  ;;  %vm3391_vm13 = vcmp.gt.f32.partialorder %v3357_v19, 0.0  ;;  %v3407_v2 = vmul.f32 0.01, %v3357_v19  ;;  %v10512_v56 = vld [vmem:[#allocation94_spill] sm:$0xff] }
 0xf9c   :  { %vm3390_vm14 = vcmp.gt.f32.partialorder %v3352_v58, 0.0  ;;  %v3406_v11 = vmul.f32 0.01, %v3352_v58  ;;  %v6921_v34 = vpop.f32.mrb[92].mxu1 }
 0xf9d   :  { %v3423_v33 = vsel %vm3391_vm13, %v3357_v19, %v3407_v2  ;;  %v3367_v46 = vadd.f32 %v6921_v34, %v10510_v23  ;;  %v3361_v49 = vpop.f32.mrb[93].mxu1  ;;  %7698 = vmatpush3.bf16.msra.mxu0 %v7697_v15  ;;  %v10513_v2 = vld [vmem:[#allocation95_spill] sm:$0xff] }
 0xf9e   :  { %v3422_v29 = vsel %vm3390_vm14, %v3352_v58, %v3406_v11  ;;  %v3362_v50 = vadd.f32 %v3361_v49, %v10511_v36  ;;  %7699 = vmatprep.subr.bf16.mxu0 %v10400_v13 }
 0xf9f   :  { %v7700_v31 = vpack.c.bf16 %v3423_v33, %v3422_v29  ;;  %vm3393_vm15 = vcmp.gt.f32.partialorder %v3367_v46, 0.0  ;;  %v3409_v20 = vmul.f32 0.01, %v3367_v46 }
 0xfa0   :  { %vm3392_vm2 = vcmp.gt.f32.partialorder %v3362_v50, 0.0  ;;  %v3408_v60 = vmul.f32 0.01, %v3362_v50  ;;  %v6924_v9 = vpop.f32.mrb[94].mxu1 }
 0xfa1   :  { %v3425_v16 = vsel %vm3393_vm15, %v3367_v46, %v3409_v20  ;;  %v3377_v62 = vadd.f32 %v6924_v9, %v10512_v56  ;;  %v3371_v1 = vpop.f32.mrb[95].mxu1  ;;  %7701 = vmatpush3.bf16.msra.mxu0 %v7700_v31 }
 0xfa2   :  { %v3424_v19 = vsel %vm3392_vm2, %v3362_v50, %v3408_v60  ;;  %v3372_v34 = vadd.f32 %v3371_v1, %v10513_v2  ;;  %7702 = vmatprep.subr.bf16.mxu0 %v10400_v13  ;;  %v9632_v1 = vld [vmem:[%s10154_s5] sm:$0xf] }
 0xfa3   :  { %v7703_v58 = vpack.c.bf16 %v3425_v16, %v3424_v19  ;;  %vm3395_vm3 = vcmp.gt.f32.partialorder %v3377_v62, 0.0  ;;  %v3411_v49 = vmul.f32 0.01, %v3377_v62  ;;  %10514 = vst [vmem:[#allocation84_spill] sm:$0xff] %v9632_v1 }
 0xfa4   :  { %vm3394_vm6 = vcmp.gt.f32.partialorder %v3372_v34, 0.0  ;;  %v3410_v15 = vmul.f32 0.01, %v3372_v34 }
 0xfa5   :  { %v3427_v11 = vsel %vm3395_vm3, %v3377_v62, %v3411_v49  ;;  %7704 = vmatpush3.bf16.msra.mxu0 %v7703_v58  ;;  %v3528_v62 = vpop.permute.xlu0 %3527 }
 0xfa6   :  { %v3426_v33 = vsel %vm3394_vm6, %v3372_v34, %v3410_v15  ;;  %7705 = vmatprep.subr.bf16.mxu0 %v10400_v13 }
 0xfa7   :  { %v7706_v46 = vpack.c.bf16 %v3427_v11, %v3426_v33 }
 0xfa9   :  { %7707 = vmatpush3.bf16.msra.mxu0 %v7706_v46  ;;  %v3543_v49 = vpop.permute.xlu0 %3542 }
 0xfaa   :  { %6960 = vmatprep.subr.msk.mxu0 %vm171_vm1, %v9065_v53 }
 0xfac   :  { %6958 = vmatmul.mubr.f32.vlgmr.msra.gmra.mrb[106].mxu0 %v9632_v1 }
 0xfad   :  { %6961 = vmatpush3.msk.msra.mxu0 %vm171_vm1, %v9065_v53  ;;  %6962 = vmatprep.mubr.msk.f32.mxu0 %vm138_vm0, %v9548_v28  ;;  %v3703_v28 = vld [vmem:[%s10158_s8] sm:$0xff] }
 0xfae   :  { %7724 = vmatprep.subr.bf16.mxu0 %v10400_v13  ;;  %6990 = vmatprep.mubr.msk.f32.mxu1 %vm3743_vm7, %v3703_v28 }
 0xfb0   :  { %6963 = vmatmul.mubr.msk.f32.vlgmr.msra.gmra.mrb[108].mxu0 %vm138_vm0, %v9560_v38  ;;  %v10515_v38 = vld [vmem:[#allocation96_spill] sm:$0xff] }
 0xfb1   :  { %6965 = vmatprep.mubr.msk.f32.mxu0 %vm138_vm0, %v9554_v27 }
 0xfb4   :  { %6966 = vmatmul.mubr.msk.f32.gmra.mrb[110].mxu0 %vm138_vm0, %v9571_v42 }
 0xfb5   :  { %6968 = vmatprep.mubr.msk.f32.mxu0 %vm138_vm0, %v9583_v14  ;;  %v3518_v14 = vpop.permute.xlu1 %3517 }
 0xfb8   :  { %6969 = vmatmul.mubr.msk.f32.gmra.mrb[112].mxu0 %vm138_vm0, %v9566_v55 }
 0xfb9   :  { %6971 = vmatprep.mubr.msk.f32.mxu0 %vm138_vm0, %v9590_v43  ;;  %v3523_v42 = vpop.permute.xlu1 %3522 }
 0xfbc   :  { %6972 = vmatmul.mubr.msk.f32.gmra.mrb[114].mxu0 %vm138_vm0, %v9578_v24 }
 0xfbd   :  { %7018 = vmatprep.mubr.msk.f32.mxu0 %vm8139_vm4, %v10411_v61  ;;  %v3533_v29 = vpop.permute.xlu1 %3532 }
 0xfc1   :  { %v3538_v33 = vpop.permute.xlu1 %3537 }
0x107f   :  { %v3494_v27 = vpop.f32.mrb[106].mxu0 }
0x1080   :  { %v9661_v55 = vadd.f32 %v3494_v27, %v10515_v38  ;;  %v6959_v43 = vpop.f32.mrb[107].mxu0 }
0x1082   :  { %7950 = vtanh.f32 %v9661_v55 }
0x1083   :  { %v6964_v24 = vpop.f32.mrb[108].mxu0 }
0x1084   :  { %v3646_v50 = vadd.f32 %v6964_v24, %v3523_v42  ;;  %v3640_v31 = vpop.f32.mrb[109].mxu0 }
0x1085   :  { %v3641_v20 = vadd.f32 %v3640_v31, %v3518_v14 }
0x1086   :  { %vm3680_vm8 = vcmp.gt.f32.partialorder %v3646_v50, 0.0  ;;  %v3688_v60 = vmul.f32 0.01, %v3646_v50 }
0x1087   :  { %vm3679_vm9 = vcmp.gt.f32.partialorder %v3641_v20, 0.0  ;;  %v3687_v9 = vmul.f32 0.01, %v3641_v20  ;;  %v6967_v16 = vpop.f32.mrb[110].mxu0 }
0x1088   :  { %v3656_v19 = vadd.f32 %v6967_v16, %v3533_v29  ;;  %v3650_v34 = vpop.f32.mrb[111].mxu0  ;;  %v3696_v58 = vsel %vm3680_vm8, %v3646_v50, %v3688_v60  ;;  %v3553_v60 = vpop.permute.xlu0 %3552 }
0x1089   :  { %v3651_v15 = vadd.f32 %v3650_v34, %v3528_v62  ;;  %v3695_v11 = vsel %vm3679_vm9, %v3641_v20, %v3687_v9  ;;  %v3548_v34 = vpop.permute.xlu1 %3547 }
0x108a   :  { %vm3682_vm10 = vcmp.gt.f32.partialorder %v3656_v19, 0.0  ;;  %v3690_v46 = vmul.f32 0.01, %v3656_v19  ;;  %v7708_v28 = vpack.c.bf16 %v3696_v58, %v3695_v11 }
0x108b   :  { %vm3681_vm11 = vcmp.gt.f32.partialorder %v3651_v15, 0.0  ;;  %v3689_v27 = vmul.f32 0.01, %v3651_v15  ;;  %v6970_v42 = vpop.f32.mrb[112].mxu0 }
0x108c   :  { %v7951_v43 = vpop.eup %7950  ;;  %v3666_v14 = vadd.f32 %v6970_v42, %v3543_v49  ;;  %v3660_v24 = vpop.f32.mrb[113].mxu0  ;;  %7709 = vmatprep.subr.bf16.mxu1 %v7708_v28  ;;  %v3698_v31 = vsel %vm3682_vm10, %v3656_v19, %v3690_v46 }
0x108d   :  { %v3503_v38 = vsub.f32 0.0, %v7951_v43  ;;  %v3661_v1 = vadd.f32 %v3660_v24, %v3538_v33  ;;  %7711 = vmatpush3.bf16.msra.mxu1 %v7708_v28  ;;  %v3697_v29 = vsel %vm3681_vm11, %v3651_v15, %v3689_v27  ;;  %v3500_v27 = vrot.slane %v9661_v55, 2  ;;  %v3705_v24 = vld [vmem:[%s10158_s8 + $0x10] sm:$0xff]  ;;  %v3706_v55 = vld [vmem:[%s10158_s8 + $0x18] sm:$0xff] }
0x108e   :  { %vm3684_vm12 = vcmp.gt.f32.partialorder %v3666_v14, 0.0  ;;  %v3692_v50 = vmul.f32 0.01, %v3666_v14  ;;  %v7712_v62 = vpack.c.bf16 %v3698_v31, %v3697_v29 }
0x108f   :  { %v3504_v20 = vmul.f32 1.442695, %v3503_v38  ;;  %vm3683_vm13 = vcmp.gt.f32.partialorder %v3661_v1, 0.0  ;;  %v3691_v9 = vmul.f32 0.01, %v3661_v1  ;;  %v6973_v16 = vpop.f32.mrb[114].mxu0 }
0x1090   :  { %v3676_v58 = vadd.f32 %v6973_v16, %v3553_v60  ;;  %v3670_v11 = vpop.f32.mrb[115].mxu0  ;;  %7713 = vmatprep.subr.bf16.mxu1 %v7712_v62  ;;  %v3700_v49 = vsel %vm3684_vm12, %v3666_v14, %v3692_v50  ;;  %v3704_v14 = vld [vmem:[%s10158_s8 + $0x8] sm:$0xff]  ;;  %v3898_v60 = vld [vmem:[%s10159_s10] sm:$0x3] }
0x1091   :  { %7952 = vpow2.f32 %v3504_v20  ;;  %v3671_v42 = vadd.f32 %v3670_v11, %v3548_v34  ;;  %7715 = vmatpush3.bf16.msra.mxu1 %v7712_v62  ;;  %v3699_v19 = vsel %vm3683_vm13, %v3661_v1, %v3691_v9  ;;  %v3502_v1 = vsub.f32 %v9156_v52, %v3500_v27  ;;  %v3707_v52 = vld [vmem:[%s10158_s8 + $0x20] sm:$0xff]  ;;  %v3708_v50 = vld [vmem:[%s10158_s8 + $0x28] sm:$0xff]  ;;  %v3709_v62 = vld [vmem:[%s10158_s8 + $0x30] sm:$0xff]  ;;  %3901 = vperm.xlu0 %7929, %v3898_v60   ;;  %v3713_v9 = vpop.permute.xlu1 %3712  ;;  %v3717_v11 = vpop.permute.xlu0 %3716 }
0x1092   :  { %vm3686_vm14 = vcmp.gt.f32.partialorder %v3676_v58, 0.0  ;;  %v3694_v33 = vmul.f32 0.01, %v3676_v58  ;;  %v7716_v15 = vpack.c.bf16 %v3700_v49, %v3699_v19  ;;  %v3710_v20 = vld [vmem:[%s10158_s8 + $0x38] sm:$0xff] }
0x1093   :  { %vm3685_vm15 = vcmp.gt.f32.partialorder %v3671_v42, 0.0  ;;  %v3693_v46 = vmul.f32 0.01, %v3671_v42 }
0x1094   :  { %7717 = vmatprep.subr.bf16.mxu1 %v7716_v15  ;;  %v3702_v38 = vsel %vm3686_vm14, %v3676_v58, %v3694_v33 }
0x1095   :  { %7719 = vmatpush3.bf16.msra.mxu1 %v7716_v15  ;;  %v3701_v28 = vsel %vm3685_vm15, %v3671_v42, %v3693_v46  ;;  %v3721_v16 = vpop.permute.xlu1 %3720 }
0x1096   :  { %v7720_v43 = vpack.c.bf16 %v3702_v38, %v3701_v28 }
0x1098   :  { %7721 = vmatprep.subr.bf16.mxu1 %v7720_v43 }
0x1099   :  { %7723 = vmatpush3.bf16.msra.mxu1 %v7720_v43  ;;  %v3725_v34 = vpop.permute.xlu1 %3724 }
0x109b   :  { %v7953_v31 = vpop.eup %7952 }
0x109c   :  { %v3506_v29 = vmul.f32 %v7953_v31, %v3502_v1  ;;  %6991 = vmatmul.mubr.msk.f32.vlgmr.msra.gmra.mrb[96].mxu1 %vm3743_vm7, %v3704_v14  ;;  %v3729_v31 = vpop.permute.xlu0 %3728 }
0x109d   :  { %6993 = vmatprep.mubr.msk.f32.mxu1 %vm3743_vm7, %v3705_v24  ;;  %v3733_v14 = vpop.permute.xlu1 %3732 }
0x109e   :  { %5385 = vst.msk [vmem:[%s10156_s11 + $0x6] sm:$0x3] %vm5381_vm5, %v3506_v29 }
0x10a0   :  { %6994 = vmatmul.mubr.msk.f32.gmra.mrb[98].mxu1 %vm3743_vm7, %v3706_v55 }
0x10a1   :  { %6996 = vmatprep.mubr.msk.f32.mxu1 %vm3743_vm7, %v3707_v52 }
0x10a4   :  { %6997 = vmatmul.mubr.msk.f32.gmra.mrb[100].mxu1 %vm3743_vm7, %v3708_v50 }
0x10a5   :  { %6999 = vmatprep.mubr.msk.f32.mxu1 %vm3743_vm7, %v3709_v62 }
0x10a8   :  { %7000 = vmatmul.mubr.msk.f32.gmra.mrb[102].mxu1 %vm3743_vm7, %v3710_v20 }
0x10a9   :  { %7079 = vmatprep.mubr.f32.mxu1 %v9289_v0 }
0x116f   :  { %v6992_v58 = vpop.f32.mrb[96].mxu1 }
0x1170   :  { %v3840_v49 = vadd.f32 %v6992_v58, %v3717_v11  ;;  %v3834_v42 = vpop.f32.mrb[97].mxu1  ;;  %v3741_v58 = vpop.permute.xlu1 %3740 }
0x1171   :  { %v3835_v19 = vadd.f32 %v3834_v42, %v3713_v9 }
0x1172   :  { %vm3874_vm2 = vcmp.gt.f32.partialorder %v3840_v49, 0.0  ;;  %v3882_v33 = vmul.f32 0.01, %v3840_v49 }
0x1173   :  { %vm3873_vm3 = vcmp.gt.f32.partialorder %v3835_v19, 0.0  ;;  %v3881_v15 = vmul.f32 0.01, %v3835_v19  ;;  %v6995_v46 = vpop.f32.mrb[98].mxu1 }
0x1174   :  { %v3890_v38 = vsel %vm3874_vm2, %v3840_v49, %v3882_v33  ;;  %v3850_v0 = vadd.f32 %v6995_v46, %v3725_v34  ;;  %v3844_v28 = vpop.f32.mrb[99].mxu1 }
0x1175   :  { %v3889_v27 = vsel %vm3873_vm3, %v3835_v19, %v3881_v15  ;;  %v3845_v43 = vadd.f32 %v3844_v28, %v3721_v16  ;;  %v3737_v19 = vpop.permute.xlu0 %3736 }
0x1176   :  { %v7725_v1 = vpack.c.bf16 %v3890_v38, %v3889_v27  ;;  %vm3876_vm6 = vcmp.gt.f32.partialorder %v3850_v0, 0.0  ;;  %v3884_v24 = vmul.f32 0.01, %v3850_v0 }
0x1177   :  { %vm3875_vm8 = vcmp.gt.f32.partialorder %v3845_v43, 0.0  ;;  %v3883_v29 = vmul.f32 0.01, %v3845_v43  ;;  %v6998_v55 = vpop.f32.mrb[100].mxu1 }
0x1178   :  { %v3892_v52 = vsel %vm3876_vm6, %v3850_v0, %v3884_v24  ;;  %v3860_v50 = vadd.f32 %v6998_v55, %v3733_v14  ;;  %v3854_v62 = vpop.f32.mrb[101].mxu1  ;;  %7726 = vmatpush3.bf16.msra.mxu0 %v7725_v1  ;;  %v3979_v1 = vld [vmem:[%s10160_s2] sm:$0x3] }
0x1179   :  { %v3891_v20 = vsel %vm3875_vm8, %v3845_v43, %v3883_v29  ;;  %v3855_v60 = vadd.f32 %v3854_v62, %v3729_v31  ;;  %7727 = vmatprep.subr.bf16.mxu0 %v10400_v13  ;;  %v3897_v24 = vld [vmem:[%s10161_s9] sm:$0x3] }
0x117a   :  { %v7728_v9 = vpack.c.bf16 %v3892_v52, %v3891_v20  ;;  %vm3878_vm9 = vcmp.gt.f32.partialorder %v3860_v50, 0.0  ;;  %v3886_v34 = vmul.f32 0.01, %v3860_v50 }
0x117b   :  { %vm3877_vm10 = vcmp.gt.f32.partialorder %v3855_v60, 0.0  ;;  %v3885_v16 = vmul.f32 0.01, %v3855_v60  ;;  %v7001_v11 = vpop.f32.mrb[102].mxu1 }
0x117c   :  { %v3894_v49 = vsel %vm3878_vm9, %v3860_v50, %v3886_v34  ;;  %v3870_v42 = vadd.f32 %v7001_v11, %v3741_v58  ;;  %v3864_v33 = vpop.f32.mrb[103].mxu1  ;;  %7729 = vmatpush3.bf16.msra.mxu0 %v7728_v9 }
0x117d   :  { %v3893_v15 = vsel %vm3877_vm10, %v3855_v60, %v3885_v16  ;;  %v3865_v46 = vadd.f32 %v3864_v33, %v3737_v19  ;;  %7730 = vmatprep.subr.bf16.mxu0 %v10400_v13 }
0x117e   :  { %v7731_v38 = vpack.c.bf16 %v3894_v49, %v3893_v15  ;;  %vm3880_vm11 = vcmp.gt.f32.partialorder %v3870_v42, 0.0  ;;  %v3888_v0 = vmul.f32 0.01, %v3870_v42 }
0x117f   :  { %vm3879_vm12 = vcmp.gt.f32.partialorder %v3865_v46, 0.0  ;;  %v3887_v28 = vmul.f32 0.01, %v3865_v46 }
0x1180   :  { %v3896_v27 = vsel %vm3880_vm11, %v3870_v42, %v3888_v0  ;;  %7732 = vmatpush3.bf16.msra.mxu0 %v7731_v38 }
0x1181   :  { %v3895_v43 = vsel %vm3879_vm12, %v3865_v46, %v3887_v28  ;;  %7733 = vmatprep.subr.bf16.mxu0 %v10400_v13 }
0x1182   :  { %v7734_v14 = vpack.c.bf16 %v3896_v27, %v3895_v43 }
0x1184   :  { %7735 = vmatpush3.bf16.msra.mxu0 %v7734_v14  ;;  %v10516_v14 = vld [vmem:[#allocation75_spill] sm:$0xff] }
0x1185   :  { %7021 = vmatprep.subr.msk.mxu0 %vm171_vm1, %v3979_v1 }
0x1187   :  { %7019 = vmatmul.mubr.msk.f32.vlgmr.msra.gmra.mrb[116].mxu0 %vm3743_vm7, %v3897_v24 }
0x1188   :  { %7022 = vmatpush3.msk.msra.mxu0 %vm171_vm1, %v3979_v1  ;;  %7023 = vmatprep.mubr.msk.f32.mxu0 %vm138_vm0, %v9321_v25  ;;  %v3902_v25 = vpop.permute.xlu0 %3901 }
0x1189   :  { %7768 = vmatprep.subr.bf16.mxu0 %v10400_v13 }
0x118b   :  { %7024 = vmatmul.mubr.msk.f32.vlgmr.msra.gmra.mrb[118].mxu0 %vm138_vm0, %v9334_v21 }
0x118c   :  { %7026 = vmatprep.mubr.msk.f32.mxu0 %vm138_vm0, %v9342_v37 }
0x118f   :  { %7027 = vmatmul.mubr.msk.f32.gmra.mrb[120].mxu0 %vm138_vm0, %v9349_v35 }
0x1190   :  { %7029 = vmatprep.mubr.msk.f32.mxu0 %vm138_vm0, %v9356_v4 }
0x1193   :  { %7030 = vmatmul.mubr.msk.f32.gmra.mrb[122].mxu0 %vm138_vm0, %v9363_v26 }
0x1194   :  { %7032 = vmatprep.mubr.msk.f32.mxu0 %vm138_vm0, %v9370_v22 }
0x1197   :  { %7033 = vmatmul.mubr.msk.f32.gmra.mrb[124].mxu0 %vm138_vm0, %v9377_v45 }
0x1198   :  { %7035 = vmatprep.mubr.msk.f32.mxu0 %vm138_vm0, %v9384_v48 }
0x119b   :  { %7036 = vmatmul.mubr.msk.f32.gmra.mrb[126].mxu0 %vm138_vm0, %v9391_v47 }
0x119c   :  { %7038 = vmatprep.mubr.msk.f32.mxu0 %vm138_vm0, %v9398_v10 }
0x119f   :  { %7039 = vmatmul.mubr.msk.f32.gmra.mrb[128].mxu0 %vm138_vm0, %v9405_v40 }
0x11a0   :  { %7041 = vmatprep.mubr.msk.f32.mxu0 %vm138_vm0, %v9412_v51 }
0x11a3   :  { %7042 = vmatmul.mubr.msk.f32.gmra.mrb[130].mxu0 %vm138_vm0, %v9419_v41 }
0x11a4   :  { %7044 = vmatprep.mubr.msk.f32.mxu0 %vm138_vm0, %v9426_v18 }
0x11a7   :  { %7045 = vmatmul.mubr.msk.f32.gmra.mrb[132].mxu0 %vm138_vm0, %v9433_v32 }
0x11a8   :  { %7135 = vmatprep.mubr.msk.f32.mxu0 %vm8139_vm4, %v10411_v61 }
0x125a   :  { %v3973_v21 = vpop.f32.mrb[116].mxu0 }
0x125b   :  { %v3974_v37 = vadd.f32 %v3973_v21, %v3902_v25  ;;  %v7020_v35 = vpop.f32.mrb[117].mxu0  ;;  %v10517_v21 = vld [vmem:[#allocation76_spill] sm:$0xff] }
0x125d   :  { %v3977_v4 = vadd.f32 %v3974_v37, %v9065_v53 }
0x125e   :  { %v7025_v26 = vpop.f32.mrb[118].mxu0 }
0x125f   :  { %7954 = vtanh.f32 %v3977_v4  ;;  %v4055_v22 = vadd.f32 %v7025_v26, %v8814_v5  ;;  %v4049_v45 = vpop.f32.mrb[119].mxu0 }
0x1260   :  { %v4050_v48 = vadd.f32 %v4049_v45, %v8812_v3 }
0x1261   :  { %vm4129_vm7 = vcmp.gt.f32.partialorder %v4055_v22, 0.0  ;;  %v4145_v47 = vmul.f32 0.01, %v4055_v22 }
0x1262   :  { %vm4128_vm13 = vcmp.gt.f32.partialorder %v4050_v48, 0.0  ;;  %v4144_v10 = vmul.f32 0.01, %v4050_v48  ;;  %v7028_v40 = vpop.f32.mrb[120].mxu0 }
0x1263   :  { %v4065_v51 = vadd.f32 %v7028_v40, %v8818_v7  ;;  %v4059_v41 = vpop.f32.mrb[121].mxu0  ;;  %v4161_v18 = vsel %vm4129_vm7, %v4055_v22, %v4145_v47  ;;  %v10518_v22 = vld [vmem:[#allocation77_spill] sm:$0xff] }
0x1264   :  { %v4060_v32 = vadd.f32 %v4059_v41, %v10473_v54  ;;  %v4160_v31 = vsel %vm4128_vm13, %v4050_v48, %v4144_v10  ;;  %v10519_v10 = vld [vmem:[#allocation78_spill] sm:$0xff] }
0x1265   :  { %vm4131_vm14 = vcmp.gt.f32.partialorder %v4065_v51, 0.0  ;;  %v4147_v53 = vmul.f32 0.01, %v4065_v51  ;;  %v7736_v29 = vpack.c.bf16 %v4161_v18, %v4160_v31 }
0x1266   :  { %vm4130_vm15 = vcmp.gt.f32.partialorder %v4060_v32, 0.0  ;;  %v4146_v5 = vmul.f32 0.01, %v4060_v32  ;;  %v7031_v55 = vpop.f32.mrb[122].mxu0 }
0x1267   :  { %v4075_v3 = vadd.f32 %v7031_v55, %v10474_v57  ;;  %v4069_v52 = vpop.f32.mrb[123].mxu0  ;;  %7737 = vmatprep.subr.bf16.mxu1 %v7736_v29  ;;  %v4163_v50 = vsel %vm4131_vm14, %v4065_v51, %v4147_v53  ;;  %v10520_v53 = vld [vmem:[#allocation79_spill] sm:$0xff] }
0x1268   :  { %v4070_v62 = vadd.f32 %v4069_v52, %v10475_v30  ;;  %7739 = vmatpush3.bf16.msra.mxu1 %v7736_v29  ;;  %v4162_v7 = vsel %vm4130_vm15, %v4060_v32, %v4146_v5 }
0x1269   :  { %v9756_v20 = vpop.eup %7954  ;;  %vm4133_vm2 = vcmp.gt.f32.partialorder %v4075_v3, 0.0  ;;  %v4149_v54 = vmul.f32 0.01, %v4075_v3  ;;  %v7740_v60 = vpack.c.bf16 %v4163_v50, %v4162_v7 }
0x126a   :  { %5386 = vst.msk [vmem:[%s10156_s11 + $0x8] sm:$0x3] %vm5381_vm5, %v9756_v20  ;;  %vm4132_vm3 = vcmp.gt.f32.partialorder %v4070_v62, 0.0  ;;  %v4148_v57 = vmul.f32 0.01, %v4070_v62  ;;  %v7034_v9 = vpop.f32.mrb[124].mxu0 }
0x126b   :  { %v4085_v34 = vadd.f32 %v7034_v9, %v10476_v63  ;;  %v4079_v16 = vpop.f32.mrb[125].mxu0  ;;  %7741 = vmatprep.subr.bf16.mxu1 %v7740_v60  ;;  %v4165_v30 = vsel %vm4133_vm2, %v4075_v3, %v4149_v54  ;;  %v10521_v3 = vld [vmem:[#allocation80_spill] sm:$0xff] }
0x126c   :  { %v4080_v58 = vadd.f32 %v4079_v16, %v10477_v12  ;;  %7743 = vmatpush3.bf16.msra.mxu1 %v7740_v60  ;;  %v4164_v11 = vsel %vm4132_vm3, %v4070_v62, %v4148_v57  ;;  %v10523_v16 = vld [vmem:[#allocation69_spill] sm:$0xff] }
0x126d   :  { %vm4135_vm6 = vcmp.gt.f32.partialorder %v4085_v34, 0.0  ;;  %v4151_v49 = vmul.f32 0.01, %v4085_v34  ;;  %v7744_v42 = vpack.c.bf16 %v4165_v30, %v4164_v11  ;;  %v10524_v30 = vld [vmem:[#allocation70_spill] sm:$0xff]  ;;  %v10526_v11 = vld [vmem:[#allocation72_spill] sm:$0xff] }
0x126e   :  { %vm4134_vm8 = vcmp.gt.f32.partialorder %v4080_v58, 0.0  ;;  %v4150_v19 = vmul.f32 0.01, %v4080_v58  ;;  %v7037_v33 = vpop.f32.mrb[126].mxu0 }
0x126f   :  { %v4095_v15 = vadd.f32 %v7037_v33, %v10478_v44  ;;  %v4089_v46 = vpop.f32.mrb[127].mxu0  ;;  %7745 = vmatprep.subr.bf16.mxu1 %v7744_v42  ;;  %v4167_v38 = vsel %vm4135_vm6, %v4085_v34, %v4151_v49  ;;  %v10522_v34 = vld [vmem:[#allocation68_spill] sm:$0xff]  ;;  %v10527_v49 = vld [vmem:[#allocation73_spill] sm:$0xff]  ;;  %v10530_v33 = vld [vmem:[#allocation98_spill] sm:$0xff] }
0x1270   :  { %v4090_v63 = vadd.f32 %v4089_v46, %v10479_v8  ;;  %7747 = vmatpush3.bf16.msra.mxu1 %v7744_v42  ;;  %v4166_v0 = vsel %vm4134_vm8, %v4080_v58, %v4150_v19  ;;  %v10525_v58 = vld [vmem:[#allocation71_spill] sm:$0xff]  ;;  %v10528_v42 = vld [vmem:[#allocation74_spill] sm:$0xff]  ;;  %v10529_v19 = vld [vmem:[#allocation97_spill] sm:$0xff] }
0x1271   :  { %vm4137_vm9 = vcmp.gt.f32.partialorder %v4095_v15, 0.0  ;;  %v4153_v28 = vmul.f32 0.01, %v4095_v15  ;;  %v7748_v12 = vpack.c.bf16 %v4167_v38, %v4166_v0  ;;  %v10532_v46 = vld [vmem:[#allocation100_spill] sm:$0xff]  ;;  %v10533_v38 = vld [vmem:[#allocation101_spill] sm:$0xff]  ;;  %v10535_v0 = vld [vmem:[#allocation103_spill] sm:$0xff] }
0x1272   :  { %vm4136_vm10 = vcmp.gt.f32.partialorder %v4090_v63, 0.0  ;;  %v4152_v27 = vmul.f32 0.01, %v4090_v63  ;;  %v7040_v43 = vpop.f32.mrb[128].mxu0 }
0x1273   :  { %v4105_v1 = vadd.f32 %v7040_v43, %v10516_v14  ;;  %v4099_v24 = vpop.f32.mrb[129].mxu0  ;;  %7749 = vmatprep.subr.bf16.mxu1 %v7748_v12  ;;  %v4169_v25 = vsel %vm4137_vm9, %v4095_v15, %v4153_v28  ;;  %v10531_v15 = vld [vmem:[#allocation99_spill] sm:$0xff]  ;;  %v10536_v28 = vld [vmem:[#allocation104_spill] sm:$0xff] }
0x1274   :  { %v4100_v44 = vadd.f32 %v4099_v24, %v10517_v21  ;;  %7751 = vmatpush3.bf16.msra.mxu1 %v7748_v12  ;;  %v4168_v37 = vsel %vm4136_vm10, %v4090_v63, %v4152_v27  ;;  %v10534_v63 = vld [vmem:[#allocation102_spill] sm:$0xff]  ;;  %v10537_v43 = vld [vmem:[#allocation83_spill] sm:$0xff]  ;;  %v10538_v24 = vld [vmem:[#allocation81_spill] sm:$0xff] }
0x1275   :  { %vm4139_vm11 = vcmp.gt.f32.partialorder %v4105_v1, 0.0  ;;  %v4155_v35 = vmul.f32 0.01, %v4105_v1  ;;  %v7752_v8 = vpack.c.bf16 %v4169_v25, %v4168_v37  ;;  %v8069_v12 = vld [vmem:[%s10152_s4 + $0x80] sm:$0xff] }
0x1276   :  { %vm4138_vm12 = vcmp.gt.f32.partialorder %v4100_v44, 0.0  ;;  %v4154_v4 = vmul.f32 0.01, %v4100_v44  ;;  %v7043_v26 = vpop.f32.mrb[130].mxu0 }
0x1277   :  { %v4115_v45 = vadd.f32 %v7043_v26, %v10518_v22  ;;  %v4109_v48 = vpop.f32.mrb[131].mxu0  ;;  %7753 = vmatprep.subr.bf16.mxu1 %v7752_v8  ;;  %v4171_v47 = vsel %vm4139_vm11, %v4105_v1, %v4155_v35  ;;  %v10539_v22 = vld [vmem:[#allocation82_spill] sm:$0xff] }
0x1278   :  { %v4110_v40 = vadd.f32 %v4109_v48, %v10519_v10  ;;  %7755 = vmatpush3.bf16.msra.mxu1 %v7752_v8  ;;  %v4170_v51 = vsel %vm4138_vm12, %v4100_v44, %v4154_v4 }
0x1279   :  { %vm4141_vm7 = vcmp.gt.f32.partialorder %v4115_v45, 0.0  ;;  %v4157_v41 = vmul.f32 0.01, %v4115_v45  ;;  %v7756_v18 = vpack.c.bf16 %v4171_v47, %v4170_v51 }
0x127a   :  { %vm4140_vm13 = vcmp.gt.f32.partialorder %v4110_v40, 0.0  ;;  %v4156_v32 = vmul.f32 0.01, %v4110_v40  ;;  %v7046_v31 = vpop.f32.mrb[132].mxu0 }
0x127b   :  { %v4125_v29 = vadd.f32 %v7046_v31, %v10520_v53  ;;  %v4119_v5 = vpop.f32.mrb[133].mxu0  ;;  %7757 = vmatprep.subr.bf16.mxu1 %v7756_v18  ;;  %v4173_v55 = vsel %vm4141_vm7, %v4115_v45, %v4157_v41  ;;  %v10540_v31 = vld [vmem:[#allocation85_spill] sm:$0xff] }
0x127c   :  { %v4120_v52 = vadd.f32 %v4119_v5, %v10521_v3  ;;  %7759 = vmatpush3.bf16.msra.mxu1 %v7756_v18  ;;  %v4172_v50 = vsel %vm4140_vm13, %v4110_v40, %v4156_v32 }
0x127d   :  { %vm4143_vm14 = vcmp.gt.f32.partialorder %v4125_v29, 0.0  ;;  %v4159_v62 = vmul.f32 0.01, %v4125_v29  ;;  %v7760_v7 = vpack.c.bf16 %v4173_v55, %v4172_v50 }
0x127e   :  { %vm4142_vm15 = vcmp.gt.f32.partialorder %v4120_v52, 0.0  ;;  %v4158_v54 = vmul.f32 0.01, %v4120_v52 }
0x127f   :  { %7761 = vmatprep.subr.bf16.mxu1 %v7760_v7  ;;  %v4175_v60 = vsel %vm4143_vm14, %v4125_v29, %v4159_v62 }
0x1280   :  { %7763 = vmatpush3.bf16.msra.mxu1 %v7760_v7  ;;  %v4174_v57 = vsel %vm4142_vm15, %v4120_v52, %v4158_v54 }
0x1281   :  { %v7764_v9 = vpack.c.bf16 %v4175_v60, %v4174_v57 }
0x1283   :  { %7765 = vmatprep.subr.bf16.mxu1 %v7764_v9 }
0x1284   :  { %7767 = vmatpush3.bf16.msra.mxu1 %v7764_v9 }
0x1287   :  { %7080 = vmatmul.mubr.f32.vlgmr.msra.gmra.mrb[104].mxu1 %v10522_v34  ;;  %v10541_v34 = vld [vmem:[#allocation88_spill] sm:$0xff] }
0x1288   :  { %7082 = vmatprep.mubr.f32.mxu1 %v10523_v16 }
0x128b   :  { %7083 = vmatmul.mubr.f32.gmra.mrb[106].mxu1 %v10524_v30 }
0x128c   :  { %7085 = vmatprep.mubr.f32.mxu1 %v10525_v58 }
0x128f   :  { %7086 = vmatmul.mubr.f32.gmra.mrb[108].mxu1 %v10526_v11 }
0x1290   :  { %7088 = vmatprep.mubr.f32.mxu1 %v10527_v49 }
0x1293   :  { %7089 = vmatmul.mubr.f32.gmra.mrb[110].mxu1 %v10528_v42 }
0x1294   :  { %7091 = vmatprep.mubr.f32.mxu1 %v10529_v19 }
0x1297   :  { %7092 = vmatmul.mubr.f32.gmra.mrb[112].mxu1 %v10530_v33 }
0x1298   :  { %7094 = vmatprep.mubr.f32.mxu1 %v10531_v15  ;;  %v10543_v15 = vld [vmem:[#allocation90_spill] sm:$0xff] }
0x129b   :  { %7095 = vmatmul.mubr.f32.gmra.mrb[114].mxu1 %v10532_v46 }
0x129c   :  { %7097 = vmatprep.mubr.f32.mxu1 %v10533_v38 }
0x129f   :  { %7098 = vmatmul.mubr.f32.gmra.mrb[116].mxu1 %v10534_v63 }
0x12a0   :  { %7100 = vmatprep.mubr.f32.mxu1 %v10535_v0  ;;  %v10544_v0 = vld [vmem:[#allocation91_spill] sm:$0xff] }
0x12a3   :  { %7101 = vmatmul.mubr.f32.gmra.mrb[118].mxu1 %v10536_v28 }
0x12a4   :  { %7196 = vmatprep.mubr.f32.mxu1 %v8069_v12 }
0x135a   :  { %v7081_v27 = vpop.f32.mrb[104].mxu1 }
0x135b   :  { %v4248_v14 = vadd.f32 %v7081_v27, %v10537_v43  ;;  %v4242_v1 = vpop.f32.mrb[105].mxu1 }
0x135c   :  { %v4243_v25 = vadd.f32 %v4242_v1, %v10538_v24 }
0x135d   :  { %vm4322_vm2 = vcmp.gt.f32.partialorder %v4248_v14, 0.0  ;;  %v4338_v21 = vmul.f32 0.01, %v4248_v14 }
0x135e   :  { %vm4321_vm3 = vcmp.gt.f32.partialorder %v4243_v25, 0.0  ;;  %v4337_v44 = vmul.f32 0.01, %v4243_v25  ;;  %v7084_v37 = vpop.f32.mrb[106].mxu1 }
0x135f   :  { %v4354_v35 = vsel %vm4322_vm2, %v4248_v14, %v4338_v21  ;;  %v4258_v8 = vadd.f32 %v7084_v37, %v8916_v6  ;;  %v4252_v4 = vpop.f32.mrb[107].mxu1 }
0x1360   :  { %v4353_v26 = vsel %vm4321_vm3, %v4243_v25, %v4337_v44  ;;  %v4253_v45 = vadd.f32 %v4252_v4, %v10539_v22 }
0x1361   :  { %v7769_v48 = vpack.c.bf16 %v4354_v35, %v4353_v26  ;;  %vm4324_vm6 = vcmp.gt.f32.partialorder %v4258_v8, 0.0  ;;  %v4340_v47 = vmul.f32 0.01, %v4258_v8 }
0x1362   :  { %vm4323_vm8 = vcmp.gt.f32.partialorder %v4253_v45, 0.0  ;;  %v4339_v10 = vmul.f32 0.01, %v4253_v45  ;;  %v7087_v40 = vpop.f32.mrb[108].mxu1 }
0x1363   :  { %v4356_v51 = vsel %vm4324_vm6, %v4258_v8, %v4340_v47  ;;  %v4268_v41 = vadd.f32 %v7087_v40, %v10505_v39  ;;  %v4262_v18 = vpop.f32.mrb[109].mxu1  ;;  %7770 = vmatpush3.bf16.msra.mxu0 %v7769_v48 }
0x1364   :  { %v4355_v32 = vsel %vm4323_vm8, %v4253_v45, %v4339_v10  ;;  %v4263_v53 = vadd.f32 %v4262_v18, %v10540_v31  ;;  %7771 = vmatprep.subr.bf16.mxu0 %v10400_v13 }
0x1365   :  { %v7772_v6 = vpack.c.bf16 %v4356_v51, %v4355_v32  ;;  %vm4326_vm9 = vcmp.gt.f32.partialorder %v4268_v41, 0.0  ;;  %v4342_v29 = vmul.f32 0.01, %v4268_v41  ;;  %v10546_v32 = vld [vmem:[#allocation96_spill] sm:$0xff] }
0x1366   :  { %vm4325_vm10 = vcmp.gt.f32.partialorder %v4263_v53, 0.0  ;;  %v4341_v5 = vmul.f32 0.01, %v4263_v53  ;;  %v7090_v55 = vpop.f32.mrb[110].mxu1 }
0x1367   :  { %v4358_v3 = vsel %vm4326_vm9, %v4268_v41, %v4342_v29  ;;  %v4278_v52 = vadd.f32 %v7090_v55, %v10507_v17  ;;  %v4272_v50 = vpop.f32.mrb[111].mxu1  ;;  %7773 = vmatpush3.bf16.msra.mxu0 %v7772_v6  ;;  %v10542_v17 = vld [vmem:[#allocation89_spill] sm:$0xff] }
0x1368   :  { %v4357_v62 = vsel %vm4325_vm10, %v4263_v53, %v4341_v5  ;;  %v4273_v39 = vadd.f32 %v4272_v50, %v10508_v59  ;;  %7774 = vmatprep.subr.bf16.mxu0 %v10400_v13  ;;  %v8071_v50 = vld [vmem:[%s10151_s3 + $0x88] sm:$0xff] }
0x1369   :  { %v7775_v7 = vpack.c.bf16 %v4358_v3, %v4357_v62  ;;  %vm4328_vm11 = vcmp.gt.f32.partialorder %v4278_v52, 0.0  ;;  %v4344_v54 = vmul.f32 0.01, %v4278_v52  ;;  %v8073_v62 = vld [vmem:[%s10151_s3 + $0x98] sm:$0xff] }
0x136a   :  { %vm4327_vm12 = vcmp.gt.f32.partialorder %v4273_v39, 0.0  ;;  %v4343_v60 = vmul.f32 0.01, %v4273_v39  ;;  %v7093_v57 = vpop.f32.mrb[112].mxu1 }
0x136b   :  { %v4360_v9 = vsel %vm4328_vm11, %v4278_v52, %v4344_v54  ;;  %v4288_v16 = vadd.f32 %v7093_v57, %v10541_v34  ;;  %v4282_v30 = vpop.f32.mrb[113].mxu1  ;;  %7776 = vmatpush3.bf16.msra.mxu0 %v7775_v7  ;;  %v8075_v7 = vld [vmem:[%s10151_s3 + $0xa8] sm:$0xff]  ;;  %v8076_v54 = vld [vmem:[%s10151_s3 + $0xb0] sm:$0xff]  ;;  %v8078_v57 = vld [vmem:[%s10151_s3 + $0xc0] sm:$0xff] }
0x136c   :  { %v4359_v58 = vsel %vm4327_vm12, %v4273_v39, %v4343_v60  ;;  %v4283_v11 = vadd.f32 %v4282_v30, %v10542_v17  ;;  %7777 = vmatprep.subr.bf16.mxu0 %v10400_v13  ;;  %v8074_v39 = vld [vmem:[%s10151_s3 + $0xa0] sm:$0xff]  ;;  %v8077_v60 = vld [vmem:[%s10151_s3 + $0xb8] sm:$0xff]  ;;  %v8080_v34 = vld [vmem:[%s10151_s3 + $0xd0] sm:$0xff] }
0x136d   :  { %v7778_v49 = vpack.c.bf16 %v4360_v9, %v4359_v58  ;;  %vm4330_vm7 = vcmp.gt.f32.partialorder %v4288_v16, 0.0  ;;  %v4346_v59 = vmul.f32 0.01, %v4288_v16  ;;  %v8079_v9 = vld [vmem:[%s10151_s3 + $0xc8] sm:$0xff]  ;;  %v8082_v30 = vld [vmem:[%s10151_s3 + $0xe0] sm:$0xff]  ;;  %v8084_v17 = vld [vmem:[%s10151_s3 + $0xf0] sm:$0xff] }
0x136e   :  { %vm4329_vm13 = vcmp.gt.f32.partialorder %v4283_v11, 0.0  ;;  %v4345_v42 = vmul.f32 0.01, %v4283_v11  ;;  %v7096_v19 = vpop.f32.mrb[114].mxu1  ;;  %v8083_v58 = vld [vmem:[%s10151_s3 + $0xe8] sm:$0xff] }
0x136f   :  { %v4362_v33 = vsel %vm4330_vm7, %v4288_v16, %v4346_v59  ;;  %v4298_v46 = vadd.f32 %v7096_v19, %v10543_v15  ;;  %v4292_v38 = vpop.f32.mrb[115].mxu1  ;;  %7779 = vmatpush3.bf16.msra.mxu0 %v7778_v49  ;;  %v8081_v16 = vld [vmem:[%s10151_s3 + $0xd8] sm:$0xff]  ;;  %v10547_v59 = vld [vmem:[#allocation36_spill] sm:$0xff] }
0x1370   :  { %v4361_v63 = vsel %vm4329_vm13, %v4283_v11, %v4345_v42  ;;  %v4293_v28 = vadd.f32 %v4292_v38, %v10544_v0  ;;  %7780 = vmatprep.subr.bf16.mxu0 %v10400_v13  ;;  %v8085_v11 = vld [vmem:[%s10151_s3 + $0xf8] sm:$0xff] }
0x1371   :  { %v7781_v12 = vpack.c.bf16 %v4362_v33, %v4361_v63  ;;  %vm4332_vm14 = vcmp.gt.f32.partialorder %v4298_v46, 0.0  ;;  %v4348_v27 = vmul.f32 0.01, %v4298_v46  ;;  %v10548_v33 = vld [vmem:[#allocation35_spill] sm:$0xff]  ;;  %v10549_v0 = vld [vmem:[#allocation37_spill] sm:$0xff] }
0x1372   :  { %vm4331_vm15 = vcmp.gt.f32.partialorder %v4293_v28, 0.0  ;;  %v4347_v43 = vmul.f32 0.01, %v4293_v28  ;;  %v7099_v14 = vpop.f32.mrb[116].mxu1 }
0x1373   :  { %v4364_v1 = vsel %vm4332_vm14, %v4298_v46, %v4348_v27  ;;  %v4308_v24 = vadd.f32 %v7099_v14, %v10510_v23  ;;  %v4302_v25 = vpop.f32.mrb[117].mxu1  ;;  %7782 = vmatpush3.bf16.msra.mxu0 %v7781_v12 }
0x1374   :  { %v4363_v21 = vsel %vm4331_vm15, %v4293_v28, %v4347_v43  ;;  %v4303_v44 = vadd.f32 %v4302_v25, %v10511_v36  ;;  %7783 = vmatprep.subr.bf16.mxu0 %v10400_v13  ;;  %v10550_v43 = vld [vmem:[#allocation38_spill] sm:$0xff] }
0x1375   :  { %v7784_v37 = vpack.c.bf16 %v4364_v1, %v4363_v21  ;;  %vm4334_vm2 = vcmp.gt.f32.partialorder %v4308_v24, 0.0  ;;  %v4350_v35 = vmul.f32 0.01, %v4308_v24 }
0x1376   :  { %vm4333_vm3 = vcmp.gt.f32.partialorder %v4303_v44, 0.0  ;;  %v4349_v8 = vmul.f32 0.01, %v4303_v44  ;;  %v7102_v4 = vpop.f32.mrb[118].mxu1 }
0x1377   :  { %v4366_v26 = vsel %vm4334_vm2, %v4308_v24, %v4350_v35  ;;  %v4318_v22 = vadd.f32 %v7102_v4, %v10512_v56  ;;  %v4312_v45 = vpop.f32.mrb[119].mxu1  ;;  %7785 = vmatpush3.bf16.msra.mxu0 %v7784_v37  ;;  %v10545_v56 = vld [vmem:[#allocation84_spill] sm:$0xff]  ;;  %v10551_v37 = vld [vmem:[#allocation39_spill] sm:$0xff] }
0x1378   :  { %v4365_v48 = vsel %vm4333_vm3, %v4303_v44, %v4349_v8  ;;  %v4313_v23 = vadd.f32 %v4312_v45, %v10513_v2  ;;  %7786 = vmatprep.subr.bf16.mxu0 %v10400_v13  ;;  %v8070_v2 = vld [vmem:[%s10151_s3 + $0x80] sm:$0xff] }
0x1379   :  { %v7787_v47 = vpack.c.bf16 %v4366_v26, %v4365_v48  ;;  %vm4336_vm6 = vcmp.gt.f32.partialorder %v4318_v22, 0.0  ;;  %v4352_v36 = vmul.f32 0.01, %v4318_v22  ;;  %v10552_v26 = vld [vmem:[#allocation40_spill] sm:$0xff] }
0x137a   :  { %vm4335_vm8 = vcmp.gt.f32.partialorder %v4313_v23, 0.0  ;;  %v4351_v10 = vmul.f32 0.01, %v4313_v23 }
0x137b   :  { %v4368_v40 = vsel %vm4336_vm6, %v4318_v22, %v4352_v36  ;;  %7788 = vmatpush3.bf16.msra.mxu0 %v7787_v47 }
0x137c   :  { %v4367_v51 = vsel %vm4335_vm8, %v4313_v23, %v4351_v10  ;;  %7789 = vmatprep.subr.bf16.mxu0 %v10400_v13  ;;  %v10553_v10 = vld [vmem:[#allocation41_spill] sm:$0xff] }
0x137d   :  { %v7790_v41 = vpack.c.bf16 %v4368_v40, %v4367_v51 }
0x137f   :  { %7791 = vmatpush3.bf16.msra.mxu0 %v7790_v41 }
0x1382   :  { %7136 = vmatmul.mubr.f32.vlgmr.msra.gmra.mrb[134].mxu0 %v10545_v56  ;;  %v10554_v56 = vld [vmem:[#allocation42_spill] sm:$0xff] }
0x1383   :  { %7140 = vmatprep.mubr.msk.f32.mxu0 %vm138_vm0, %v8070_v2 }
0x1455   :  { %v4435_v18 = vpop.f32.mrb[134].mxu0 }
0x1456   :  { %v4436_v31 = vadd.f32 %v4435_v18, %v10546_v32  ;;  %v7137_v53 = vpop.f32.mrb[135].mxu0 }
0x1458   :  { %7956 = vtanh.f32 %v4436_v31  ;;  %v4444_v3 = vrot.slane %v4436_v31, 2 }
0x1462   :  { %v7957_v6 = vpop.eup %7956 }
0x1463   :  { %v4440_v29 = vmul.f32 1.442695, %v7957_v6 }
0x1465   :  { %7958 = vpow2.f32 %v4440_v29  ;;  %v10555_v29 = vld [vmem:[#allocation43_spill] sm:$0xff] }
0x146f   :  { %v7959_v5 = vpop.eup %7958 }
0x1470   :  { %v4442_v55 = vmul.f32 %v7959_v5, %v9756_v20  ;;  %v8072_v20 = vld [vmem:[%s10151_s3 + $0x90] sm:$0xff] }
0x1472   :  { %v9821_v52 = vadd.f32 %v4444_v3, %v4442_v55 }
0x1474   :  { %7138 = vmatprep.subr.msk.mxu0 %vm171_vm1, %v9821_v52 }
0x1475   :  { %7139 = vmatpush3.msk.msra.mxu0 %vm171_vm1, %v9821_v52 }
0x1476   :  { %7141 = vmatmul.mubr.msk.f32.vlgmr.msra.gmra.mrb[136].mxu0 %vm138_vm0, %v8071_v50  ;;  %7824 = vmatprep.subr.bf16.mxu0 %v10400_v13  ;;  %v10556_v50 = vld [vmem:[#allocation44_spill] sm:$0xff] }
0x1477   :  { %7143 = vmatprep.mubr.msk.f32.mxu0 %vm138_vm0, %v8072_v20 }
0x147a   :  { %7144 = vmatmul.mubr.msk.f32.gmra.mrb[138].mxu0 %vm138_vm0, %v8073_v62 }
0x147b   :  { %7146 = vmatprep.mubr.msk.f32.mxu0 %vm138_vm0, %v8074_v39 }
0x147e   :  { %7147 = vmatmul.mubr.msk.f32.gmra.mrb[140].mxu0 %vm138_vm0, %v8075_v7 }
0x147f   :  { %7149 = vmatprep.mubr.msk.f32.mxu0 %vm138_vm0, %v8076_v54 }
0x1482   :  { %7150 = vmatmul.mubr.msk.f32.gmra.mrb[142].mxu0 %vm138_vm0, %v8077_v60 }
0x1483   :  { %7152 = vmatprep.mubr.msk.f32.mxu0 %vm138_vm0, %v8078_v57  ;;  %v10557_v57 = vld [vmem:[#allocation45_spill] sm:$0xff] }
0x1486   :  { %7153 = vmatmul.mubr.msk.f32.gmra.mrb[144].mxu0 %vm138_vm0, %v8079_v9 }
0x1487   :  { %7155 = vmatprep.mubr.msk.f32.mxu0 %vm138_vm0, %v8080_v34 }
0x148a   :  { %7156 = vmatmul.mubr.msk.f32.gmra.mrb[146].mxu0 %vm138_vm0, %v8081_v16 }
0x148b   :  { %7158 = vmatprep.mubr.msk.f32.mxu0 %vm138_vm0, %v8082_v30  ;;  %v10558_v30 = vld [vmem:[#allocation46_spill] sm:$0xff] }
0x148e   :  { %7159 = vmatmul.mubr.msk.f32.gmra.mrb[148].mxu0 %vm138_vm0, %v8083_v58 }
0x148f   :  { %7161 = vmatprep.mubr.msk.f32.mxu0 %vm138_vm0, %v8084_v17 }
0x1492   :  { %7162 = vmatmul.mubr.msk.f32.gmra.mrb[150].mxu0 %vm138_vm0, %v8085_v11 }
0x1493   :  { %7252 = vmatprep.mubr.msk.f32.mxu0 %vm8139_vm4, %v10411_v61 }
0x1549   :  { %v7142_v49 = vpop.f32.mrb[136].mxu0 }
0x154a   :  { %v4522_v42 = vadd.f32 %v7142_v49, %v10547_v59  ;;  %v4516_v19 = vpop.f32.mrb[137].mxu0 }
0x154b   :  { %v4517_v15 = vadd.f32 %v4516_v19, %v10548_v33  ;;  %v10559_v19 = vld [vmem:[#allocation47_spill] sm:$0xff] }
0x154c   :  { %vm4596_vm9 = vcmp.gt.f32.partialorder %v4522_v42, 0.0  ;;  %v4612_v46 = vmul.f32 0.01, %v4522_v42 }
0x154d   :  { %vm4595_vm10 = vcmp.gt.f32.partialorder %v4517_v15, 0.0  ;;  %v4611_v38 = vmul.f32 0.01, %v4517_v15  ;;  %v7145_v63 = vpop.f32.mrb[138].mxu0 }
0x154e   :  { %v4532_v28 = vadd.f32 %v7145_v63, %v10549_v0  ;;  %v4526_v12 = vpop.f32.mrb[139].mxu0  ;;  %v4628_v27 = vsel %vm4596_vm9, %v4522_v42, %v4612_v46 }
0x154f   :  { %v4527_v14 = vadd.f32 %v4526_v12, %v10550_v43  ;;  %v4627_v1 = vsel %vm4595_vm10, %v4517_v15, %v4611_v38  ;;  %v10560_v38 = vld [vmem:[#allocation48_spill] sm:$0xff] }
0x1550   :  { %vm4598_vm11 = vcmp.gt.f32.partialorder %v4532_v28, 0.0  ;;  %v4614_v24 = vmul.f32 0.01, %v4532_v28  ;;  %v7792_v25 = vpack.c.bf16 %v4628_v27, %v4627_v1 }
0x1551   :  { %vm4597_vm12 = vcmp.gt.f32.partialorder %v4527_v14, 0.0  ;;  %v4613_v21 = vmul.f32 0.01, %v4527_v14  ;;  %v7148_v44 = vpop.f32.mrb[140].mxu0 }
0x1552   :  { %v4542_v35 = vadd.f32 %v7148_v44, %v10551_v37  ;;  %v4536_v8 = vpop.f32.mrb[141].mxu0  ;;  %7793 = vmatprep.subr.bf16.mxu1 %v7792_v25  ;;  %v4630_v4 = vsel %vm4598_vm11, %v4532_v28, %v4614_v24 }
0x1553   :  { %v4537_v22 = vadd.f32 %v4536_v8, %v10552_v26  ;;  %7795 = vmatpush3.bf16.msra.mxu1 %v7792_v25  ;;  %v4629_v45 = vsel %vm4597_vm12, %v4527_v14, %v4613_v21  ;;  %v10561_v14 = vld [vmem:[#allocation49_spill] sm:$0xff]  ;;  %v10562_v21 = vld [vmem:[#allocation50_spill] sm:$0xff] }
0x1554   :  { %vm4600_vm7 = vcmp.gt.f32.partialorder %v4542_v35, 0.0  ;;  %v4616_v48 = vmul.f32 0.01, %v4542_v35  ;;  %v7796_v23 = vpack.c.bf16 %v4630_v4, %v4629_v45 }
0x1555   :  { %vm4599_vm13 = vcmp.gt.f32.partialorder %v4537_v22, 0.0  ;;  %v4615_v47 = vmul.f32 0.01, %v4537_v22  ;;  %v7151_v36 = vpop.f32.mrb[142].mxu0 }
0x1556   :  { %v4552_v40 = vadd.f32 %v7151_v36, %v10553_v10  ;;  %v4546_v51 = vpop.f32.mrb[143].mxu0  ;;  %7797 = vmatprep.subr.bf16.mxu1 %v7796_v23  ;;  %v4632_v41 = vsel %vm4600_vm7, %v4542_v35, %v4616_v48  ;;  %v8086_v48 = vld [vmem:[%s10152_s4 + $0x88] sm:$0xff]  ;;  %v8089_v36 = vld [vmem:[%s10152_s4 + $0xa0] sm:$0xff] }
0x1557   :  { %v4547_v2 = vadd.f32 %v4546_v51, %v10554_v56  ;;  %7799 = vmatpush3.bf16.msra.mxu1 %v7796_v23  ;;  %v4631_v18 = vsel %vm4599_vm13, %v4537_v22, %v4615_v47  ;;  %v8087_v23 = vld [vmem:[%s10152_s4 + $0x90] sm:$0xff]  ;;  %v8088_v47 = vld [vmem:[%s10152_s4 + $0x98] sm:$0xff]  ;;  %v8090_v10 = vld [vmem:[%s10152_s4 + $0xa8] sm:$0xff] }
0x1558   :  { %vm4602_vm14 = vcmp.gt.f32.partialorder %v4552_v40, 0.0  ;;  %v4618_v32 = vmul.f32 0.01, %v4552_v40  ;;  %v7800_v31 = vpack.c.bf16 %v4632_v41, %v4631_v18  ;;  %v8092_v51 = vld [vmem:[%s10152_s4 + $0xb8] sm:$0xff]  ;;  %v8093_v41 = vld [vmem:[%s10152_s4 + $0xc0] sm:$0xff]  ;;  %v8094_v56 = vld [vmem:[%s10152_s4 + $0xc8] sm:$0xff] }
0x1559   :  { %vm4601_vm15 = vcmp.gt.f32.partialorder %v4547_v2, 0.0  ;;  %v4617_v53 = vmul.f32 0.01, %v4547_v2  ;;  %v7154_v6 = vpop.f32.mrb[144].mxu0  ;;  %v8096_v18 = vld [vmem:[%s10152_s4 + $0xd8] sm:$0xff] }
0x155a   :  { %v4562_v5 = vadd.f32 %v7154_v6, %v10555_v29  ;;  %v4556_v55 = vpop.f32.mrb[145].mxu0  ;;  %7801 = vmatprep.subr.bf16.mxu1 %v7800_v31  ;;  %v4634_v3 = vsel %vm4602_vm14, %v4552_v40, %v4618_v32  ;;  %v8091_v40 = vld [vmem:[%s10152_s4 + $0xb0] sm:$0xff]  ;;  %v8097_v32 = vld [vmem:[%s10152_s4 + $0xe0] sm:$0xff]  ;;  %v8100_v6 = vld [vmem:[%s10152_s4 + $0xf8] sm:$0xff] }
0x155b   :  { %v4557_v20 = vadd.f32 %v4556_v55, %v10556_v50  ;;  %7803 = vmatpush3.bf16.msra.mxu1 %v7800_v31  ;;  %v4633_v62 = vsel %vm4601_vm15, %v4547_v2, %v4617_v53  ;;  %v8095_v2 = vld [vmem:[%s10152_s4 + $0xd0] sm:$0xff]  ;;  %v8098_v31 = vld [vmem:[%s10152_s4 + $0xe8] sm:$0xff]  ;;  %v8101_v29 = vld [vmem:[%s10152_s4 + $0x100] sm:$0xff] }
0x155c   :  { %vm4604_vm2 = vcmp.gt.f32.partialorder %v4562_v5, 0.0  ;;  %v4620_v39 = vmul.f32 0.01, %v4562_v5  ;;  %v7804_v7 = vpack.c.bf16 %v4634_v3, %v4633_v62  ;;  %v8099_v53 = vld [vmem:[%s10152_s4 + $0xf0] sm:$0xff]  ;;  %v10563_v55 = vld [vmem:[#allocation54_spill] sm:$0xff] }
0x155d   :  { %vm4603_vm3 = vcmp.gt.f32.partialorder %v4557_v20, 0.0  ;;  %v4619_v54 = vmul.f32 0.01, %v4557_v20  ;;  %v7157_v60 = vpop.f32.mrb[146].mxu0 }
0x155e   :  { %v4572_v9 = vadd.f32 %v7157_v60, %v10557_v57  ;;  %v4566_v34 = vpop.f32.mrb[147].mxu0  ;;  %7805 = vmatprep.subr.bf16.mxu1 %v7804_v7  ;;  %v4636_v16 = vsel %vm4604_vm2, %v4562_v5, %v4620_v39  ;;  %v10565_v57 = vld [vmem:[#allocation53_spill] sm:$0xff] }
0x155f   :  { %v4567_v58 = vadd.f32 %v4566_v34, %v10558_v30  ;;  %7807 = vmatpush3.bf16.msra.mxu1 %v7804_v7  ;;  %v4635_v17 = vsel %vm4603_vm3, %v4557_v20, %v4619_v54  ;;  %v10564_v20 = vld [vmem:[#allocation51_spill] sm:$0xff]  ;;  %v10566_v30 = vld [vmem:[#allocation52_spill] sm:$0xff] }
0x1560   :  { %vm4606_vm6 = vcmp.gt.f32.partialorder %v4572_v9, 0.0  ;;  %v4622_v11 = vmul.f32 0.01, %v4572_v9  ;;  %v7808_v49 = vpack.c.bf16 %v4636_v16, %v4635_v17 }
0x1561   :  { %vm4605_vm8 = vcmp.gt.f32.partialorder %v4567_v58, 0.0  ;;  %v4621_v59 = vmul.f32 0.01, %v4567_v58  ;;  %v7160_v42 = vpop.f32.mrb[148].mxu0 }
0x1562   :  { %v4582_v33 = vadd.f32 %v7160_v42, %v10559_v19  ;;  %v4576_v15 = vpop.f32.mrb[149].mxu0  ;;  %7809 = vmatprep.subr.bf16.mxu1 %v7808_v49  ;;  %v4638_v46 = vsel %vm4606_vm6, %v4572_v9, %v4622_v11  ;;  %v10567_v19 = vld [vmem:[#allocation55_spill] sm:$0xff] }
0x1563   :  { %v4577_v63 = vadd.f32 %v4576_v15, %v10560_v38  ;;  %7811 = vmatpush3.bf16.msra.mxu1 %v7808_v49  ;;  %v4637_v0 = vsel %vm4605_vm8, %v4567_v58, %v4621_v59  ;;  %v10568_v38 = vld [vmem:[#allocation56_spill] sm:$0xff] }
0x1564   :  { %vm4608_vm9 = vcmp.gt.f32.partialorder %v4582_v33, 0.0  ;;  %v4624_v28 = vmul.f32 0.01, %v4582_v33  ;;  %v7812_v12 = vpack.c.bf16 %v4638_v46, %v4637_v0 }
0x1565   :  { %vm4607_vm10 = vcmp.gt.f32.partialorder %v4577_v63, 0.0  ;;  %v4623_v27 = vmul.f32 0.01, %v4577_v63  ;;  %v7163_v43 = vpop.f32.mrb[150].mxu0 }
0x1566   :  { %v4592_v1 = vadd.f32 %v7163_v43, %v10561_v14  ;;  %v4586_v24 = vpop.f32.mrb[151].mxu0  ;;  %7813 = vmatprep.subr.bf16.mxu1 %v7812_v12  ;;  %v4640_v25 = vsel %vm4608_vm9, %v4582_v33, %v4624_v28  ;;  %v10569_v14 = vld [vmem:[#allocation57_spill] sm:$0xff] }
0x1567   :  { %v4587_v44 = vadd.f32 %v4586_v24, %v10562_v21  ;;  %7815 = vmatpush3.bf16.msra.mxu1 %v7812_v12  ;;  %v4639_v37 = vsel %vm4607_vm10, %v4577_v63, %v4623_v27  ;;  %v10570_v21 = vld [vmem:[#allocation58_spill] sm:$0xff] }
0x1568   :  { %vm4610_vm11 = vcmp.gt.f32.partialorder %v4592_v1, 0.0  ;;  %v4626_v35 = vmul.f32 0.01, %v4592_v1  ;;  %v7816_v8 = vpack.c.bf16 %v4640_v25, %v4639_v37 }
0x1569   :  { %vm4609_vm12 = vcmp.gt.f32.partialorder %v4587_v44, 0.0  ;;  %v4625_v4 = vmul.f32 0.01, %v4587_v44 }
0x156a   :  { %7817 = vmatprep.subr.bf16.mxu1 %v7816_v8  ;;  %v4642_v26 = vsel %vm4610_vm11, %v4592_v1, %v4626_v35 }
0x156b   :  { %7819 = vmatpush3.bf16.msra.mxu1 %v7816_v8  ;;  %v4641_v22 = vsel %vm4609_vm12, %v4587_v44, %v4625_v4 }
0x156c   :  { %v7820_v45 = vpack.c.bf16 %v4642_v26, %v4641_v22  ;;  %v10571_v22 = vld [vmem:[#allocation59_spill] sm:$0xff] }
0x156e   :  { %7821 = vmatprep.subr.bf16.mxu1 %v7820_v45 }
0x156f   :  { %7823 = vmatpush3.bf16.msra.mxu1 %v7820_v45 }
0x1572   :  { %7197 = vmatmul.mubr.f32.vlgmr.msra.gmra.mrb[120].mxu1 %v8086_v48 }
0x1573   :  { %7199 = vmatprep.mubr.f32.mxu1 %v8087_v23 }
0x1576   :  { %7200 = vmatmul.mubr.f32.gmra.mrb[122].mxu1 %v8088_v47  ;;  %v10572_v47 = vld [vmem:[#allocation60_spill] sm:$0xff] }
0x1577   :  { %7202 = vmatprep.mubr.f32.mxu1 %v8089_v36 }
0x157a   :  { %7203 = vmatmul.mubr.f32.gmra.mrb[124].mxu1 %v8090_v10 }
0x157b   :  { %7205 = vmatprep.mubr.f32.mxu1 %v8091_v40 }
0x157e   :  { %7206 = vmatmul.mubr.f32.gmra.mrb[126].mxu1 %v8092_v51 }
0x157f   :  { %7208 = vmatprep.mubr.f32.mxu1 %v8093_v41 }
0x1582   :  { %7209 = vmatmul.mubr.f32.gmra.mrb[128].mxu1 %v8094_v56 }
0x1583   :  { %7211 = vmatprep.mubr.f32.mxu1 %v8095_v2  ;;  %v10573_v2 = vld [vmem:[#allocation61_spill] sm:$0xff] }
0x1586   :  { %7212 = vmatmul.mubr.f32.gmra.mrb[130].mxu1 %v8096_v18 }
0x1587   :  { %7214 = vmatprep.mubr.f32.mxu1 %v8097_v32 }
0x158a   :  { %7215 = vmatmul.mubr.f32.gmra.mrb[132].mxu1 %v8098_v31 }
0x158b   :  { %7217 = vmatprep.mubr.f32.mxu1 %v8099_v53  ;;  %v10574_v53 = vld [vmem:[#allocation62_spill] sm:$0xff] }
0x158e   :  { %7218 = vmatmul.mubr.f32.gmra.mrb[134].mxu1 %v8100_v6 }
0x158f   :  { %7313 = vmatprep.mubr.f32.mxu1 %v8101_v29 }
0x1645   :  { %v7198_v5 = vpop.f32.mrb[120].mxu1 }
0x1646   :  { %v4715_v3 = vadd.f32 %v7198_v5, %v10563_v55  ;;  %v4709_v50 = vpop.f32.mrb[121].mxu1 }
0x1647   :  { %v4710_v62 = vadd.f32 %v4709_v50, %v10564_v20  ;;  %v10575_v20 = vld [vmem:[#allocation63_spill] sm:$0xff] }
0x1648   :  { %vm4789_vm7 = vcmp.gt.f32.partialorder %v4715_v3, 0.0  ;;  %v4805_v39 = vmul.f32 0.01, %v4715_v3 }
0x1649   :  { %vm4788_vm13 = vcmp.gt.f32.partialorder %v4710_v62, 0.0  ;;  %v4804_v7 = vmul.f32 0.01, %v4710_v62  ;;  %v7201_v54 = vpop.f32.mrb[122].mxu1 }
0x164a   :  { %v4821_v60 = vsel %vm4789_vm7, %v4715_v3, %v4805_v39  ;;  %v4725_v9 = vadd.f32 %v7201_v54, %v10565_v57  ;;  %v4719_v34 = vpop.f32.mrb[123].mxu1  ;;  %v10576_v54 = vld [vmem:[#allocation64_spill] sm:$0xff] }
0x164b   :  { %v4820_v16 = vsel %vm4788_vm13, %v4710_v62, %v4804_v7  ;;  %v4720_v58 = vadd.f32 %v4719_v34, %v10566_v30 }
0x164c   :  { %v7825_v17 = vpack.c.bf16 %v4821_v60, %v4820_v16  ;;  %vm4791_vm14 = vcmp.gt.f32.partialorder %v4725_v9, 0.0  ;;  %v4807_v11 = vmul.f32 0.01, %v4725_v9 }
0x164d   :  { %vm4790_vm15 = vcmp.gt.f32.partialorder %v4720_v58, 0.0  ;;  %v4806_v49 = vmul.f32 0.01, %v4720_v58  ;;  %v7204_v59 = vpop.f32.mrb[124].mxu1 }
0x164e   :  { %v4823_v42 = vsel %vm4791_vm14, %v4725_v9, %v4807_v11  ;;  %v4735_v33 = vadd.f32 %v7204_v59, %v10567_v19  ;;  %v4729_v15 = vpop.f32.mrb[125].mxu1  ;;  %7826 = vmatpush3.bf16.msra.mxu0 %v7825_v17  ;;  %v10578_v59 = vld [vmem:[#allocation66_spill] sm:$0xff] }
0x164f   :  { %v4822_v46 = vsel %vm4790_vm15, %v4720_v58, %v4806_v49  ;;  %v4730_v63 = vadd.f32 %v4729_v15, %v10568_v38  ;;  %7827 = vmatprep.subr.bf16.mxu0 %v10400_v13  ;;  %v10577_v58 = vld [vmem:[#allocation65_spill] sm:$0xff] }
0x1650   :  { %v7828_v0 = vpack.c.bf16 %v4823_v42, %v4822_v46  ;;  %vm4793_vm2 = vcmp.gt.f32.partialorder %v4735_v33, 0.0  ;;  %v4809_v28 = vmul.f32 0.01, %v4735_v33 }
0x1651   :  { %vm4792_vm3 = vcmp.gt.f32.partialorder %v4730_v63, 0.0  ;;  %v4808_v12 = vmul.f32 0.01, %v4730_v63  ;;  %v7207_v27 = vpop.f32.mrb[126].mxu1 }
0x1652   :  { %v4825_v43 = vsel %vm4793_vm2, %v4735_v33, %v4809_v28  ;;  %v4745_v1 = vadd.f32 %v7207_v27, %v10569_v14  ;;  %v4739_v24 = vpop.f32.mrb[127].mxu1  ;;  %7829 = vmatpush3.bf16.msra.mxu0 %v7828_v0  ;;  %v8102_v0 = vld [vmem:[%s10154_s5 + $0x4] sm:$0xf]  ;;  %v10579_v27 = vld [vmem:[#allocation67_spill] sm:$0xff] }
0x1653   :  { %v4824_v25 = vsel %vm4792_vm3, %v4730_v63, %v4808_v12  ;;  %v4740_v44 = vadd.f32 %v4739_v24, %v10570_v21  ;;  %7830 = vmatprep.subr.bf16.mxu0 %v10400_v13  ;;  %v8103_v28 = vld [vmem:[%s10151_s3 + $0x100] sm:$0xff] }
0x1654   :  { %v7831_v37 = vpack.c.bf16 %v4825_v43, %v4824_v25  ;;  %vm4795_vm6 = vcmp.gt.f32.partialorder %v4745_v1, 0.0  ;;  %v4811_v35 = vmul.f32 0.01, %v4745_v1  ;;  %v8104_v21 = vld [vmem:[%s10160_s2] sm:$0x3] }
0x1655   :  { %vm4794_vm8 = vcmp.gt.f32.partialorder %v4740_v44, 0.0  ;;  %v4810_v8 = vmul.f32 0.01, %v4740_v44  ;;  %v7210_v4 = vpop.f32.mrb[128].mxu1 }
0x1656   :  { %v4827_v26 = vsel %vm4795_vm6, %v4745_v1, %v4811_v35  ;;  %v4755_v45 = vadd.f32 %v7210_v4, %v10571_v22  ;;  %v4749_v48 = vpop.f32.mrb[129].mxu1  ;;  %7832 = vmatpush3.bf16.msra.mxu0 %v7831_v37  ;;  %v8106_v4 = vld [vmem:[%s10151_s3 + $0x110] sm:$0xff]  ;;  %v8108_v22 = vld [vmem:[%s10151_s3 + $0x120] sm:$0xff] }
0x1657   :  { %v4826_v23 = vsel %vm4794_vm8, %v4740_v44, %v4810_v8  ;;  %v4750_v36 = vadd.f32 %v4749_v48, %v10572_v47  ;;  %7833 = vmatprep.subr.bf16.mxu0 %v10400_v13  ;;  %v8105_v8 = vld [vmem:[%s10151_s3 + $0x108] sm:$0xff]  ;;  %v8110_v48 = vld [vmem:[%s10151_s3 + $0x130] sm:$0xff]  ;;  %v8112_v47 = vld [vmem:[%s10151_s3 + $0x140] sm:$0xff] }
0x1658   :  { %v7834_v10 = vpack.c.bf16 %v4827_v26, %v4826_v23  ;;  %vm4797_vm9 = vcmp.gt.f32.partialorder %v4755_v45, 0.0  ;;  %v4813_v40 = vmul.f32 0.01, %v4755_v45  ;;  %v8107_v26 = vld [vmem:[%s10151_s3 + $0x118] sm:$0xff] }
0x1659   :  { %vm4796_vm10 = vcmp.gt.f32.partialorder %v4750_v36, 0.0  ;;  %v4812_v51 = vmul.f32 0.01, %v4750_v36  ;;  %v7213_v41 = vpop.f32.mrb[130].mxu1  ;;  %v8111_v23 = vld [vmem:[%s10151_s3 + $0x138] sm:$0xff] }
0x165a   :  { %v4829_v56 = vsel %vm4797_vm9, %v4755_v45, %v4813_v40  ;;  %v4765_v18 = vadd.f32 %v7213_v41, %v10573_v2  ;;  %v4759_v32 = vpop.f32.mrb[131].mxu1  ;;  %7835 = vmatpush3.bf16.msra.mxu0 %v7834_v10  ;;  %v8109_v45 = vld [vmem:[%s10151_s3 + $0x128] sm:$0xff]  ;;  %v8114_v10 = vld [vmem:[%s10151_s3 + $0x150] sm:$0xff]  ;;  %v8115_v40 = vld [vmem:[%s10151_s3 + $0x158] sm:$0xff] }
0x165b   :  { %v4828_v31 = vsel %vm4796_vm10, %v4750_v36, %v4812_v51  ;;  %v4760_v6 = vadd.f32 %v4759_v32, %v10574_v53  ;;  %7836 = vmatprep.subr.bf16.mxu0 %v10400_v13  ;;  %v8113_v36 = vld [vmem:[%s10151_s3 + $0x148] sm:$0xff]  ;;  %v8116_v51 = vld [vmem:[%s10151_s3 + $0x160] sm:$0xff]  ;;  %v8119_v2 = vld [vmem:[%s10151_s3 + $0x178] sm:$0xff] }
0x165c   :  { %v7837_v29 = vpack.c.bf16 %v4829_v56, %v4828_v31  ;;  %vm4799_vm11 = vcmp.gt.f32.partialorder %v4765_v18, 0.0  ;;  %v4815_v5 = vmul.f32 0.01, %v4765_v18  ;;  %v8117_v41 = vld [vmem:[%s10151_s3 + $0x168] sm:$0xff]  ;;  %v8118_v56 = vld [vmem:[%s10151_s3 + $0x170] sm:$0xff]  ;;  %v10580_v32 = vld [vmem:[#allocation5_spill] sm:$0xff] }
0x165d   :  { %vm4798_vm12 = vcmp.gt.f32.partialorder %v4760_v6, 0.0  ;;  %v4814_v55 = vmul.f32 0.01, %v4760_v6  ;;  %v7216_v3 = vpop.f32.mrb[132].mxu1 }
0x165e   :  { %v4831_v50 = vsel %vm4799_vm11, %v4765_v18, %v4815_v5  ;;  %v4775_v62 = vadd.f32 %v7216_v3, %v10575_v20  ;;  %v4769_v39 = vpop.f32.mrb[133].mxu1  ;;  %7838 = vmatpush3.bf16.msra.mxu0 %v7837_v29 }
0x165f   :  { %v4830_v7 = vsel %vm4798_vm12, %v4760_v6, %v4814_v55  ;;  %v4770_v60 = vadd.f32 %v4769_v39, %v10576_v54  ;;  %7839 = vmatprep.subr.bf16.mxu0 %v10400_v13  ;;  %v10581_v6 = vld [vmem:[#allocation3_spill] sm:$0xff] }
0x1660   :  { %v7840_v57 = vpack.c.bf16 %v4831_v50, %v4830_v7  ;;  %vm4801_vm7 = vcmp.gt.f32.partialorder %v4775_v62, 0.0  ;;  %v4817_v9 = vmul.f32 0.01, %v4775_v62  ;;  %v10582_v50 = vld [vmem:[#allocation4_spill] sm:$0xff]  ;;  %v10583_v7 = vld [vmem:[#allocation2_spill] sm:$0xff] }
0x1661   :  { %vm4800_vm13 = vcmp.gt.f32.partialorder %v4770_v60, 0.0  ;;  %v4816_v34 = vmul.f32 0.01, %v4770_v60  ;;  %v7219_v16 = vpop.f32.mrb[134].mxu1 }
0x1662   :  { %v4833_v30 = vsel %vm4801_vm7, %v4775_v62, %v4817_v9  ;;  %v4785_v17 = vadd.f32 %v7219_v16, %v10577_v58  ;;  %v4779_v11 = vpop.f32.mrb[135].mxu1  ;;  %7841 = vmatpush3.bf16.msra.mxu0 %v7840_v57  ;;  %v10584_v16 = vld [vmem:[#allocation6_spill] sm:$0xff] }
0x1663   :  { %v4832_v49 = vsel %vm4800_vm13, %v4770_v60, %v4816_v34  ;;  %v4780_v42 = vadd.f32 %v4779_v11, %v10578_v59  ;;  %7842 = vmatprep.subr.bf16.mxu0 %v10400_v13  ;;  %v10585_v11 = vld [vmem:[#allocation7_spill] sm:$0xff] }
0x1664   :  { %v7843_v19 = vpack.c.bf16 %v4833_v30, %v4832_v49  ;;  %vm4803_vm14 = vcmp.gt.f32.partialorder %v4785_v17, 0.0  ;;  %v4819_v33 = vmul.f32 0.01, %v4785_v17 }
0x1665   :  { %vm4802_vm15 = vcmp.gt.f32.partialorder %v4780_v42, 0.0  ;;  %v4818_v15 = vmul.f32 0.01, %v4780_v42 }
0x1666   :  { %v4835_v46 = vsel %vm4803_vm14, %v4785_v17, %v4819_v33  ;;  %7844 = vmatpush3.bf16.msra.mxu0 %v7843_v19 }
0x1667   :  { %v4834_v38 = vsel %vm4802_vm15, %v4780_v42, %v4818_v15  ;;  %7845 = vmatprep.subr.bf16.mxu0 %v10400_v13 }
0x1668   :  { %v7846_v63 = vpack.c.bf16 %v4835_v46, %v4834_v38  ;;  %v10586_v46 = vld [vmem:[#allocation8_spill] sm:$0xff] }
0x166a   :  { %7847 = vmatpush3.bf16.msra.mxu0 %v7846_v63 }
0x166d   :  { %7253 = vmatmul.mubr.f32.vlgmr.msra.gmra.mrb[152].mxu0 %v8102_v0 }
0x166e   :  { %7257 = vmatprep.mubr.msk.f32.mxu0 %vm138_vm0, %v8103_v28  ;;  %v10587_v28 = vld [vmem:[#allocation9_spill] sm:$0xff] }
0x1740   :  { %v4902_v12 = vpop.f32.mrb[152].mxu0 }
0x1741   :  { %v4903_v43 = vadd.f32 %v4902_v12, %v10579_v27  ;;  %v7254_v14 = vpop.f32.mrb[153].mxu0 }
0x1743   :  { %7960 = vtanh.f32 %v4903_v43  ;;  %v4911_v37 = vrot.slane %v4903_v43, 2 }
0x174d   :  { %v7961_v1 = vpop.eup %7960 }
0x174e   :  { %v4907_v24 = vmul.f32 1.442695, %v7961_v1 }
0x1750   :  { %7962 = vpow2.f32 %v4907_v24 }
0x175a   :  { %v7963_v25 = vpop.eup %7962 }
0x175b   :  { %v4909_v44 = vmul.f32 %v8104_v21, %v7963_v25  ;;  %v10588_v25 = vld [vmem:[#allocation10_spill] sm:$0xff] }
0x175d   :  { %v4913_v35 = vadd.f32 %v4911_v37, %v4909_v44 }
0x175f   :  { %5383 = vst.msk [vmem:[%s10156_s11 + $0x2] sm:$0x3] %vm5381_vm5, %v4913_v35  ;;  %7255 = vmatprep.subr.msk.mxu0 %vm171_vm1, %v4913_v35 }
0x1760   :  { %7256 = vmatpush3.msk.msra.mxu0 %vm171_vm1, %v4913_v35  ;;  %v10589_v35 = vld [vmem:[#allocation11_spill] sm:$0xff] }
0x1761   :  { %7258 = vmatmul.mubr.msk.f32.vlgmr.msra.gmra.mrb[154].mxu0 %vm138_vm0, %v8105_v8  ;;  %7880 = vmatprep.subr.bf16.mxu0 %v10400_v13 }
0x1762   :  { %7260 = vmatprep.mubr.msk.f32.mxu0 %vm138_vm0, %v8106_v4 }
0x1765   :  { %7261 = vmatmul.mubr.msk.f32.gmra.mrb[156].mxu0 %vm138_vm0, %v8107_v26 }
0x1766   :  { %7263 = vmatprep.mubr.msk.f32.mxu0 %vm138_vm0, %v8108_v22 }
0x1769   :  { %7264 = vmatmul.mubr.msk.f32.gmra.mrb[158].mxu0 %vm138_vm0, %v8109_v45 }
0x176a   :  { %7266 = vmatprep.mubr.msk.f32.mxu0 %vm138_vm0, %v8110_v48 }
0x176d   :  { %7267 = vmatmul.mubr.msk.f32.gmra.mrb[160].mxu0 %vm138_vm0, %v8111_v23  ;;  %v10590_v23 = vld [vmem:[#allocation12_spill] sm:$0xff] }
0x176e   :  { %7269 = vmatprep.mubr.msk.f32.mxu0 %vm138_vm0, %v8112_v47 }
0x1771   :  { %7270 = vmatmul.mubr.msk.f32.gmra.mrb[162].mxu0 %vm138_vm0, %v8113_v36 }
0x1772   :  { %7272 = vmatprep.mubr.msk.f32.mxu0 %vm138_vm0, %v8114_v10 }
0x1775   :  { %7273 = vmatmul.mubr.msk.f32.gmra.mrb[164].mxu0 %vm138_vm0, %v8115_v40  ;;  %v10591_v40 = vld [vmem:[#allocation13_spill] sm:$0xff] }
0x1776   :  { %7275 = vmatprep.mubr.msk.f32.mxu0 %vm138_vm0, %v8116_v51 }
0x1779   :  { %7276 = vmatmul.mubr.msk.f32.gmra.mrb[166].mxu0 %vm138_vm0, %v8117_v41 }
0x177a   :  { %7278 = vmatprep.mubr.msk.f32.mxu0 %vm138_vm0, %v8118_v56 }
0x177d   :  { %7279 = vmatmul.mubr.msk.f32.gmra.mrb[168].mxu0 %vm138_vm0, %v8119_v2 }
0x177e   :  { %7369 = vmatprep.mubr.msk.f32.mxu0 %vm8139_vm4, %v10411_v61 }
0x1834   :  { %v7259_v18 = vpop.f32.mrb[154].mxu0 }
0x1835   :  { %v4989_v31 = vadd.f32 %v7259_v18, %v10580_v32  ;;  %v4983_v53 = vpop.f32.mrb[155].mxu0 }
0x1836   :  { %v4984_v29 = vadd.f32 %v4983_v53, %v10581_v6 }
0x1837   :  { %vm5063_vm1 = vcmp.gt.f32.partialorder %v4989_v31, 0.0  ;;  %v5079_v5 = vmul.f32 0.01, %v4989_v31 }
0x1838   :  { %vm5062_vm2 = vcmp.gt.f32.partialorder %v4984_v29, 0.0  ;;  %v5078_v55 = vmul.f32 0.01, %v4984_v29  ;;  %v7262_v3 = vpop.f32.mrb[156].mxu0 }
0x1839   :  { %v4999_v20 = vadd.f32 %v7262_v3, %v10582_v50  ;;  %v4993_v62 = vpop.f32.mrb[157].mxu0  ;;  %v5095_v39 = vsel %vm5063_vm1, %v4989_v31, %v5079_v5  ;;  %v10592_v31 = vld [vmem:[#allocation14_spill] sm:$0xff]  ;;  %v10593_v5 = vld [vmem:[#allocation15_spill] sm:$0xff] }
0x183a   :  { %v4994_v54 = vadd.f32 %v4993_v62, %v10583_v7  ;;  %v5094_v60 = vsel %vm5062_vm2, %v4984_v29, %v5078_v55  ;;  %v10594_v7 = vld [vmem:[#allocation16_spill] sm:$0xff] }
0x183b   :  { %vm5065_vm0 = vcmp.gt.f32.partialorder %v4999_v20, 0.0  ;;  %v5081_v61 = vmul.f32 0.01, %v4999_v20  ;;  %v7848_v57 = vpack.c.bf16 %v5095_v39, %v5094_v60 }
0x183c   :  { %vm5064_vm4 = vcmp.gt.f32.partialorder %v4994_v54, 0.0  ;;  %v5080_v9 = vmul.f32 0.01, %v4994_v54  ;;  %v7265_v34 = vpop.f32.mrb[158].mxu0 }
0x183d   :  { %v5009_v30 = vadd.f32 %v7265_v34, %v10584_v16  ;;  %v5003_v58 = vpop.f32.mrb[159].mxu0  ;;  %7849 = vmatprep.subr.bf16.mxu1 %v7848_v57  ;;  %v5097_v17 = vsel %vm5065_vm0, %v4999_v20, %v5081_v61 }
0x183e   :  { %v5004_v49 = vadd.f32 %v5003_v58, %v10585_v11  ;;  %7851 = vmatpush3.bf16.msra.mxu1 %v7848_v57  ;;  %v5096_v59 = vsel %vm5064_vm4, %v4994_v54, %v5080_v9  ;;  %v10595_v57 = vld [vmem:[#allocation17_spill] sm:$0xff] }
0x183f   :  { %vm5067_vm3 = vcmp.gt.f32.partialorder %v5009_v30, 0.0  ;;  %v5083_v42 = vmul.f32 0.01, %v5009_v30  ;;  %v7852_v19 = vpack.c.bf16 %v5097_v17, %v5096_v59  ;;  %v8120_v59 = vld [vmem:[%s10152_s4 + $0x108] sm:$0xff] }
0x1840   :  { %vm5066_vm6 = vcmp.gt.f32.partialorder %v5004_v49, 0.0  ;;  %v5082_v33 = vmul.f32 0.01, %v5004_v49  ;;  %v7268_v15 = vpop.f32.mrb[160].mxu0 }
0x1841   :  { %v5019_v38 = vadd.f32 %v7268_v15, %v10586_v46  ;;  %v5013_v63 = vpop.f32.mrb[161].mxu0  ;;  %7853 = vmatprep.subr.bf16.mxu1 %v7852_v19  ;;  %v5099_v0 = vsel %vm5067_vm3, %v5009_v30, %v5083_v42  ;;  %v8121_v42 = vld [vmem:[%s10152_s4 + $0x110] sm:$0xff]  ;;  %v8124_v15 = vld [vmem:[%s10152_s4 + $0x128] sm:$0xff] }
0x1842   :  { %v5014_v12 = vadd.f32 %v5013_v63, %v10587_v28  ;;  %7855 = vmatpush3.bf16.msra.mxu1 %v7852_v19  ;;  %v5098_v27 = vsel %vm5066_vm6, %v5004_v49, %v5082_v33  ;;  %v8122_v19 = vld [vmem:[%s10152_s4 + $0x118] sm:$0xff]  ;;  %v8123_v33 = vld [vmem:[%s10152_s4 + $0x120] sm:$0xff]  ;;  %v8125_v46 = vld [vmem:[%s10152_s4 + $0x130] sm:$0xff] }
0x1843   :  { %vm5069_vm8 = vcmp.gt.f32.partialorder %v5019_v38, 0.0  ;;  %v5085_v43 = vmul.f32 0.01, %v5019_v38  ;;  %v7856_v14 = vpack.c.bf16 %v5099_v0, %v5098_v27  ;;  %v8127_v63 = vld [vmem:[%s10152_s4 + $0x140] sm:$0xff]  ;;  %v8128_v0 = vld [vmem:[%s10152_s4 + $0x148] sm:$0xff]  ;;  %v8129_v28 = vld [vmem:[%s10152_s4 + $0x150] sm:$0xff] }
0x1844   :  { %vm5068_vm9 = vcmp.gt.f32.partialorder %v5014_v12, 0.0  ;;  %v5084_v1 = vmul.f32 0.01, %v5014_v12  ;;  %v7271_v24 = vpop.f32.mrb[162].mxu0  ;;  %v8131_v27 = vld [vmem:[%s10152_s4 + $0x160] sm:$0xff] }
0x1845   :  { %v5029_v21 = vadd.f32 %v7271_v24, %v10588_v25  ;;  %v5023_v44 = vpop.f32.mrb[163].mxu0  ;;  %7857 = vmatprep.subr.bf16.mxu1 %v7856_v14  ;;  %v5101_v37 = vsel %vm5069_vm8, %v5019_v38, %v5085_v43  ;;  %v8126_v38 = vld [vmem:[%s10152_s4 + $0x138] sm:$0xff]  ;;  %v8132_v43 = vld [vmem:[%s10152_s4 + $0x168] sm:$0xff] }
0x1846   :  { %v5024_v8 = vadd.f32 %v5023_v44, %v10589_v35  ;;  %7859 = vmatpush3.bf16.msra.mxu1 %v7856_v14  ;;  %v5100_v4 = vsel %vm5068_vm9, %v5014_v12, %v5084_v1  ;;  %v8130_v12 = vld [vmem:[%s10152_s4 + $0x158] sm:$0xff]  ;;  %v8133_v14 = vld [vmem:[%s10152_s4 + $0x170] sm:$0xff]  ;;  %v10596_v25 = vld [vmem:[#allocation19_spill] sm:$0xff] }
0x1847   :  { %vm5071_vm10 = vcmp.gt.f32.partialorder %v5029_v21, 0.0  ;;  %v5087_v26 = vmul.f32 0.01, %v5029_v21  ;;  %v7860_v22 = vpack.c.bf16 %v5101_v37, %v5100_v4  ;;  %v8134_v1 = vld [vmem:[%s10152_s4 + $0x178] sm:$0xff]  ;;  %v10597_v37 = vld [vmem:[#allocation18_spill] sm:$0xff] }
0x1848   :  { %vm5070_vm11 = vcmp.gt.f32.partialorder %v5024_v8, 0.0  ;;  %v5086_v45 = vmul.f32 0.01, %v5024_v8  ;;  %v7274_v48 = vpop.f32.mrb[164].mxu0 }
0x1849   :  { %v5039_v47 = vadd.f32 %v7274_v48, %v10590_v23  ;;  %v5033_v36 = vpop.f32.mrb[165].mxu0  ;;  %7861 = vmatprep.subr.bf16.mxu1 %v7860_v22  ;;  %v5103_v10 = vsel %vm5071_vm10, %v5029_v21, %v5087_v26 }
0x184a   :  { %v5034_v51 = vadd.f32 %v5033_v36, %v10591_v40  ;;  %7863 = vmatpush3.bf16.msra.mxu1 %v7860_v22  ;;  %v5102_v41 = vsel %vm5070_vm11, %v5024_v8, %v5086_v45  ;;  %v10598_v45 = vld [vmem:[#allocation20_spill] sm:$0xff]  ;;  %v10599_v36 = vld [vmem:[#allocation21_spill] sm:$0xff] }
0x184b   :  { %vm5073_vm12 = vcmp.gt.f32.partialorder %v5039_v47, 0.0  ;;  %v5089_v56 = vmul.f32 0.01, %v5039_v47  ;;  %v7864_v2 = vpack.c.bf16 %v5103_v10, %v5102_v41 }
0x184c   :  { %vm5072_vm7 = vcmp.gt.f32.partialorder %v5034_v51, 0.0  ;;  %v5088_v18 = vmul.f32 0.01, %v5034_v51  ;;  %v7277_v32 = vpop.f32.mrb[166].mxu0 }
0x184d   :  { %v5049_v53 = vadd.f32 %v7277_v32, %v10592_v31  ;;  %v5043_v6 = vpop.f32.mrb[167].mxu0  ;;  %7865 = vmatprep.subr.bf16.mxu1 %v7864_v2  ;;  %v5105_v29 = vsel %vm5073_vm12, %v5039_v47, %v5089_v56 }
0x184e   :  { %v5044_v55 = vadd.f32 %v5043_v6, %v10593_v5  ;;  %7867 = vmatpush3.bf16.msra.mxu1 %v7864_v2  ;;  %v5104_v3 = vsel %vm5072_vm7, %v5034_v51, %v5088_v18  ;;  %v10600_v18 = vld [vmem:[#allocation22_spill] sm:$0xff]  ;;  %v10601_v6 = vld [vmem:[#allocation23_spill] sm:$0xff] }
0x184f   :  { %vm5075_vm13 = vcmp.gt.f32.partialorder %v5049_v53, 0.0  ;;  %v5091_v50 = vmul.f32 0.01, %v5049_v53  ;;  %v7868_v20 = vpack.c.bf16 %v5105_v29, %v5104_v3 }
0x1850   :  { %vm5074_vm14 = vcmp.gt.f32.partialorder %v5044_v55, 0.0  ;;  %v5090_v62 = vmul.f32 0.01, %v5044_v55  ;;  %v7280_v39 = vpop.f32.mrb[168].mxu0 }
0x1851   :  { %v5059_v54 = vadd.f32 %v7280_v39, %v10594_v7  ;;  %v5053_v60 = vpop.f32.mrb[169].mxu0  ;;  %7869 = vmatprep.subr.bf16.mxu1 %v7868_v20  ;;  %v5107_v61 = vsel %vm5075_vm13, %v5049_v53, %v5091_v50 }
0x1852   :  { %v5054_v9 = vadd.f32 %v5053_v60, %v10595_v57  ;;  %7871 = vmatpush3.bf16.msra.mxu1 %v7868_v20  ;;  %v5106_v34 = vsel %vm5074_vm14, %v5044_v55, %v5090_v62  ;;  %v10602_v62 = vld [vmem:[#allocation24_spill] sm:$0xff]  ;;  %v10603_v60 = vld [vmem:[#allocation25_spill] sm:$0xff] }
0x1853   :  { %vm5077_vm15 = vcmp.gt.f32.partialorder %v5059_v54, 0.0  ;;  %v5093_v16 = vmul.f32 0.01, %v5059_v54  ;;  %v7872_v30 = vpack.c.bf16 %v5107_v61, %v5106_v34 }
0x1854   :  { %vm5076_vm1 = vcmp.gt.f32.partialorder %v5054_v9, 0.0  ;;  %v5092_v58 = vmul.f32 0.01, %v5054_v9 }
0x1855   :  { %7873 = vmatprep.subr.bf16.mxu1 %v7872_v30  ;;  %v5109_v17 = vsel %vm5077_vm15, %v5059_v54, %v5093_v16 }
0x1856   :  { %7875 = vmatpush3.bf16.msra.mxu1 %v7872_v30  ;;  %v5108_v11 = vsel %vm5076_vm1, %v5054_v9, %v5092_v58  ;;  %v10604_v58 = vld [vmem:[#allocation26_spill] sm:$0xff] }
0x1857   :  { %v7876_v49 = vpack.c.bf16 %v5109_v17, %v5108_v11 }
0x1859   :  { %7877 = vmatprep.subr.bf16.mxu1 %v7876_v49 }
0x185a   :  { %7879 = vmatpush3.bf16.msra.mxu1 %v7876_v49 }
0x185d   :  { %7314 = vmatmul.mubr.f32.vlgmr.msra.gmra.mrb[136].mxu1 %v8120_v59  ;;  %v10605_v59 = vld [vmem:[#allocation27_spill] sm:$0xff] }
0x185e   :  { %7316 = vmatprep.mubr.f32.mxu1 %v8121_v42 }
0x1861   :  { %7317 = vmatmul.mubr.f32.gmra.mrb[138].mxu1 %v8122_v19 }
0x1862   :  { %7319 = vmatprep.mubr.f32.mxu1 %v8123_v33 }
0x1865   :  { %7320 = vmatmul.mubr.f32.gmra.mrb[140].mxu1 %v8124_v15 }
0x1866   :  { %7322 = vmatprep.mubr.f32.mxu1 %v8125_v46 }
0x1869   :  { %7323 = vmatmul.mubr.f32.gmra.mrb[142].mxu1 %v8126_v38 }
0x186a   :  { %7325 = vmatprep.mubr.f32.mxu1 %v8127_v63  ;;  %v10606_v63 = vld [vmem:[#allocation28_spill] sm:$0xff] }
0x186d   :  { %7326 = vmatmul.mubr.f32.gmra.mrb[144].mxu1 %v8128_v0 }
0x186e   :  { %7328 = vmatprep.mubr.f32.mxu1 %v8129_v28 }
0x1871   :  { %7329 = vmatmul.mubr.f32.gmra.mrb[146].mxu1 %v8130_v12 }
0x1872   :  { %7331 = vmatprep.mubr.f32.mxu1 %v8131_v27  ;;  %v10607_v27 = vld [vmem:[#allocation29_spill] sm:$0xff] }
0x1875   :  { %7332 = vmatmul.mubr.f32.gmra.mrb[148].mxu1 %v8132_v43 }
0x1876   :  { %7334 = vmatprep.mubr.f32.mxu1 %v8133_v14 }
0x1879   :  { %7335 = vmatmul.mubr.f32.gmra.mrb[150].mxu1 %v8134_v1 }
0x1930   :  { %v7315_v24 = vpop.f32.mrb[136].mxu1 }
0x1931   :  { %v5182_v21 = vadd.f32 %v7315_v24, %v10596_v25  ;;  %v5176_v44 = vpop.f32.mrb[137].mxu1 }
0x1932   :  { %v5177_v35 = vadd.f32 %v5176_v44, %v10597_v37  ;;  %v10608_v44 = vld [vmem:[#allocation30_spill] sm:$0xff] }
0x1933   :  { %vm5256_vm2 = vcmp.gt.f32.partialorder %v5182_v21, 0.0  ;;  %v5272_v8 = vmul.f32 0.01, %v5182_v21 }
0x1934   :  { %vm5255_vm0 = vcmp.gt.f32.partialorder %v5177_v35, 0.0  ;;  %v5271_v4 = vmul.f32 0.01, %v5177_v35  ;;  %v7318_v26 = vpop.f32.mrb[138].mxu1 }
0x1935   :  { %v5288_v22 = vsel %vm5256_vm2, %v5182_v21, %v5272_v8  ;;  %v5192_v48 = vadd.f32 %v7318_v26, %v10598_v45  ;;  %v5186_v23 = vpop.f32.mrb[139].mxu1 }
0x1936   :  { %v5287_v47 = vsel %vm5255_vm0, %v5177_v35, %v5271_v4  ;;  %v5187_v10 = vadd.f32 %v5186_v23, %v10599_v36  ;;  %v10609_v4 = vld [vmem:[#allocation31_spill] sm:$0xff]  ;;  %v10610_v36 = vld [vmem:[#allocation32_spill] sm:$0xff] }
0x1937   :  { %v7881_v40 = vpack.c.bf16 %v5288_v22, %v5287_v47  ;;  %vm5258_vm4 = vcmp.gt.f32.partialorder %v5192_v48, 0.0  ;;  %v5274_v51 = vmul.f32 0.01, %v5192_v48 }
0x1938   :  { %vm5257_vm3 = vcmp.gt.f32.partialorder %v5187_v10, 0.0  ;;  %v5273_v41 = vmul.f32 0.01, %v5187_v10  ;;  %v7321_v56 = vpop.f32.mrb[140].mxu1 }
0x1939   :  { %v5290_v2 = vsel %vm5258_vm4, %v5192_v48, %v5274_v51  ;;  %v5202_v32 = vadd.f32 %v7321_v56, %v10600_v18  ;;  %v5196_v31 = vpop.f32.mrb[141].mxu1  ;;  %7882 = vmatpush3.bf16.msra.mxu0 %v7881_v40 }
0x193a   :  { %v5289_v53 = vsel %vm5257_vm3, %v5187_v10, %v5273_v41  ;;  %v5197_v29 = vadd.f32 %v5196_v31, %v10601_v6  ;;  %7883 = vmatprep.subr.bf16.mxu0 %v10400_v13  ;;  %v10611_v41 = vld [vmem:[#allocation33_spill] sm:$0xff] }
0x193b   :  { %v7884_v5 = vpack.c.bf16 %v5290_v2, %v5289_v53  ;;  %vm5260_vm6 = vcmp.gt.f32.partialorder %v5202_v32, 0.0  ;;  %v5276_v55 = vmul.f32 0.01, %v5202_v32 }
0x193c   :  { %vm5259_vm8 = vcmp.gt.f32.partialorder %v5197_v29, 0.0  ;;  %v5275_v3 = vmul.f32 0.01, %v5197_v29  ;;  %v7324_v50 = vpop.f32.mrb[142].mxu1 }
0x193d   :  { %v5292_v20 = vsel %vm5260_vm6, %v5202_v32, %v5276_v55  ;;  %v5212_v39 = vadd.f32 %v7324_v50, %v10602_v62  ;;  %v5206_v7 = vpop.f32.mrb[143].mxu1  ;;  %7885 = vmatpush3.bf16.msra.mxu0 %v7884_v5  ;;  %v10612_v55 = vld [vmem:[#allocation34_spill] sm:$0xff] }
0x193e   :  { %v5291_v54 = vsel %vm5259_vm8, %v5197_v29, %v5275_v3  ;;  %v5207_v61 = vadd.f32 %v5206_v7, %v10603_v60  ;;  %7886 = vmatprep.subr.bf16.mxu0 %v10400_v13  ;;  %v8135_v29 = vld [vmem:[%s10154_s5 + $0x8] sm:$0xf] }
0x193f   :  { %v7887_v57 = vpack.c.bf16 %v5292_v20, %v5291_v54  ;;  %vm5262_vm9 = vcmp.gt.f32.partialorder %v5212_v39, 0.0  ;;  %v5278_v9 = vmul.f32 0.01, %v5212_v39 }
0x1940   :  { %vm5261_vm10 = vcmp.gt.f32.partialorder %v5207_v61, 0.0  ;;  %v5277_v34 = vmul.f32 0.01, %v5207_v61  ;;  %v7327_v16 = vpop.f32.mrb[144].mxu1 }
0x1941   :  { %v5294_v30 = vsel %vm5262_vm9, %v5212_v39, %v5278_v9  ;;  %v5222_v17 = vadd.f32 %v7327_v16, %v10604_v58  ;;  %v5216_v11 = vpop.f32.mrb[145].mxu1  ;;  %7888 = vmatpush3.bf16.msra.mxu0 %v7887_v57 }
0x1942   :  { %v5293_v49 = vsel %vm5261_vm10, %v5207_v61, %v5277_v34  ;;  %v5217_v42 = vadd.f32 %v5216_v11, %v10605_v59  ;;  %7889 = vmatprep.subr.bf16.mxu0 %v10400_v13 }
0x1943   :  { %v7890_v19 = vpack.c.bf16 %v5294_v30, %v5293_v49  ;;  %vm5264_vm11 = vcmp.gt.f32.partialorder %v5222_v17, 0.0  ;;  %v5280_v33 = vmul.f32 0.01, %v5222_v17 }
0x1944   :  { %vm5263_vm12 = vcmp.gt.f32.partialorder %v5217_v42, 0.0  ;;  %v5279_v15 = vmul.f32 0.01, %v5217_v42  ;;  %v7330_v46 = vpop.f32.mrb[146].mxu1 }
0x1945   :  { %v5296_v38 = vsel %vm5264_vm11, %v5222_v17, %v5280_v33  ;;  %v5232_v0 = vadd.f32 %v7330_v46, %v10606_v63  ;;  %v5226_v28 = vpop.f32.mrb[147].mxu1  ;;  %7891 = vmatpush3.bf16.msra.mxu0 %v7890_v19 }
0x1946   :  { %v5295_v12 = vsel %vm5263_vm12, %v5217_v42, %v5279_v15  ;;  %v5227_v43 = vadd.f32 %v5226_v28, %v10607_v27  ;;  %7892 = vmatprep.subr.bf16.mxu0 %v10400_v13 }
0x1947   :  { %v7893_v14 = vpack.c.bf16 %v5296_v38, %v5295_v12  ;;  %vm5266_vm7 = vcmp.gt.f32.partialorder %v5232_v0, 0.0  ;;  %v5282_v1 = vmul.f32 0.01, %v5232_v0 }
0x1948   :  { %vm5265_vm13 = vcmp.gt.f32.partialorder %v5227_v43, 0.0  ;;  %v5281_v24 = vmul.f32 0.01, %v5227_v43  ;;  %v7333_v25 = vpop.f32.mrb[148].mxu1 }
0x1949   :  { %v5298_v21 = vsel %vm5266_vm7, %v5232_v0, %v5282_v1  ;;  %v5242_v37 = vadd.f32 %v7333_v25, %v10608_v44  ;;  %v5236_v35 = vpop.f32.mrb[149].mxu1  ;;  %7894 = vmatpush3.bf16.msra.mxu0 %v7893_v14 }
0x194a   :  { %v5297_v8 = vsel %vm5265_vm13, %v5227_v43, %v5281_v24  ;;  %v5237_v26 = vadd.f32 %v5236_v35, %v10609_v4  ;;  %7895 = vmatprep.subr.bf16.mxu0 %v10400_v13 }
0x194b   :  { %v7896_v22 = vpack.c.bf16 %v5298_v21, %v5297_v8  ;;  %vm5268_vm14 = vcmp.gt.f32.partialorder %v5242_v37, 0.0  ;;  %v5284_v45 = vmul.f32 0.01, %v5242_v37 }
0x194c   :  { %vm5267_vm15 = vcmp.gt.f32.partialorder %v5237_v26, 0.0  ;;  %v5283_v48 = vmul.f32 0.01, %v5237_v26  ;;  %v7336_v23 = vpop.f32.mrb[150].mxu1 }
0x194d   :  { %v5300_v47 = vsel %vm5268_vm14, %v5242_v37, %v5284_v45  ;;  %v5252_v10 = vadd.f32 %v7336_v23, %v10610_v36  ;;  %v5246_v40 = vpop.f32.mrb[151].mxu1  ;;  %7897 = vmatpush3.bf16.msra.mxu0 %v7896_v22 }
0x194e   :  { %v5299_v51 = vsel %vm5267_vm15, %v5237_v26, %v5283_v48  ;;  %v5247_v56 = vadd.f32 %v5246_v40, %v10611_v41  ;;  %7898 = vmatprep.subr.bf16.mxu0 %v10400_v13 }
0x194f   :  { %v7899_v2 = vpack.c.bf16 %v5300_v47, %v5299_v51  ;;  %vm5270_vm1 = vcmp.gt.f32.partialorder %v5252_v10, 0.0  ;;  %v5286_v18 = vmul.f32 0.01, %v5252_v10 }
0x1950   :  { %vm5269_vm2 = vcmp.gt.f32.partialorder %v5247_v56, 0.0  ;;  %v5285_v32 = vmul.f32 0.01, %v5247_v56 }
0x1951   :  { %v5302_v31 = vsel %vm5270_vm1, %v5252_v10, %v5286_v18  ;;  %7900 = vmatpush3.bf16.msra.mxu0 %v7899_v2 }
0x1952   :  { %v5301_v53 = vsel %vm5269_vm2, %v5247_v56, %v5285_v32  ;;  %7901 = vmatprep.subr.bf16.mxu0 %v10400_v13 }
0x1953   :  { %v7902_v6 = vpack.c.bf16 %v5302_v31, %v5301_v53 }
0x1955   :  { %7903 = vmatpush3.bf16.msra.mxu0 %v7902_v6 }
0x1958   :  { %7370 = vmatmul.mubr.f32.vlgmr.msra.gmra.mrb[170].mxu0 %v8135_v29 }
0x1a2b   :  { %v5369_v5 = vpop.f32.mrb[170].mxu0 }
0x1a2c   :  { %v5370_v3 = vadd.f32 %v5369_v5, %v10612_v55  ;;  %v7371_v50 = vpop.f32.mrb[171].mxu0 }
0x1a2e   :  { %7964 = vtanh.f32 %v5370_v3  ;;  %v5378_v54 = vrot.slane %v5370_v3, 2 }
0x1a38   :  { %v7965_v20 = vpop.eup %7964 }
0x1a39   :  { %v5374_v62 = vmul.f32 1.442695, %v7965_v20 }
0x1a3b   :  { %7966 = vpow2.f32 %v5374_v62 }
0x1a45   :  { %v7967_v39 = vpop.eup %7966 }
0x1a46   :  { %v5376_v7 = vmul.f32 %v7967_v39, %v9821_v52 }
0x1a48   :  { %v5380_v13 = vadd.f32 %v5378_v54, %v5376_v7 }
0x1a4a   :  { %5382 = vst.msk [vmem:[%s10156_s11] sm:$0x3] %vm5381_vm5, %v5380_v13 }

</bundles_post_ra>
